<compile_context>
chip_gen: v6e
topology: v6e:2x2x1
jax: 0.10.0
libtpu: 0.0.40
codegen_flags: <defaults>
</compile_context>

<pallas_src>
import functools
import math

import numpy as np

import jax
import jax.numpy as jnp
from jax import lax
from jax.experimental import pallas as pl
from jax.experimental.pallas import tpu as pltpu

EPS = 1e-5           # PyTorch BatchNorm default eps
LEAKY_SLOPE = 0.1    # nn.LeakyReLU(0.1)
LANE = 128           # TPU lane width; all activations padded to this
N_STAGES = 5         # fixed by the module's channel list


def _layer_dims(h0):
    """(H_in, H_out) of the 15 (de)conv layers for unflattened height h0."""
    dims = []
    h = h0
    for _ in range(N_STAGES):
        dims.append((h, 2 * h))          # ConvTranspose2d, stride 2
        h *= 2
        dims.extend([(h, h), (h, h)])    # two stride-1 Conv2d
    return tuple(dims)


# --------------------------------------------------------------------------
# Shared layer-stack math (works on Pallas refs AND on plain jnp arrays)
# --------------------------------------------------------------------------
def _run_conv_stack(x, r_all, l_stages, st_all, dims, bb):
    """15 fused (de)conv + BN + LeakyReLU layers + final Tanh.

    x        : (bb*H0, 128) f32 activation, batch folded into rows.
    r_all    : (15, 3*128, 128) bf16  kw/channel taps, kh taps stacked on K.
    l_stages : 5 tensors (3, 3*bb*H_s, bb*H_s) bf16  0/1 row-tap matrices.
    st_all   : (15, 2, 128) f32  folded conv-bias + BatchNorm scale / shift.
    """
    n_layers = len(dims)
    for li, (h_in, h_out) in enumerate(dims):
        stage, slot = divmod(li, 3)
        m_in, m_out = bb * h_in, bb * h_out
        l_mat = l_stages[stage][slot, :, :m_in]            # (3*m_out, m_in)
        # kh taps as one exact row-gather matmul (L entries are 0/1).
        u = jnp.dot(l_mat, x.astype(jnp.bfloat16),
                    preferred_element_type=jnp.float32)    # (3*m_out, 128)
        # Lane-concat the three tap blocks -> single K=384 matmul over kw/cin.
        u_wide = jnp.concatenate(
            [u[0:m_out], u[m_out:2 * m_out], u[2 * m_out:3 * m_out]],
            axis=1).astype(jnp.bfloat16)                   # (m_out, 384)
        acc = jnp.dot(u_wide, r_all[li],
                      preferred_element_type=jnp.float32)  # (m_out, 128)
        y = acc * st_all[li, 0:1, :] + st_all[li, 1:2, :]  # bias + BN folded
        y = jnp.where(y > 0, y, LEAKY_SLOPE * y)           # LeakyReLU(0.1)
        if li == n_layers - 1:
            y = jnp.tanh(y)                                # final nn.Tanh
        x = y
    return x


def _decoder_kernel(dims, bb, x_ref, r_ref, l0, l1, l2, l3, l4, st_ref,
                    out_ref):
    out_ref[...] = _run_conv_stack(x_ref[...], r_ref, (l0, l1, l2, l3, l4),
                                   st_ref, dims, bb)


# --------------------------------------------------------------------------
# Forward pass
# --------------------------------------------------------------------------
def _front_end(z, params, conv_input_shape):
    """Dropout(eval) + Linear + BatchNorm1d + ReLU + Unflatten, lane-padded."""
    # TODO(synk): nn.Dropout(0.1) is stochastic in training mode; inference
    # identity is used here.
    c0, h0, w0 = conv_input_shape
    n = z.shape[0]
    h = jnp.dot(z, params["lin_w"], precision=lax.Precision.HIGHEST)
    h = jnp.maximum(h * params["lin_s"] + params["lin_t"], 0.0)
    # NCHW unflatten -> NHWC -> (batch*H) rows, (W*C) lanes, zero-padded.
    x = h.reshape(n, c0, h0, w0).transpose(0, 2, 3, 1).reshape(n * h0, w0 * c0)
    return jnp.pad(x, ((0, 0), (0, LANE - w0 * c0)))


def _to_image(y, n, h_img, w_img):
    return y[:, :w_img].reshape(n, h_img, w_img)[:, None, :, :]   # NCHW, C=1


def decoder_forward(z, params, *, conv_input_shape, batch_block=None):
    c0, h0, w0 = conv_input_shape
    assert w0 * c0 <= LANE
    n = z.shape[0]
    bb = n if batch_block is None else batch_block
    assert n % bb == 0
    dims = _layer_dims(h0)
    h_img, w_img = h0 * 2 ** N_STAGES, w0 * 2 ** N_STAGES

    x0 = _front_end(z, params, conv_input_shape)          # (n*h0, 128) f32
    l_stages = params["l_stages"]

    kernel = functools.partial(_decoder_kernel, dims, bb)
    in_specs = ([pl.BlockSpec((bb * h0, LANE), lambda i: (i, 0)),
                 pl.BlockSpec(params["r"].shape, lambda i: (0, 0, 0))]
                + [pl.BlockSpec(l.shape, lambda i: (0, 0, 0))
                   for l in l_stages]
                + [pl.BlockSpec(params["st"].shape, lambda i: (0, 0, 0))])

    y = pl.pallas_call(
        kernel,
        out_shape=jax.ShapeDtypeStruct((n * h_img, LANE), jnp.float32),
        grid=(n // bb,),
        in_specs=in_specs,
        out_specs=pl.BlockSpec((bb * h_img, LANE), lambda i: (i, 0)),
        compiler_params=pltpu.CompilerParams(
            dimension_semantics=("parallel",)),
    )(x0, params["r"], *l_stages, params["st"])

    return _to_image(y, n, h_img, w_img)


def decoder_emulated(z, params, *, conv_input_shape, batch_block=None):
    """Exact same math as the Pallas kernel, run by XLA (validation only)."""
    c0, h0, w0 = conv_input_shape
    n = z.shape[0]
    bb = n if batch_block is None else batch_block
    dims = _layer_dims(h0)
    h_img, w_img = h0 * 2 ** N_STAGES, w0 * 2 ** N_STAGES
    x0 = _front_end(z, params, conv_input_shape)
    blocks = []
    for i in range(n // bb):
        xi = x0[i * bb * h0:(i + 1) * bb * h0]
        blocks.append(_run_conv_stack(xi, params["r"], params["l_stages"],
                                      params["st"], dims, bb))
    return _to_image(jnp.concatenate(blocks, axis=0), n, h_img, w_img)


# --------------------------------------------------------------------------
# Parameter construction / packing
# --------------------------------------------------------------------------
def _fold_bn(gamma, beta, mean, var, bias):
    s = gamma / np.sqrt(var + EPS)
    t = beta + (bias - mean) * s
    return s.astype(np.float32), t.astype(np.float32)


def _conv_taps(w, hw):
    """Per-kh-tap (L_k, R_k) for Conv2d(k=3, s=1, p=1); w: (Co, Ci, 3, 3)."""
    co, ci = w.shape[0], w.shape[1]
    h, wd = hw
    ls, rs = [], []
    for k in range(3):
        lmat = np.zeros((h, h), np.float32)
        for oh in range(h):
            ih = oh + k - 1
            if 0 <= ih < h:
                lmat[oh, ih] = 1.0
        rmat = np.zeros((wd * ci, wd * co), np.float32)
        for ow in range(wd):
            for kw in range(3):
                iw = ow + kw - 1
                if 0 <= iw < wd:
                    rmat[iw * ci:(iw + 1) * ci, ow * co:(ow + 1) * co] = \
                        w[:, :, k, kw].T
        ls.append(lmat)
        rs.append(rmat)
    return ls, rs


def _deconv_taps(w_t, hw_in):
    """Per-kh-tap (L_k, R_k) for ConvTranspose2d(k=3, s=2, p=1, op=1);
    w_t: (Ci, Co, 3, 3)."""
    ci, co = w_t.shape[0], w_t.shape[1]
    hi, wi = hw_in
    ho, wo = 2 * hi, 2 * wi
    ls, rs = [], []
    for k in range(3):
        lmat = np.zeros((ho, hi), np.float32)
        for oh in range(ho):
            num = oh + 1 - k
            if num >= 0 and num % 2 == 0 and num // 2 < hi:
                lmat[oh, num // 2] = 1.0
        rmat = np.zeros((wi * ci, wo * co), np.float32)
        for ow in range(wo):
            for iw in range(wi):
                kw = ow + 1 - 2 * iw
                if 0 <= kw <= 2:
                    rmat[iw * ci:(iw + 1) * ci, ow * co:(ow + 1) * co] = \
                        w_t[:, :, k, kw]
        ls.append(lmat)
        rs.append(rmat)
    return ls, rs


def pack_params(raw, conv_input_shape, bb):
    """Fold BN, concat kh taps, pad to 128 lanes, fold the batch block into
    block-diagonal L, and pack everything into 8 lane-dense tensors."""
    lin_s, lin_t = _fold_bn(raw["lin_bn"]["gamma"], raw["lin_bn"]["beta"],
                            raw["lin_bn"]["mean"], raw["lin_bn"]["var"],
                            raw["lin_b"])
    packed = {"lin_w": jnp.asarray(raw["lin_w"]),
              "lin_s": jnp.asarray(lin_s),
              "lin_t": jnp.asarray(lin_t)}

    eye = np.eye(bb, dtype=np.float32)
    r_list, st_list, l_list = [], [], []
    for lyr in raw["conv_layers"]:
        s, t = _fold_bn(lyr["bn"]["gamma"], lyr["bn"]["beta"],
                        lyr["bn"]["mean"], lyr["bn"]["var"], lyr["b"])
        ls, rs = (_deconv_taps if lyr["kind"] == "deconv" else _conv_taps)(
            lyr["w"], lyr["hw_in"])
        k_in, n_out = rs[0].shape
        assert k_in <= LANE and n_out <= LANE
        r_stack = np.zeros((3 * LANE, LANE), np.float32)
        st = np.zeros((2, LANE), np.float32)
        for k in range(3):
            r_stack[k * LANE:k * LANE + k_in, :n_out] = rs[k]
        st[0, :n_out] = np.tile(s, n_out // s.shape[0])
        st[1, :n_out] = np.tile(t, n_out // t.shape[0])
        # Row-tap matrix: kh taps stacked on M, block-diagonal over the batch.
        l_all = np.concatenate([np.kron(eye, ls[k]) for k in range(3)], 0)
        r_list.append(r_stack)
        st_list.append(st)
        l_list.append(l_all)

    # One L pack per stage (same H_out for its 3 layers; deconv uses fewer
    # columns -> zero-padded into the conv-sized pack).
    l_stages = []
    for s_idx in range(N_STAGES):
        group = l_list[3 * s_idx:3 * s_idx + 3]
        m1, k1 = group[1].shape
        pack = np.zeros((3, m1, k1), np.float32)
        for j, lm in enumerate(group):
            pack[j, :lm.shape[0], :lm.shape[1]] = lm
        l_stages.append(jnp.asarray(pack, jnp.bfloat16))   # 0/1 -> exact

    packed["r"] = jnp.asarray(np.stack(r_list), jnp.bfloat16)   # (15,384,128)
    packed["st"] = jnp.asarray(np.stack(st_list), jnp.float32)  # (15,2,128)
    packed["l_stages"] = tuple(l_stages)
    return packed


def init_raw_params(key, latent_vec_size, conv_input_shape, channels_start):
    c0, h0, w0 = conv_input_shape
    d = c0 * h0 * w0
    keys = iter(jax.random.split(key, 256))
    nk = lambda: next(keys)

    def bn(c):
        # Mild random BN statistics keep activations O(1) through 15 layers.
        return dict(
            gamma=np.asarray(jax.random.uniform(nk(), (c,), minval=0.8,
                                                maxval=1.2), np.float32),
            beta=np.asarray(0.05 * jax.random.normal(nk(), (c,)), np.float32),
            mean=np.asarray(0.05 * jax.random.normal(nk(), (c,)), np.float32),
            var=np.asarray(jax.random.uniform(nk(), (c,), minval=0.8,
                                              maxval=1.2), np.float32),
        )

    raw = {
        "lin_w": np.asarray(jax.random.normal(nk(), (latent_vec_size, d))
                            / math.sqrt(latent_vec_size), np.float32),
        "lin_b": np.asarray(0.01 * jax.random.normal(nk(), (d,)), np.float32),
        "lin_bn": bn(d),
    }

    channels = [channels_start * 5, channels_start * 4, channels_start * 3,
                channels_start * 2, channels_start, 1]
    assert channels[0] == c0, "conv_input_shape[0] must be channels_start*5"

    layers = []
    h, w = h0, w0
    for i in range(1, len(channels)):
        cin, cout = channels[i - 1], channels[i]
        wt = np.asarray(jax.random.normal(nk(), (cin, cout, 3, 3))
                        * (2.8 / math.sqrt(9 * cin)), np.float32)
        bt = np.asarray(0.01 * jax.random.normal(nk(), (cout,)), np.float32)
        layers.append(dict(kind="deconv", w=wt, b=bt, bn=bn(cout),
                           hw_in=(h, w)))
        h, w = 2 * h, 2 * w
        for _ in range(2):
            wc = np.asarray(jax.random.normal(nk(), (cout, cout, 3, 3))
                            * (1.4 / math.sqrt(9 * cout)), np.float32)
            bc = np.asarray(0.01 * jax.random.normal(nk(), (cout,)),
                            np.float32)
            layers.append(dict(kind="conv", w=wc, b=bc, bn=bn(cout),
                               hw_in=(h, w)))
    raw["conv_layers"] = layers
    return raw


# --------------------------------------------------------------------------
# Pure-JAX f32 reference (lax.conv) of the PyTorch module semantics
# --------------------------------------------------------------------------
def decoder_reference(z, raw, conv_input_shape):
    c0, h0, w0 = conv_input_shape
    n = z.shape[0]

    bn = raw["lin_bn"]
    h = jnp.dot(z, raw["lin_w"], precision=lax.Precision.HIGHEST) + raw["lin_b"]
    h = (h - bn["mean"]) / np.sqrt(bn["var"] + EPS) * bn["gamma"] + bn["beta"]
    h = jnp.maximum(h, 0.0)
    x = h.reshape(n, c0, h0, w0).transpose(0, 2, 3, 1)          # NHWC

    for lyr in raw["conv_layers"]:
        w = jnp.asarray(lyr["w"])
        if lyr["kind"] == "deconv":
            # ConvTranspose2d(k=3, s=2, p=1, output_padding=1) == lhs-dilated
            # conv with flipped weights and asymmetric (1, 2) padding.
            w_hwio = jnp.transpose(jnp.flip(w, axis=(2, 3)), (2, 3, 0, 1))
            x = lax.conv_general_dilated(
                x, w_hwio, window_strides=(1, 1), padding=((1, 2), (1, 2)),
                lhs_dilation=(2, 2),
                dimension_numbers=("NHWC", "HWIO", "NHWC"),
                precision=lax.Precision.HIGHEST)
        else:
            w_hwio = jnp.transpose(w, (2, 3, 1, 0))
            x = lax.conv_general_dilated(
                x, w_hwio, window_strides=(1, 1), padding=((1, 1), (1, 1)),
                dimension_numbers=("NHWC", "HWIO", "NHWC"),
                precision=lax.Precision.HIGHEST)
        b = lyr["bn"]
        x = x + lyr["b"]
        x = (x - b["mean"]) / np.sqrt(b["var"] + EPS) * b["gamma"] + b["beta"]
        x = jnp.where(x > 0, x, LEAKY_SLOPE * x)

    return jnp.tanh(x).transpose(0, 3, 1, 2)                    # NCHW


# --------------------------------------------------------------------------
# main
# --------------------------------------------------------------------------
if __name__ == "__main__":
    key = jax.random.PRNGKey(0)
    k_param, k_in = jax.random.split(key)

    latent_vec_size = 16
    channels_start = 4
    conv_input_shape = (channels_start * 5, 2, 2)   # (C0, H0, W0): 20*2*2 = 80
    batch = 2

    raw = init_raw_params(k_param, latent_vec_size, conv_input_shape,
                          channels_start)

    # Fold the whole batch into the matmul M dimension (one grid step; best
    # for single-TensorCore v5e/v6e).  On v7x pick batch_block = batch // 2
    # so both TensorCores get a parallel grid step.
    batch_block = batch
    packed = pack_params(raw, conv_input_shape, batch_block)

    z = jax.random.normal(k_in, (batch, latent_vec_size), dtype=jnp.float32)

    fwd = jax.jit(functools.partial(decoder_forward,
                                    conv_input_shape=conv_input_shape,
                                    batch_block=batch_block))
    out = jax.block_until_ready(fwd(z, packed))

    h_img = conv_input_shape[1] * 2 ** N_STAGES
    w_img = conv_input_shape[2] * 2 ** N_STAGES
    assert out.shape == (batch, 1, h_img, w_img), out.shape
    assert bool(jnp.all(jnp.isfinite(out))), "non-finite output"

    # (a) Pallas vs. identical-math XLA emulation (catches lowering bugs).
    emu = jax.jit(functools.partial(decoder_emulated,
                                    conv_input_shape=conv_input_shape,
                                    batch_block=batch_block))(z, packed)
    err_emu = float(jnp.max(jnp.abs(out - emu)))
    assert err_emu < 1e-2, f"Pallas vs emulation mismatch: {err_emu}"

    # (b) Pallas (bf16 MXU inputs) vs. full-f32 lax.conv reference of the
    #     PyTorch module; loose tolerance covers the bf16 weight/act rounding.
    ref = decoder_reference(z, raw, conv_input_shape)
    err_ref = float(jnp.max(jnp.abs(out - ref)))
    assert err_ref < 8e-2, f"mismatch vs f32 reference: max abs err {err_ref}"

    print("KERNEL_OK")
</pallas_src>

<mosaic_0001>
module attributes {stable_mosaic.version = 11 : i64} {
  func.func @_decoder_kernel(%arg0: i32, %arg1: memref<4x128xf32, #tpu.memory_space<vmem>>, %arg2: memref<15x384x128xbf16, #tpu.memory_space<vmem>>, %arg3: memref<3x24x8xbf16, #tpu.memory_space<vmem>>, %arg4: memref<3x48x16xbf16, #tpu.memory_space<vmem>>, %arg5: memref<3x96x32xbf16, #tpu.memory_space<vmem>>, %arg6: memref<3x192x64xbf16, #tpu.memory_space<vmem>>, %arg7: memref<3x384x128xbf16, #tpu.memory_space<vmem>>, %arg8: memref<15x2x128xf32, #tpu.memory_space<vmem>>, %arg9: memref<128x128xf32, #tpu.memory_space<vmem>>) attributes {dimension_semantics = [#tpu.dimension_semantics<parallel>], iteration_bounds = array<i64: 1>, scalar_prefetch = 0 : i64, scratch_operands = 0 : i64, tpu.core_type = #tpu.core_type<tc>, window_params = [{transform_indices = @transform_0, window_bounds = array<i64: 4, 128>}, {pipeline_mode = #tpu.pipeline_mode<synchronous>, transform_indices = @transform_1, window_bounds = array<i64: 15, 384, 128>}, {pipeline_mode = #tpu.pipeline_mode<synchronous>, transform_indices = @transform_2, window_bounds = array<i64: 3, 24, 8>}, {pipeline_mode = #tpu.pipeline_mode<synchronous>, transform_indices = @transform_3, window_bounds = array<i64: 3, 48, 16>}, {pipeline_mode = #tpu.pipeline_mode<synchronous>, transform_indices = @transform_4, window_bounds = array<i64: 3, 96, 32>}, {pipeline_mode = #tpu.pipeline_mode<synchronous>, transform_indices = @transform_5, window_bounds = array<i64: 3, 192, 64>}, {pipeline_mode = #tpu.pipeline_mode<synchronous>, transform_indices = @transform_6, window_bounds = array<i64: 3, 384, 128>}, {pipeline_mode = #tpu.pipeline_mode<synchronous>, transform_indices = @transform_7, window_bounds = array<i64: 15, 2, 128>}, {transform_indices = @transform_8, window_bounds = array<i64: 128, 128>}]} {
    %c0 = arith.constant 0 : index
    %c0_0 = arith.constant 0 : index
    %0 = vector.load %arg1[%c0, %c0_0] : memref<4x128xf32, #tpu.memory_space<vmem>>, vector<4x128xf32>
    %c0_1 = arith.constant 0 : index
    %c0_2 = arith.constant 0 : index
    %c0_3 = arith.constant 0 : index
    %1 = vector.load %arg3[%c0_1, %c0_2, %c0_3] : memref<3x24x8xbf16, #tpu.memory_space<vmem>>, vector<1x24x4xbf16>
    %2 = vector.shape_cast %1 : vector<1x24x4xbf16> to vector<24x4xbf16>
    %3 = arith.truncf %0 : vector<4x128xf32> to vector<4x128xbf16>
    %cst = arith.constant dense<0.000000e+00> : vector<24x128xf32>
    %4 = tpu.matmul %2, %3, %cst {dimension_numbers = #tpu.dot_dimension_numbers<[1], [0], [0], [1], [0, 0, 1, 1], [], []>} : vector<24x4xbf16>, vector<4x128xbf16>, vector<24x128xf32> -> vector<24x128xf32>
    %5 = vector.extract_strided_slice %4 {offsets = [0, 0], sizes = [8, 128], strides = [1, 1]} : vector<24x128xf32> to vector<8x128xf32>
    %6 = vector.extract_strided_slice %4 {offsets = [8, 0], sizes = [8, 128], strides = [1, 1]} : vector<24x128xf32> to vector<8x128xf32>
    %7 = vector.extract_strided_slice %4 {offsets = [16, 0], sizes = [8, 128], strides = [1, 1]} : vector<24x128xf32> to vector<8x128xf32>
    %8 = tpu.concatenate %5, %6, %7 in 1 : vector<8x128xf32>, vector<8x128xf32>, vector<8x128xf32> -> vector<8x384xf32>
    %9 = arith.truncf %8 : vector<8x384xf32> to vector<8x384xbf16>
    %c0_4 = arith.constant 0 : index
    %c0_5 = arith.constant 0 : index
    %c0_6 = arith.constant 0 : index
    %10 = vector.load %arg2[%c0_4, %c0_5, %c0_6] : memref<15x384x128xbf16, #tpu.memory_space<vmem>>, vector<1x384x128xbf16>
    %11 = vector.shape_cast %10 : vector<1x384x128xbf16> to vector<384x128xbf16>
    %cst_7 = arith.constant dense<0.000000e+00> : vector<8x128xf32>
    %12 = tpu.matmul %9, %11, %cst_7 {dimension_numbers = #tpu.dot_dimension_numbers<[1], [0], [0], [1], [0, 0, 1, 1], [], []>} : vector<8x384xbf16>, vector<384x128xbf16>, vector<8x128xf32> -> vector<8x128xf32>
    %c0_8 = arith.constant 0 : index
    %c0_9 = arith.constant 0 : index
    %c0_10 = arith.constant 0 : index
    %13 = vector.load %arg8[%c0_8, %c0_9, %c0_10] : memref<15x2x128xf32, #tpu.memory_space<vmem>>, vector<1x1x128xf32>
    %14 = vector.shape_cast %13 : vector<1x1x128xf32> to vector<1x128xf32>
    %15 = vector.broadcast %14 : vector<1x128xf32> to vector<8x128xf32>
    %16 = arith.mulf %12, %15 : vector<8x128xf32>
    %c0_11 = arith.constant 0 : index
    %c1 = arith.constant 1 : index
    %c0_12 = arith.constant 0 : index
    %17 = vector.load %arg8[%c0_11, %c1, %c0_12] : memref<15x2x128xf32, #tpu.memory_space<vmem>>, vector<1x1x128xf32>
    %18 = vector.shape_cast %17 : vector<1x1x128xf32> to vector<1x128xf32>
    %19 = vector.broadcast %18 : vector<1x128xf32> to vector<8x128xf32>
    %20 = arith.addf %16, %19 : vector<8x128xf32>
    %cst_13 = arith.constant 0.000000e+00 : f32
    %21 = vector.broadcast %cst_13 : f32 to vector<8x128xf32>
    %22 = arith.cmpf ogt, %20, %21 : vector<8x128xf32>
    %cst_14 = arith.constant 1.000000e-01 : f32
    %23 = vector.broadcast %cst_14 : f32 to vector<8x128xf32>
    %24 = arith.mulf %23, %20 : vector<8x128xf32>
    %25 = arith.select %22, %20, %24 : vector<8x128xi1>, vector<8x128xf32>
    %c1_15 = arith.constant 1 : index
    %c0_16 = arith.constant 0 : index
    %c0_17 = arith.constant 0 : index
    %26 = vector.load %arg3[%c1_15, %c0_16, %c0_17] : memref<3x24x8xbf16, #tpu.memory_space<vmem>>, vector<1x24x8xbf16>
    %27 = vector.shape_cast %26 : vector<1x24x8xbf16> to vector<24x8xbf16>
    %28 = arith.truncf %25 : vector<8x128xf32> to vector<8x128xbf16>
    %cst_18 = arith.constant dense<0.000000e+00> : vector<24x128xf32>
    %29 = tpu.matmul %27, %28, %cst_18 {dimension_numbers = #tpu.dot_dimension_numbers<[1], [0], [0], [1], [0, 0, 1, 1], [], []>} : vector<24x8xbf16>, vector<8x128xbf16>, vector<24x128xf32> -> vector<24x128xf32>
    %30 = vector.extract_strided_slice %29 {offsets = [0, 0], sizes = [8, 128], strides = [1, 1]} : vector<24x128xf32> to vector<8x128xf32>
    %31 = vector.extract_strided_slice %29 {offsets = [8, 0], sizes = [8, 128], strides = [1, 1]} : vector<24x128xf32> to vector<8x128xf32>
    %32 = vector.extract_strided_slice %29 {offsets = [16, 0], sizes = [8, 128], strides = [1, 1]} : vector<24x128xf32> to vector<8x128xf32>
    %33 = tpu.concatenate %30, %31, %32 in 1 : vector<8x128xf32>, vector<8x128xf32>, vector<8x128xf32> -> vector<8x384xf32>
    %34 = arith.truncf %33 : vector<8x384xf32> to vector<8x384xbf16>
    %c1_19 = arith.constant 1 : index
    %c0_20 = arith.constant 0 : index
    %c0_21 = arith.constant 0 : index
    %35 = vector.load %arg2[%c1_19, %c0_20, %c0_21] : memref<15x384x128xbf16, #tpu.memory_space<vmem>>, vector<1x384x128xbf16>
    %36 = vector.shape_cast %35 : vector<1x384x128xbf16> to vector<384x128xbf16>
    %cst_22 = arith.constant dense<0.000000e+00> : vector<8x128xf32>
    %37 = tpu.matmul %34, %36, %cst_22 {dimension_numbers = #tpu.dot_dimension_numbers<[1], [0], [0], [1], [0, 0, 1, 1], [], []>} : vector<8x384xbf16>, vector<384x128xbf16>, vector<8x128xf32> -> vector<8x128xf32>
    %c1_23 = arith.constant 1 : index
    %c0_24 = arith.constant 0 : index
    %c0_25 = arith.constant 0 : index
    %38 = vector.load %arg8[%c1_23, %c0_24, %c0_25] : memref<15x2x128xf32, #tpu.memory_space<vmem>>, vector<1x1x128xf32>
    %39 = vector.shape_cast %38 : vector<1x1x128xf32> to vector<1x128xf32>
    %40 = vector.broadcast %39 : vector<1x128xf32> to vector<8x128xf32>
    %41 = arith.mulf %37, %40 : vector<8x128xf32>
    %c1_26 = arith.constant 1 : index
    %c1_27 = arith.constant 1 : index
    %c0_28 = arith.constant 0 : index
    %42 = vector.load %arg8[%c1_26, %c1_27, %c0_28] : memref<15x2x128xf32, #tpu.memory_space<vmem>>, vector<1x1x128xf32>
    %43 = vector.shape_cast %42 : vector<1x1x128xf32> to vector<1x128xf32>
    %44 = vector.broadcast %43 : vector<1x128xf32> to vector<8x128xf32>
    %45 = arith.addf %41, %44 : vector<8x128xf32>
    %cst_29 = arith.constant 0.000000e+00 : f32
    %46 = vector.broadcast %cst_29 : f32 to vector<8x128xf32>
    %47 = arith.cmpf ogt, %45, %46 : vector<8x128xf32>
    %cst_30 = arith.constant 1.000000e-01 : f32
    %48 = vector.broadcast %cst_30 : f32 to vector<8x128xf32>
    %49 = arith.mulf %48, %45 : vector<8x128xf32>
    %50 = arith.select %47, %45, %49 : vector<8x128xi1>, vector<8x128xf32>
    %c2 = arith.constant 2 : index
    %c0_31 = arith.constant 0 : index
    %c0_32 = arith.constant 0 : index
    %51 = vector.load %arg3[%c2, %c0_31, %c0_32] : memref<3x24x8xbf16, #tpu.memory_space<vmem>>, vector<1x24x8xbf16>
    %52 = vector.shape_cast %51 : vector<1x24x8xbf16> to vector<24x8xbf16>
    %53 = arith.truncf %50 : vector<8x128xf32> to vector<8x128xbf16>
    %cst_33 = arith.constant dense<0.000000e+00> : vector<24x128xf32>
    %54 = tpu.matmul %52, %53, %cst_33 {dimension_numbers = #tpu.dot_dimension_numbers<[1], [0], [0], [1], [0, 0, 1, 1], [], []>} : vector<24x8xbf16>, vector<8x128xbf16>, vector<24x128xf32> -> vector<24x128xf32>
    %55 = vector.extract_strided_slice %54 {offsets = [0, 0], sizes = [8, 128], strides = [1, 1]} : vector<24x128xf32> to vector<8x128xf32>
    %56 = vector.extract_strided_slice %54 {offsets = [8, 0], sizes = [8, 128], strides = [1, 1]} : vector<24x128xf32> to vector<8x128xf32>
    %57 = vector.extract_strided_slice %54 {offsets = [16, 0], sizes = [8, 128], strides = [1, 1]} : vector<24x128xf32> to vector<8x128xf32>
    %58 = tpu.concatenate %55, %56, %57 in 1 : vector<8x128xf32>, vector<8x128xf32>, vector<8x128xf32> -> vector<8x384xf32>
    %59 = arith.truncf %58 : vector<8x384xf32> to vector<8x384xbf16>
    %c2_34 = arith.constant 2 : index
    %c0_35 = arith.constant 0 : index
    %c0_36 = arith.constant 0 : index
    %60 = vector.load %arg2[%c2_34, %c0_35, %c0_36] : memref<15x384x128xbf16, #tpu.memory_space<vmem>>, vector<1x384x128xbf16>
    %61 = vector.shape_cast %60 : vector<1x384x128xbf16> to vector<384x128xbf16>
    %cst_37 = arith.constant dense<0.000000e+00> : vector<8x128xf32>
    %62 = tpu.matmul %59, %61, %cst_37 {dimension_numbers = #tpu.dot_dimension_numbers<[1], [0], [0], [1], [0, 0, 1, 1], [], []>} : vector<8x384xbf16>, vector<384x128xbf16>, vector<8x128xf32> -> vector<8x128xf32>
    %c2_38 = arith.constant 2 : index
    %c0_39 = arith.constant 0 : index
    %c0_40 = arith.constant 0 : index
    %63 = vector.load %arg8[%c2_38, %c0_39, %c0_40] : memref<15x2x128xf32, #tpu.memory_space<vmem>>, vector<1x1x128xf32>
    %64 = vector.shape_cast %63 : vector<1x1x128xf32> to vector<1x128xf32>
    %65 = vector.broadcast %64 : vector<1x128xf32> to vector<8x128xf32>
    %66 = arith.mulf %62, %65 : vector<8x128xf32>
    %c2_41 = arith.constant 2 : index
    %c1_42 = arith.constant 1 : index
    %c0_43 = arith.constant 0 : index
    %67 = vector.load %arg8[%c2_41, %c1_42, %c0_43] : memref<15x2x128xf32, #tpu.memory_space<vmem>>, vector<1x1x128xf32>
    %68 = vector.shape_cast %67 : vector<1x1x128xf32> to vector<1x128xf32>
    %69 = vector.broadcast %68 : vector<1x128xf32> to vector<8x128xf32>
    %70 = arith.addf %66, %69 : vector<8x128xf32>
    %cst_44 = arith.constant 0.000000e+00 : f32
    %71 = vector.broadcast %cst_44 : f32 to vector<8x128xf32>
    %72 = arith.cmpf ogt, %70, %71 : vector<8x128xf32>
    %cst_45 = arith.constant 1.000000e-01 : f32
    %73 = vector.broadcast %cst_45 : f32 to vector<8x128xf32>
    %74 = arith.mulf %73, %70 : vector<8x128xf32>
    %75 = arith.select %72, %70, %74 : vector<8x128xi1>, vector<8x128xf32>
    %c0_46 = arith.constant 0 : index
    %c0_47 = arith.constant 0 : index
    %c0_48 = arith.constant 0 : index
    %76 = vector.load %arg4[%c0_46, %c0_47, %c0_48] : memref<3x48x16xbf16, #tpu.memory_space<vmem>>, vector<1x48x8xbf16>
    %77 = vector.shape_cast %76 : vector<1x48x8xbf16> to vector<48x8xbf16>
    %78 = arith.truncf %75 : vector<8x128xf32> to vector<8x128xbf16>
    %cst_49 = arith.constant dense<0.000000e+00> : vector<48x128xf32>
    %79 = tpu.matmul %77, %78, %cst_49 {dimension_numbers = #tpu.dot_dimension_numbers<[1], [0], [0], [1], [0, 0, 1, 1], [], []>} : vector<48x8xbf16>, vector<8x128xbf16>, vector<48x128xf32> -> vector<48x128xf32>
    %80 = vector.extract_strided_slice %79 {offsets = [0, 0], sizes = [16, 128], strides = [1, 1]} : vector<48x128xf32> to vector<16x128xf32>
    %81 = vector.extract_strided_slice %79 {offsets = [16, 0], sizes = [16, 128], strides = [1, 1]} : vector<48x128xf32> to vector<16x128xf32>
    %82 = vector.extract_strided_slice %79 {offsets = [32, 0], sizes = [16, 128], strides = [1, 1]} : vector<48x128xf32> to vector<16x128xf32>
    %83 = tpu.concatenate %80, %81, %82 in 1 : vector<16x128xf32>, vector<16x128xf32>, vector<16x128xf32> -> vector<16x384xf32>
    %84 = arith.truncf %83 : vector<16x384xf32> to vector<16x384xbf16>
    %c3 = arith.constant 3 : index
    %c0_50 = arith.constant 0 : index
    %c0_51 = arith.constant 0 : index
    %85 = vector.load %arg2[%c3, %c0_50, %c0_51] : memref<15x384x128xbf16, #tpu.memory_space<vmem>>, vector<1x384x128xbf16>
    %86 = vector.shape_cast %85 : vector<1x384x128xbf16> to vector<384x128xbf16>
    %cst_52 = arith.constant dense<0.000000e+00> : vector<16x128xf32>
    %87 = tpu.matmul %84, %86, %cst_52 {dimension_numbers = #tpu.dot_dimension_numbers<[1], [0], [0], [1], [0, 0, 1, 1], [], []>} : vector<16x384xbf16>, vector<384x128xbf16>, vector<16x128xf32> -> vector<16x128xf32>
    %c3_53 = arith.constant 3 : index
    %c0_54 = arith.constant 0 : index
    %c0_55 = arith.constant 0 : index
    %88 = vector.load %arg8[%c3_53, %c0_54, %c0_55] : memref<15x2x128xf32, #tpu.memory_space<vmem>>, vector<1x1x128xf32>
    %89 = vector.shape_cast %88 : vector<1x1x128xf32> to vector<1x128xf32>
    %90 = vector.broadcast %89 : vector<1x128xf32> to vector<16x128xf32>
    %91 = arith.mulf %87, %90 : vector<16x128xf32>
    %c3_56 = arith.constant 3 : index
    %c1_57 = arith.constant 1 : index
    %c0_58 = arith.constant 0 : index
    %92 = vector.load %arg8[%c3_56, %c1_57, %c0_58] : memref<15x2x128xf32, #tpu.memory_space<vmem>>, vector<1x1x128xf32>
    %93 = vector.shape_cast %92 : vector<1x1x128xf32> to vector<1x128xf32>
    %94 = vector.broadcast %93 : vector<1x128xf32> to vector<16x128xf32>
    %95 = arith.addf %91, %94 : vector<16x128xf32>
    %cst_59 = arith.constant 0.000000e+00 : f32
    %96 = vector.broadcast %cst_59 : f32 to vector<16x128xf32>
    %97 = arith.cmpf ogt, %95, %96 : vector<16x128xf32>
    %cst_60 = arith.constant 1.000000e-01 : f32
    %98 = vector.broadcast %cst_60 : f32 to vector<16x128xf32>
    %99 = arith.mulf %98, %95 : vector<16x128xf32>
    %100 = arith.select %97, %95, %99 : vector<16x128xi1>, vector<16x128xf32>
    %c1_61 = arith.constant 1 : index
    %c0_62 = arith.constant 0 : index
    %c0_63 = arith.constant 0 : index
    %101 = vector.load %arg4[%c1_61, %c0_62, %c0_63] : memref<3x48x16xbf16, #tpu.memory_space<vmem>>, vector<1x48x16xbf16>
    %102 = vector.shape_cast %101 : vector<1x48x16xbf16> to vector<48x16xbf16>
    %103 = arith.truncf %100 : vector<16x128xf32> to vector<16x128xbf16>
    %cst_64 = arith.constant dense<0.000000e+00> : vector<48x128xf32>
    %104 = tpu.matmul %102, %103, %cst_64 {dimension_numbers = #tpu.dot_dimension_numbers<[1], [0], [0], [1], [0, 0, 1, 1], [], []>} : vector<48x16xbf16>, vector<16x128xbf16>, vector<48x128xf32> -> vector<48x128xf32>
    %105 = vector.extract_strided_slice %104 {offsets = [0, 0], sizes = [16, 128], strides = [1, 1]} : vector<48x128xf32> to vector<16x128xf32>
    %106 = vector.extract_strided_slice %104 {offsets = [16, 0], sizes = [16, 128], strides = [1, 1]} : vector<48x128xf32> to vector<16x128xf32>
    %107 = vector.extract_strided_slice %104 {offsets = [32, 0], sizes = [16, 128], strides = [1, 1]} : vector<48x128xf32> to vector<16x128xf32>
    %108 = tpu.concatenate %105, %106, %107 in 1 : vector<16x128xf32>, vector<16x128xf32>, vector<16x128xf32> -> vector<16x384xf32>
    %109 = arith.truncf %108 : vector<16x384xf32> to vector<16x384xbf16>
    %c4 = arith.constant 4 : index
    %c0_65 = arith.constant 0 : index
    %c0_66 = arith.constant 0 : index
    %110 = vector.load %arg2[%c4, %c0_65, %c0_66] : memref<15x384x128xbf16, #tpu.memory_space<vmem>>, vector<1x384x128xbf16>
    %111 = vector.shape_cast %110 : vector<1x384x128xbf16> to vector<384x128xbf16>
    %cst_67 = arith.constant dense<0.000000e+00> : vector<16x128xf32>
    %112 = tpu.matmul %109, %111, %cst_67 {dimension_numbers = #tpu.dot_dimension_numbers<[1], [0], [0], [1], [0, 0, 1, 1], [], []>} : vector<16x384xbf16>, vector<384x128xbf16>, vector<16x128xf32> -> vector<16x128xf32>
    %c4_68 = arith.constant 4 : index
    %c0_69 = arith.constant 0 : index
    %c0_70 = arith.constant 0 : index
    %113 = vector.load %arg8[%c4_68, %c0_69, %c0_70] : memref<15x2x128xf32, #tpu.memory_space<vmem>>, vector<1x1x128xf32>
    %114 = vector.shape_cast %113 : vector<1x1x128xf32> to vector<1x128xf32>
    %115 = vector.broadcast %114 : vector<1x128xf32> to vector<16x128xf32>
    %116 = arith.mulf %112, %115 : vector<16x128xf32>
    %c4_71 = arith.constant 4 : index
    %c1_72 = arith.constant 1 : index
    %c0_73 = arith.constant 0 : index
    %117 = vector.load %arg8[%c4_71, %c1_72, %c0_73] : memref<15x2x128xf32, #tpu.memory_space<vmem>>, vector<1x1x128xf32>
    %118 = vector.shape_cast %117 : vector<1x1x128xf32> to vector<1x128xf32>
    %119 = vector.broadcast %118 : vector<1x128xf32> to vector<16x128xf32>
    %120 = arith.addf %116, %119 : vector<16x128xf32>
    %cst_74 = arith.constant 0.000000e+00 : f32
    %121 = vector.broadcast %cst_74 : f32 to vector<16x128xf32>
    %122 = arith.cmpf ogt, %120, %121 : vector<16x128xf32>
    %cst_75 = arith.constant 1.000000e-01 : f32
    %123 = vector.broadcast %cst_75 : f32 to vector<16x128xf32>
    %124 = arith.mulf %123, %120 : vector<16x128xf32>
    %125 = arith.select %122, %120, %124 : vector<16x128xi1>, vector<16x128xf32>
    %c2_76 = arith.constant 2 : index
    %c0_77 = arith.constant 0 : index
    %c0_78 = arith.constant 0 : index
    %126 = vector.load %arg4[%c2_76, %c0_77, %c0_78] : memref<3x48x16xbf16, #tpu.memory_space<vmem>>, vector<1x48x16xbf16>
    %127 = vector.shape_cast %126 : vector<1x48x16xbf16> to vector<48x16xbf16>
    %128 = arith.truncf %125 : vector<16x128xf32> to vector<16x128xbf16>
    %cst_79 = arith.constant dense<0.000000e+00> : vector<48x128xf32>
    %129 = tpu.matmul %127, %128, %cst_79 {dimension_numbers = #tpu.dot_dimension_numbers<[1], [0], [0], [1], [0, 0, 1, 1], [], []>} : vector<48x16xbf16>, vector<16x128xbf16>, vector<48x128xf32> -> vector<48x128xf32>
    %130 = vector.extract_strided_slice %129 {offsets = [0, 0], sizes = [16, 128], strides = [1, 1]} : vector<48x128xf32> to vector<16x128xf32>
    %131 = vector.extract_strided_slice %129 {offsets = [16, 0], sizes = [16, 128], strides = [1, 1]} : vector<48x128xf32> to vector<16x128xf32>
    %132 = vector.extract_strided_slice %129 {offsets = [32, 0], sizes = [16, 128], strides = [1, 1]} : vector<48x128xf32> to vector<16x128xf32>
    %133 = tpu.concatenate %130, %131, %132 in 1 : vector<16x128xf32>, vector<16x128xf32>, vector<16x128xf32> -> vector<16x384xf32>
    %134 = arith.truncf %133 : vector<16x384xf32> to vector<16x384xbf16>
    %c5 = arith.constant 5 : index
    %c0_80 = arith.constant 0 : index
    %c0_81 = arith.constant 0 : index
    %135 = vector.load %arg2[%c5, %c0_80, %c0_81] : memref<15x384x128xbf16, #tpu.memory_space<vmem>>, vector<1x384x128xbf16>
    %136 = vector.shape_cast %135 : vector<1x384x128xbf16> to vector<384x128xbf16>
    %cst_82 = arith.constant dense<0.000000e+00> : vector<16x128xf32>
    %137 = tpu.matmul %134, %136, %cst_82 {dimension_numbers = #tpu.dot_dimension_numbers<[1], [0], [0], [1], [0, 0, 1, 1], [], []>} : vector<16x384xbf16>, vector<384x128xbf16>, vector<16x128xf32> -> vector<16x128xf32>
    %c5_83 = arith.constant 5 : index
    %c0_84 = arith.constant 0 : index
    %c0_85 = arith.constant 0 : index
    %138 = vector.load %arg8[%c5_83, %c0_84, %c0_85] : memref<15x2x128xf32, #tpu.memory_space<vmem>>, vector<1x1x128xf32>
    %139 = vector.shape_cast %138 : vector<1x1x128xf32> to vector<1x128xf32>
    %140 = vector.broadcast %139 : vector<1x128xf32> to vector<16x128xf32>
    %141 = arith.mulf %137, %140 : vector<16x128xf32>
    %c5_86 = arith.constant 5 : index
    %c1_87 = arith.constant 1 : index
    %c0_88 = arith.constant 0 : index
    %142 = vector.load %arg8[%c5_86, %c1_87, %c0_88] : memref<15x2x128xf32, #tpu.memory_space<vmem>>, vector<1x1x128xf32>
    %143 = vector.shape_cast %142 : vector<1x1x128xf32> to vector<1x128xf32>
    %144 = vector.broadcast %143 : vector<1x128xf32> to vector<16x128xf32>
    %145 = arith.addf %141, %144 : vector<16x128xf32>
    %cst_89 = arith.constant 0.000000e+00 : f32
    %146 = vector.broadcast %cst_89 : f32 to vector<16x128xf32>
    %147 = arith.cmpf ogt, %145, %146 : vector<16x128xf32>
    %cst_90 = arith.constant 1.000000e-01 : f32
    %148 = vector.broadcast %cst_90 : f32 to vector<16x128xf32>
    %149 = arith.mulf %148, %145 : vector<16x128xf32>
    %150 = arith.select %147, %145, %149 : vector<16x128xi1>, vector<16x128xf32>
    %c0_91 = arith.constant 0 : index
    %c0_92 = arith.constant 0 : index
    %c0_93 = arith.constant 0 : index
    %151 = vector.load %arg5[%c0_91, %c0_92, %c0_93] : memref<3x96x32xbf16, #tpu.memory_space<vmem>>, vector<1x96x16xbf16>
    %152 = vector.shape_cast %151 : vector<1x96x16xbf16> to vector<96x16xbf16>
    %153 = arith.truncf %150 : vector<16x128xf32> to vector<16x128xbf16>
    %cst_94 = arith.constant dense<0.000000e+00> : vector<96x128xf32>
    %154 = tpu.matmul %152, %153, %cst_94 {dimension_numbers = #tpu.dot_dimension_numbers<[1], [0], [0], [1], [0, 0, 1, 1], [], []>} : vector<96x16xbf16>, vector<16x128xbf16>, vector<96x128xf32> -> vector<96x128xf32>
    %155 = vector.extract_strided_slice %154 {offsets = [0, 0], sizes = [32, 128], strides = [1, 1]} : vector<96x128xf32> to vector<32x128xf32>
    %156 = vector.extract_strided_slice %154 {offsets = [32, 0], sizes = [32, 128], strides = [1, 1]} : vector<96x128xf32> to vector<32x128xf32>
    %157 = vector.extract_strided_slice %154 {offsets = [64, 0], sizes = [32, 128], strides = [1, 1]} : vector<96x128xf32> to vector<32x128xf32>
    %158 = tpu.concatenate %155, %156, %157 in 1 : vector<32x128xf32>, vector<32x128xf32>, vector<32x128xf32> -> vector<32x384xf32>
    %159 = arith.truncf %158 : vector<32x384xf32> to vector<32x384xbf16>
    %c6 = arith.constant 6 : index
    %c0_95 = arith.constant 0 : index
    %c0_96 = arith.constant 0 : index
    %160 = vector.load %arg2[%c6, %c0_95, %c0_96] : memref<15x384x128xbf16, #tpu.memory_space<vmem>>, vector<1x384x128xbf16>
    %161 = vector.shape_cast %160 : vector<1x384x128xbf16> to vector<384x128xbf16>
    %cst_97 = arith.constant dense<0.000000e+00> : vector<32x128xf32>
    %162 = tpu.matmul %159, %161, %cst_97 {dimension_numbers = #tpu.dot_dimension_numbers<[1], [0], [0], [1], [0, 0, 1, 1], [], []>} : vector<32x384xbf16>, vector<384x128xbf16>, vector<32x128xf32> -> vector<32x128xf32>
    %c6_98 = arith.constant 6 : index
    %c0_99 = arith.constant 0 : index
    %c0_100 = arith.constant 0 : index
    %163 = vector.load %arg8[%c6_98, %c0_99, %c0_100] : memref<15x2x128xf32, #tpu.memory_space<vmem>>, vector<1x1x128xf32>
    %164 = vector.shape_cast %163 : vector<1x1x128xf32> to vector<1x128xf32>
    %165 = vector.broadcast %164 : vector<1x128xf32> to vector<32x128xf32>
    %166 = arith.mulf %162, %165 : vector<32x128xf32>
    %c6_101 = arith.constant 6 : index
    %c1_102 = arith.constant 1 : index
    %c0_103 = arith.constant 0 : index
    %167 = vector.load %arg8[%c6_101, %c1_102, %c0_103] : memref<15x2x128xf32, #tpu.memory_space<vmem>>, vector<1x1x128xf32>
    %168 = vector.shape_cast %167 : vector<1x1x128xf32> to vector<1x128xf32>
    %169 = vector.broadcast %168 : vector<1x128xf32> to vector<32x128xf32>
    %170 = arith.addf %166, %169 : vector<32x128xf32>
    %cst_104 = arith.constant 0.000000e+00 : f32
    %171 = vector.broadcast %cst_104 : f32 to vector<32x128xf32>
    %172 = arith.cmpf ogt, %170, %171 : vector<32x128xf32>
    %cst_105 = arith.constant 1.000000e-01 : f32
    %173 = vector.broadcast %cst_105 : f32 to vector<32x128xf32>
    %174 = arith.mulf %173, %170 : vector<32x128xf32>
    %175 = arith.select %172, %170, %174 : vector<32x128xi1>, vector<32x128xf32>
    %c1_106 = arith.constant 1 : index
    %c0_107 = arith.constant 0 : index
    %c0_108 = arith.constant 0 : index
    %176 = vector.load %arg5[%c1_106, %c0_107, %c0_108] : memref<3x96x32xbf16, #tpu.memory_space<vmem>>, vector<1x96x32xbf16>
    %177 = vector.shape_cast %176 : vector<1x96x32xbf16> to vector<96x32xbf16>
    %178 = arith.truncf %175 : vector<32x128xf32> to vector<32x128xbf16>
    %cst_109 = arith.constant dense<0.000000e+00> : vector<96x128xf32>
    %179 = tpu.matmul %177, %178, %cst_109 {dimension_numbers = #tpu.dot_dimension_numbers<[1], [0], [0], [1], [0, 0, 1, 1], [], []>} : vector<96x32xbf16>, vector<32x128xbf16>, vector<96x128xf32> -> vector<96x128xf32>
    %180 = vector.extract_strided_slice %179 {offsets = [0, 0], sizes = [32, 128], strides = [1, 1]} : vector<96x128xf32> to vector<32x128xf32>
    %181 = vector.extract_strided_slice %179 {offsets = [32, 0], sizes = [32, 128], strides = [1, 1]} : vector<96x128xf32> to vector<32x128xf32>
    %182 = vector.extract_strided_slice %179 {offsets = [64, 0], sizes = [32, 128], strides = [1, 1]} : vector<96x128xf32> to vector<32x128xf32>
    %183 = tpu.concatenate %180, %181, %182 in 1 : vector<32x128xf32>, vector<32x128xf32>, vector<32x128xf32> -> vector<32x384xf32>
    %184 = arith.truncf %183 : vector<32x384xf32> to vector<32x384xbf16>
    %c7 = arith.constant 7 : index
    %c0_110 = arith.constant 0 : index
    %c0_111 = arith.constant 0 : index
    %185 = vector.load %arg2[%c7, %c0_110, %c0_111] : memref<15x384x128xbf16, #tpu.memory_space<vmem>>, vector<1x384x128xbf16>
    %186 = vector.shape_cast %185 : vector<1x384x128xbf16> to vector<384x128xbf16>
    %cst_112 = arith.constant dense<0.000000e+00> : vector<32x128xf32>
    %187 = tpu.matmul %184, %186, %cst_112 {dimension_numbers = #tpu.dot_dimension_numbers<[1], [0], [0], [1], [0, 0, 1, 1], [], []>} : vector<32x384xbf16>, vector<384x128xbf16>, vector<32x128xf32> -> vector<32x128xf32>
    %c7_113 = arith.constant 7 : index
    %c0_114 = arith.constant 0 : index
    %c0_115 = arith.constant 0 : index
    %188 = vector.load %arg8[%c7_113, %c0_114, %c0_115] : memref<15x2x128xf32, #tpu.memory_space<vmem>>, vector<1x1x128xf32>
    %189 = vector.shape_cast %188 : vector<1x1x128xf32> to vector<1x128xf32>
    %190 = vector.broadcast %189 : vector<1x128xf32> to vector<32x128xf32>
    %191 = arith.mulf %187, %190 : vector<32x128xf32>
    %c7_116 = arith.constant 7 : index
    %c1_117 = arith.constant 1 : index
    %c0_118 = arith.constant 0 : index
    %192 = vector.load %arg8[%c7_116, %c1_117, %c0_118] : memref<15x2x128xf32, #tpu.memory_space<vmem>>, vector<1x1x128xf32>
    %193 = vector.shape_cast %192 : vector<1x1x128xf32> to vector<1x128xf32>
    %194 = vector.broadcast %193 : vector<1x128xf32> to vector<32x128xf32>
    %195 = arith.addf %191, %194 : vector<32x128xf32>
    %cst_119 = arith.constant 0.000000e+00 : f32
    %196 = vector.broadcast %cst_119 : f32 to vector<32x128xf32>
    %197 = arith.cmpf ogt, %195, %196 : vector<32x128xf32>
    %cst_120 = arith.constant 1.000000e-01 : f32
    %198 = vector.broadcast %cst_120 : f32 to vector<32x128xf32>
    %199 = arith.mulf %198, %195 : vector<32x128xf32>
    %200 = arith.select %197, %195, %199 : vector<32x128xi1>, vector<32x128xf32>
    %c2_121 = arith.constant 2 : index
    %c0_122 = arith.constant 0 : index
    %c0_123 = arith.constant 0 : index
    %201 = vector.load %arg5[%c2_121, %c0_122, %c0_123] : memref<3x96x32xbf16, #tpu.memory_space<vmem>>, vector<1x96x32xbf16>
    %202 = vector.shape_cast %201 : vector<1x96x32xbf16> to vector<96x32xbf16>
    %203 = arith.truncf %200 : vector<32x128xf32> to vector<32x128xbf16>
    %cst_124 = arith.constant dense<0.000000e+00> : vector<96x128xf32>
    %204 = tpu.matmul %202, %203, %cst_124 {dimension_numbers = #tpu.dot_dimension_numbers<[1], [0], [0], [1], [0, 0, 1, 1], [], []>} : vector<96x32xbf16>, vector<32x128xbf16>, vector<96x128xf32> -> vector<96x128xf32>
    %205 = vector.extract_strided_slice %204 {offsets = [0, 0], sizes = [32, 128], strides = [1, 1]} : vector<96x128xf32> to vector<32x128xf32>
    %206 = vector.extract_strided_slice %204 {offsets = [32, 0], sizes = [32, 128], strides = [1, 1]} : vector<96x128xf32> to vector<32x128xf32>
    %207 = vector.extract_strided_slice %204 {offsets = [64, 0], sizes = [32, 128], strides = [1, 1]} : vector<96x128xf32> to vector<32x128xf32>
    %208 = tpu.concatenate %205, %206, %207 in 1 : vector<32x128xf32>, vector<32x128xf32>, vector<32x128xf32> -> vector<32x384xf32>
    %209 = arith.truncf %208 : vector<32x384xf32> to vector<32x384xbf16>
    %c8 = arith.constant 8 : index
    %c0_125 = arith.constant 0 : index
    %c0_126 = arith.constant 0 : index
    %210 = vector.load %arg2[%c8, %c0_125, %c0_126] : memref<15x384x128xbf16, #tpu.memory_space<vmem>>, vector<1x384x128xbf16>
    %211 = vector.shape_cast %210 : vector<1x384x128xbf16> to vector<384x128xbf16>
    %cst_127 = arith.constant dense<0.000000e+00> : vector<32x128xf32>
    %212 = tpu.matmul %209, %211, %cst_127 {dimension_numbers = #tpu.dot_dimension_numbers<[1], [0], [0], [1], [0, 0, 1, 1], [], []>} : vector<32x384xbf16>, vector<384x128xbf16>, vector<32x128xf32> -> vector<32x128xf32>
    %c8_128 = arith.constant 8 : index
    %c0_129 = arith.constant 0 : index
    %c0_130 = arith.constant 0 : index
    %213 = vector.load %arg8[%c8_128, %c0_129, %c0_130] : memref<15x2x128xf32, #tpu.memory_space<vmem>>, vector<1x1x128xf32>
    %214 = vector.shape_cast %213 : vector<1x1x128xf32> to vector<1x128xf32>
    %215 = vector.broadcast %214 : vector<1x128xf32> to vector<32x128xf32>
    %216 = arith.mulf %212, %215 : vector<32x128xf32>
    %c8_131 = arith.constant 8 : index
    %c1_132 = arith.constant 1 : index
    %c0_133 = arith.constant 0 : index
    %217 = vector.load %arg8[%c8_131, %c1_132, %c0_133] : memref<15x2x128xf32, #tpu.memory_space<vmem>>, vector<1x1x128xf32>
    %218 = vector.shape_cast %217 : vector<1x1x128xf32> to vector<1x128xf32>
    %219 = vector.broadcast %218 : vector<1x128xf32> to vector<32x128xf32>
    %220 = arith.addf %216, %219 : vector<32x128xf32>
    %cst_134 = arith.constant 0.000000e+00 : f32
    %221 = vector.broadcast %cst_134 : f32 to vector<32x128xf32>
    %222 = arith.cmpf ogt, %220, %221 : vector<32x128xf32>
    %cst_135 = arith.constant 1.000000e-01 : f32
    %223 = vector.broadcast %cst_135 : f32 to vector<32x128xf32>
    %224 = arith.mulf %223, %220 : vector<32x128xf32>
    %225 = arith.select %222, %220, %224 : vector<32x128xi1>, vector<32x128xf32>
    %c0_136 = arith.constant 0 : index
    %c0_137 = arith.constant 0 : index
    %c0_138 = arith.constant 0 : index
    %226 = vector.load %arg6[%c0_136, %c0_137, %c0_138] : memref<3x192x64xbf16, #tpu.memory_space<vmem>>, vector<1x192x32xbf16>
    %227 = vector.shape_cast %226 : vector<1x192x32xbf16> to vector<192x32xbf16>
    %228 = arith.truncf %225 : vector<32x128xf32> to vector<32x128xbf16>
    %cst_139 = arith.constant dense<0.000000e+00> : vector<192x128xf32>
    %229 = tpu.matmul %227, %228, %cst_139 {dimension_numbers = #tpu.dot_dimension_numbers<[1], [0], [0], [1], [0, 0, 1, 1], [], []>} : vector<192x32xbf16>, vector<32x128xbf16>, vector<192x128xf32> -> vector<192x128xf32>
    %230 = vector.extract_strided_slice %229 {offsets = [0, 0], sizes = [64, 128], strides = [1, 1]} : vector<192x128xf32> to vector<64x128xf32>
    %231 = vector.extract_strided_slice %229 {offsets = [64, 0], sizes = [64, 128], strides = [1, 1]} : vector<192x128xf32> to vector<64x128xf32>
    %232 = vector.extract_strided_slice %229 {offsets = [128, 0], sizes = [64, 128], strides = [1, 1]} : vector<192x128xf32> to vector<64x128xf32>
    %233 = tpu.concatenate %230, %231, %232 in 1 : vector<64x128xf32>, vector<64x128xf32>, vector<64x128xf32> -> vector<64x384xf32>
    %234 = arith.truncf %233 : vector<64x384xf32> to vector<64x384xbf16>
    %c9 = arith.constant 9 : index
    %c0_140 = arith.constant 0 : index
    %c0_141 = arith.constant 0 : index
    %235 = vector.load %arg2[%c9, %c0_140, %c0_141] : memref<15x384x128xbf16, #tpu.memory_space<vmem>>, vector<1x384x128xbf16>
    %236 = vector.shape_cast %235 : vector<1x384x128xbf16> to vector<384x128xbf16>
    %cst_142 = arith.constant dense<0.000000e+00> : vector<64x128xf32>
    %237 = tpu.matmul %234, %236, %cst_142 {dimension_numbers = #tpu.dot_dimension_numbers<[1], [0], [0], [1], [0, 0, 1, 1], [], []>} : vector<64x384xbf16>, vector<384x128xbf16>, vector<64x128xf32> -> vector<64x128xf32>
    %c9_143 = arith.constant 9 : index
    %c0_144 = arith.constant 0 : index
    %c0_145 = arith.constant 0 : index
    %238 = vector.load %arg8[%c9_143, %c0_144, %c0_145] : memref<15x2x128xf32, #tpu.memory_space<vmem>>, vector<1x1x128xf32>
    %239 = vector.shape_cast %238 : vector<1x1x128xf32> to vector<1x128xf32>
    %240 = vector.broadcast %239 : vector<1x128xf32> to vector<64x128xf32>
    %241 = arith.mulf %237, %240 : vector<64x128xf32>
    %c9_146 = arith.constant 9 : index
    %c1_147 = arith.constant 1 : index
    %c0_148 = arith.constant 0 : index
    %242 = vector.load %arg8[%c9_146, %c1_147, %c0_148] : memref<15x2x128xf32, #tpu.memory_space<vmem>>, vector<1x1x128xf32>
    %243 = vector.shape_cast %242 : vector<1x1x128xf32> to vector<1x128xf32>
    %244 = vector.broadcast %243 : vector<1x128xf32> to vector<64x128xf32>
    %245 = arith.addf %241, %244 : vector<64x128xf32>
    %cst_149 = arith.constant 0.000000e+00 : f32
    %246 = vector.broadcast %cst_149 : f32 to vector<64x128xf32>
    %247 = arith.cmpf ogt, %245, %246 : vector<64x128xf32>
    %cst_150 = arith.constant 1.000000e-01 : f32
    %248 = vector.broadcast %cst_150 : f32 to vector<64x128xf32>
    %249 = arith.mulf %248, %245 : vector<64x128xf32>
    %250 = arith.select %247, %245, %249 : vector<64x128xi1>, vector<64x128xf32>
    %c1_151 = arith.constant 1 : index
    %c0_152 = arith.constant 0 : index
    %c0_153 = arith.constant 0 : index
    %251 = vector.load %arg6[%c1_151, %c0_152, %c0_153] : memref<3x192x64xbf16, #tpu.memory_space<vmem>>, vector<1x192x64xbf16>
    %252 = vector.shape_cast %251 : vector<1x192x64xbf16> to vector<192x64xbf16>
    %253 = arith.truncf %250 : vector<64x128xf32> to vector<64x128xbf16>
    %cst_154 = arith.constant dense<0.000000e+00> : vector<192x128xf32>
    %254 = tpu.matmul %252, %253, %cst_154 {dimension_numbers = #tpu.dot_dimension_numbers<[1], [0], [0], [1], [0, 0, 1, 1], [], []>} : vector<192x64xbf16>, vector<64x128xbf16>, vector<192x128xf32> -> vector<192x128xf32>
    %255 = vector.extract_strided_slice %254 {offsets = [0, 0], sizes = [64, 128], strides = [1, 1]} : vector<192x128xf32> to vector<64x128xf32>
    %256 = vector.extract_strided_slice %254 {offsets = [64, 0], sizes = [64, 128], strides = [1, 1]} : vector<192x128xf32> to vector<64x128xf32>
    %257 = vector.extract_strided_slice %254 {offsets = [128, 0], sizes = [64, 128], strides = [1, 1]} : vector<192x128xf32> to vector<64x128xf32>
    %258 = tpu.concatenate %255, %256, %257 in 1 : vector<64x128xf32>, vector<64x128xf32>, vector<64x128xf32> -> vector<64x384xf32>
    %259 = arith.truncf %258 : vector<64x384xf32> to vector<64x384xbf16>
    %c10 = arith.constant 10 : index
    %c0_155 = arith.constant 0 : index
    %c0_156 = arith.constant 0 : index
    %260 = vector.load %arg2[%c10, %c0_155, %c0_156] : memref<15x384x128xbf16, #tpu.memory_space<vmem>>, vector<1x384x128xbf16>
    %261 = vector.shape_cast %260 : vector<1x384x128xbf16> to vector<384x128xbf16>
    %cst_157 = arith.constant dense<0.000000e+00> : vector<64x128xf32>
    %262 = tpu.matmul %259, %261, %cst_157 {dimension_numbers = #tpu.dot_dimension_numbers<[1], [0], [0], [1], [0, 0, 1, 1], [], []>} : vector<64x384xbf16>, vector<384x128xbf16>, vector<64x128xf32> -> vector<64x128xf32>
    %c10_158 = arith.constant 10 : index
    %c0_159 = arith.constant 0 : index
    %c0_160 = arith.constant 0 : index
    %263 = vector.load %arg8[%c10_158, %c0_159, %c0_160] : memref<15x2x128xf32, #tpu.memory_space<vmem>>, vector<1x1x128xf32>
    %264 = vector.shape_cast %263 : vector<1x1x128xf32> to vector<1x128xf32>
    %265 = vector.broadcast %264 : vector<1x128xf32> to vector<64x128xf32>
    %266 = arith.mulf %262, %265 : vector<64x128xf32>
    %c10_161 = arith.constant 10 : index
    %c1_162 = arith.constant 1 : index
    %c0_163 = arith.constant 0 : index
    %267 = vector.load %arg8[%c10_161, %c1_162, %c0_163] : memref<15x2x128xf32, #tpu.memory_space<vmem>>, vector<1x1x128xf32>
    %268 = vector.shape_cast %267 : vector<1x1x128xf32> to vector<1x128xf32>
    %269 = vector.broadcast %268 : vector<1x128xf32> to vector<64x128xf32>
    %270 = arith.addf %266, %269 : vector<64x128xf32>
    %cst_164 = arith.constant 0.000000e+00 : f32
    %271 = vector.broadcast %cst_164 : f32 to vector<64x128xf32>
    %272 = arith.cmpf ogt, %270, %271 : vector<64x128xf32>
    %cst_165 = arith.constant 1.000000e-01 : f32
    %273 = vector.broadcast %cst_165 : f32 to vector<64x128xf32>
    %274 = arith.mulf %273, %270 : vector<64x128xf32>
    %275 = arith.select %272, %270, %274 : vector<64x128xi1>, vector<64x128xf32>
    %c2_166 = arith.constant 2 : index
    %c0_167 = arith.constant 0 : index
    %c0_168 = arith.constant 0 : index
    %276 = vector.load %arg6[%c2_166, %c0_167, %c0_168] : memref<3x192x64xbf16, #tpu.memory_space<vmem>>, vector<1x192x64xbf16>
    %277 = vector.shape_cast %276 : vector<1x192x64xbf16> to vector<192x64xbf16>
    %278 = arith.truncf %275 : vector<64x128xf32> to vector<64x128xbf16>
    %cst_169 = arith.constant dense<0.000000e+00> : vector<192x128xf32>
    %279 = tpu.matmul %277, %278, %cst_169 {dimension_numbers = #tpu.dot_dimension_numbers<[1], [0], [0], [1], [0, 0, 1, 1], [], []>} : vector<192x64xbf16>, vector<64x128xbf16>, vector<192x128xf32> -> vector<192x128xf32>
    %280 = vector.extract_strided_slice %279 {offsets = [0, 0], sizes = [64, 128], strides = [1, 1]} : vector<192x128xf32> to vector<64x128xf32>
    %281 = vector.extract_strided_slice %279 {offsets = [64, 0], sizes = [64, 128], strides = [1, 1]} : vector<192x128xf32> to vector<64x128xf32>
    %282 = vector.extract_strided_slice %279 {offsets = [128, 0], sizes = [64, 128], strides = [1, 1]} : vector<192x128xf32> to vector<64x128xf32>
    %283 = tpu.concatenate %280, %281, %282 in 1 : vector<64x128xf32>, vector<64x128xf32>, vector<64x128xf32> -> vector<64x384xf32>
    %284 = arith.truncf %283 : vector<64x384xf32> to vector<64x384xbf16>
    %c11 = arith.constant 11 : index
    %c0_170 = arith.constant 0 : index
    %c0_171 = arith.constant 0 : index
    %285 = vector.load %arg2[%c11, %c0_170, %c0_171] : memref<15x384x128xbf16, #tpu.memory_space<vmem>>, vector<1x384x128xbf16>
    %286 = vector.shape_cast %285 : vector<1x384x128xbf16> to vector<384x128xbf16>
    %cst_172 = arith.constant dense<0.000000e+00> : vector<64x128xf32>
    %287 = tpu.matmul %284, %286, %cst_172 {dimension_numbers = #tpu.dot_dimension_numbers<[1], [0], [0], [1], [0, 0, 1, 1], [], []>} : vector<64x384xbf16>, vector<384x128xbf16>, vector<64x128xf32> -> vector<64x128xf32>
    %c11_173 = arith.constant 11 : index
    %c0_174 = arith.constant 0 : index
    %c0_175 = arith.constant 0 : index
    %288 = vector.load %arg8[%c11_173, %c0_174, %c0_175] : memref<15x2x128xf32, #tpu.memory_space<vmem>>, vector<1x1x128xf32>
    %289 = vector.shape_cast %288 : vector<1x1x128xf32> to vector<1x128xf32>
    %290 = vector.broadcast %289 : vector<1x128xf32> to vector<64x128xf32>
    %291 = arith.mulf %287, %290 : vector<64x128xf32>
    %c11_176 = arith.constant 11 : index
    %c1_177 = arith.constant 1 : index
    %c0_178 = arith.constant 0 : index
    %292 = vector.load %arg8[%c11_176, %c1_177, %c0_178] : memref<15x2x128xf32, #tpu.memory_space<vmem>>, vector<1x1x128xf32>
    %293 = vector.shape_cast %292 : vector<1x1x128xf32> to vector<1x128xf32>
    %294 = vector.broadcast %293 : vector<1x128xf32> to vector<64x128xf32>
    %295 = arith.addf %291, %294 : vector<64x128xf32>
    %cst_179 = arith.constant 0.000000e+00 : f32
    %296 = vector.broadcast %cst_179 : f32 to vector<64x128xf32>
    %297 = arith.cmpf ogt, %295, %296 : vector<64x128xf32>
    %cst_180 = arith.constant 1.000000e-01 : f32
    %298 = vector.broadcast %cst_180 : f32 to vector<64x128xf32>
    %299 = arith.mulf %298, %295 : vector<64x128xf32>
    %300 = arith.select %297, %295, %299 : vector<64x128xi1>, vector<64x128xf32>
    %c0_181 = arith.constant 0 : index
    %c0_182 = arith.constant 0 : index
    %c0_183 = arith.constant 0 : index
    %301 = vector.load %arg7[%c0_181, %c0_182, %c0_183] : memref<3x384x128xbf16, #tpu.memory_space<vmem>>, vector<1x384x64xbf16>
    %302 = vector.shape_cast %301 : vector<1x384x64xbf16> to vector<384x64xbf16>
    %303 = arith.truncf %300 : vector<64x128xf32> to vector<64x128xbf16>
    %cst_184 = arith.constant dense<0.000000e+00> : vector<384x128xf32>
    %304 = tpu.matmul %302, %303, %cst_184 {dimension_numbers = #tpu.dot_dimension_numbers<[1], [0], [0], [1], [0, 0, 1, 1], [], []>} : vector<384x64xbf16>, vector<64x128xbf16>, vector<384x128xf32> -> vector<384x128xf32>
    %305 = vector.extract_strided_slice %304 {offsets = [0, 0], sizes = [128, 128], strides = [1, 1]} : vector<384x128xf32> to vector<128x128xf32>
    %306 = vector.extract_strided_slice %304 {offsets = [128, 0], sizes = [128, 128], strides = [1, 1]} : vector<384x128xf32> to vector<128x128xf32>
    %307 = vector.extract_strided_slice %304 {offsets = [256, 0], sizes = [128, 128], strides = [1, 1]} : vector<384x128xf32> to vector<128x128xf32>
    %308 = tpu.concatenate %305, %306, %307 in 1 : vector<128x128xf32>, vector<128x128xf32>, vector<128x128xf32> -> vector<128x384xf32>
    %309 = arith.truncf %308 : vector<128x384xf32> to vector<128x384xbf16>
    %c12 = arith.constant 12 : index
    %c0_185 = arith.constant 0 : index
    %c0_186 = arith.constant 0 : index
    %310 = vector.load %arg2[%c12, %c0_185, %c0_186] : memref<15x384x128xbf16, #tpu.memory_space<vmem>>, vector<1x384x128xbf16>
    %311 = vector.shape_cast %310 : vector<1x384x128xbf16> to vector<384x128xbf16>
    %cst_187 = arith.constant dense<0.000000e+00> : vector<128x128xf32>
    %312 = tpu.matmul %309, %311, %cst_187 {dimension_numbers = #tpu.dot_dimension_numbers<[1], [0], [0], [1], [0, 0, 1, 1], [], []>} : vector<128x384xbf16>, vector<384x128xbf16>, vector<128x128xf32> -> vector<128x128xf32>
    %c12_188 = arith.constant 12 : index
    %c0_189 = arith.constant 0 : index
    %c0_190 = arith.constant 0 : index
    %313 = vector.load %arg8[%c12_188, %c0_189, %c0_190] : memref<15x2x128xf32, #tpu.memory_space<vmem>>, vector<1x1x128xf32>
    %314 = vector.shape_cast %313 : vector<1x1x128xf32> to vector<1x128xf32>
    %315 = vector.broadcast %314 : vector<1x128xf32> to vector<128x128xf32>
    %316 = arith.mulf %312, %315 : vector<128x128xf32>
    %c12_191 = arith.constant 12 : index
    %c1_192 = arith.constant 1 : index
    %c0_193 = arith.constant 0 : index
    %317 = vector.load %arg8[%c12_191, %c1_192, %c0_193] : memref<15x2x128xf32, #tpu.memory_space<vmem>>, vector<1x1x128xf32>
    %318 = vector.shape_cast %317 : vector<1x1x128xf32> to vector<1x128xf32>
    %319 = vector.broadcast %318 : vector<1x128xf32> to vector<128x128xf32>
    %320 = arith.addf %316, %319 : vector<128x128xf32>
    %cst_194 = arith.constant 0.000000e+00 : f32
    %321 = vector.broadcast %cst_194 : f32 to vector<128x128xf32>
    %322 = arith.cmpf ogt, %320, %321 : vector<128x128xf32>
    %cst_195 = arith.constant 1.000000e-01 : f32
    %323 = vector.broadcast %cst_195 : f32 to vector<128x128xf32>
    %324 = arith.mulf %323, %320 : vector<128x128xf32>
    %325 = arith.select %322, %320, %324 : vector<128x128xi1>, vector<128x128xf32>
    %c1_196 = arith.constant 1 : index
    %c0_197 = arith.constant 0 : index
    %c0_198 = arith.constant 0 : index
    %326 = vector.load %arg7[%c1_196, %c0_197, %c0_198] : memref<3x384x128xbf16, #tpu.memory_space<vmem>>, vector<1x384x128xbf16>
    %327 = vector.shape_cast %326 : vector<1x384x128xbf16> to vector<384x128xbf16>
    %328 = arith.truncf %325 : vector<128x128xf32> to vector<128x128xbf16>
    %cst_199 = arith.constant dense<0.000000e+00> : vector<384x128xf32>
    %329 = tpu.matmul %327, %328, %cst_199 {dimension_numbers = #tpu.dot_dimension_numbers<[1], [0], [0], [1], [0, 0, 1, 1], [], []>} : vector<384x128xbf16>, vector<128x128xbf16>, vector<384x128xf32> -> vector<384x128xf32>
    %330 = vector.extract_strided_slice %329 {offsets = [0, 0], sizes = [128, 128], strides = [1, 1]} : vector<384x128xf32> to vector<128x128xf32>
    %331 = vector.extract_strided_slice %329 {offsets = [128, 0], sizes = [128, 128], strides = [1, 1]} : vector<384x128xf32> to vector<128x128xf32>
    %332 = vector.extract_strided_slice %329 {offsets = [256, 0], sizes = [128, 128], strides = [1, 1]} : vector<384x128xf32> to vector<128x128xf32>
    %333 = tpu.concatenate %330, %331, %332 in 1 : vector<128x128xf32>, vector<128x128xf32>, vector<128x128xf32> -> vector<128x384xf32>
    %334 = arith.truncf %333 : vector<128x384xf32> to vector<128x384xbf16>
    %c13 = arith.constant 13 : index
    %c0_200 = arith.constant 0 : index
    %c0_201 = arith.constant 0 : index
    %335 = vector.load %arg2[%c13, %c0_200, %c0_201] : memref<15x384x128xbf16, #tpu.memory_space<vmem>>, vector<1x384x128xbf16>
    %336 = vector.shape_cast %335 : vector<1x384x128xbf16> to vector<384x128xbf16>
    %cst_202 = arith.constant dense<0.000000e+00> : vector<128x128xf32>
    %337 = tpu.matmul %334, %336, %cst_202 {dimension_numbers = #tpu.dot_dimension_numbers<[1], [0], [0], [1], [0, 0, 1, 1], [], []>} : vector<128x384xbf16>, vector<384x128xbf16>, vector<128x128xf32> -> vector<128x128xf32>
    %c13_203 = arith.constant 13 : index
    %c0_204 = arith.constant 0 : index
    %c0_205 = arith.constant 0 : index
    %338 = vector.load %arg8[%c13_203, %c0_204, %c0_205] : memref<15x2x128xf32, #tpu.memory_space<vmem>>, vector<1x1x128xf32>
    %339 = vector.shape_cast %338 : vector<1x1x128xf32> to vector<1x128xf32>
    %340 = vector.broadcast %339 : vector<1x128xf32> to vector<128x128xf32>
    %341 = arith.mulf %337, %340 : vector<128x128xf32>
    %c13_206 = arith.constant 13 : index
    %c1_207 = arith.constant 1 : index
    %c0_208 = arith.constant 0 : index
    %342 = vector.load %arg8[%c13_206, %c1_207, %c0_208] : memref<15x2x128xf32, #tpu.memory_space<vmem>>, vector<1x1x128xf32>
    %343 = vector.shape_cast %342 : vector<1x1x128xf32> to vector<1x128xf32>
    %344 = vector.broadcast %343 : vector<1x128xf32> to vector<128x128xf32>
    %345 = arith.addf %341, %344 : vector<128x128xf32>
    %cst_209 = arith.constant 0.000000e+00 : f32
    %346 = vector.broadcast %cst_209 : f32 to vector<128x128xf32>
    %347 = arith.cmpf ogt, %345, %346 : vector<128x128xf32>
    %cst_210 = arith.constant 1.000000e-01 : f32
    %348 = vector.broadcast %cst_210 : f32 to vector<128x128xf32>
    %349 = arith.mulf %348, %345 : vector<128x128xf32>
    %350 = arith.select %347, %345, %349 : vector<128x128xi1>, vector<128x128xf32>
    %c2_211 = arith.constant 2 : index
    %c0_212 = arith.constant 0 : index
    %c0_213 = arith.constant 0 : index
    %351 = vector.load %arg7[%c2_211, %c0_212, %c0_213] : memref<3x384x128xbf16, #tpu.memory_space<vmem>>, vector<1x384x128xbf16>
    %352 = vector.shape_cast %351 : vector<1x384x128xbf16> to vector<384x128xbf16>
    %353 = arith.truncf %350 : vector<128x128xf32> to vector<128x128xbf16>
    %cst_214 = arith.constant dense<0.000000e+00> : vector<384x128xf32>
    %354 = tpu.matmul %352, %353, %cst_214 {dimension_numbers = #tpu.dot_dimension_numbers<[1], [0], [0], [1], [0, 0, 1, 1], [], []>} : vector<384x128xbf16>, vector<128x128xbf16>, vector<384x128xf32> -> vector<384x128xf32>
    %355 = vector.extract_strided_slice %354 {offsets = [0, 0], sizes = [128, 128], strides = [1, 1]} : vector<384x128xf32> to vector<128x128xf32>
    %356 = vector.extract_strided_slice %354 {offsets = [128, 0], sizes = [128, 128], strides = [1, 1]} : vector<384x128xf32> to vector<128x128xf32>
    %357 = vector.extract_strided_slice %354 {offsets = [256, 0], sizes = [128, 128], strides = [1, 1]} : vector<384x128xf32> to vector<128x128xf32>
    %358 = tpu.concatenate %355, %356, %357 in 1 : vector<128x128xf32>, vector<128x128xf32>, vector<128x128xf32> -> vector<128x384xf32>
    %359 = arith.truncf %358 : vector<128x384xf32> to vector<128x384xbf16>
    %c14 = arith.constant 14 : index
    %c0_215 = arith.constant 0 : index
    %c0_216 = arith.constant 0 : index
    %360 = vector.load %arg2[%c14, %c0_215, %c0_216] : memref<15x384x128xbf16, #tpu.memory_space<vmem>>, vector<1x384x128xbf16>
    %361 = vector.shape_cast %360 : vector<1x384x128xbf16> to vector<384x128xbf16>
    %cst_217 = arith.constant dense<0.000000e+00> : vector<128x128xf32>
    %362 = tpu.matmul %359, %361, %cst_217 {dimension_numbers = #tpu.dot_dimension_numbers<[1], [0], [0], [1], [0, 0, 1, 1], [], []>} : vector<128x384xbf16>, vector<384x128xbf16>, vector<128x128xf32> -> vector<128x128xf32>
    %c14_218 = arith.constant 14 : index
    %c0_219 = arith.constant 0 : index
    %c0_220 = arith.constant 0 : index
    %363 = vector.load %arg8[%c14_218, %c0_219, %c0_220] : memref<15x2x128xf32, #tpu.memory_space<vmem>>, vector<1x1x128xf32>
    %364 = vector.shape_cast %363 : vector<1x1x128xf32> to vector<1x128xf32>
    %365 = vector.broadcast %364 : vector<1x128xf32> to vector<128x128xf32>
    %366 = arith.mulf %362, %365 : vector<128x128xf32>
    %c14_221 = arith.constant 14 : index
    %c1_222 = arith.constant 1 : index
    %c0_223 = arith.constant 0 : index
    %367 = vector.load %arg8[%c14_221, %c1_222, %c0_223] : memref<15x2x128xf32, #tpu.memory_space<vmem>>, vector<1x1x128xf32>
    %368 = vector.shape_cast %367 : vector<1x1x128xf32> to vector<1x128xf32>
    %369 = vector.broadcast %368 : vector<1x128xf32> to vector<128x128xf32>
    %370 = arith.addf %366, %369 : vector<128x128xf32>
    %cst_224 = arith.constant 0.000000e+00 : f32
    %371 = vector.broadcast %cst_224 : f32 to vector<128x128xf32>
    %372 = arith.cmpf ogt, %370, %371 : vector<128x128xf32>
    %cst_225 = arith.constant 1.000000e-01 : f32
    %373 = vector.broadcast %cst_225 : f32 to vector<128x128xf32>
    %374 = arith.mulf %373, %370 : vector<128x128xf32>
    %375 = arith.select %372, %370, %374 : vector<128x128xi1>, vector<128x128xf32>
    %376 = math.tanh %375 : vector<128x128xf32>
    %c0_226 = arith.constant 0 : index
    %c0_227 = arith.constant 0 : index
    %377 = vector.load %arg9[%c0_226, %c0_227] : memref<128x128xf32, #tpu.memory_space<vmem>>, vector<128x128xf32>
    tpu.vector_store %arg9[%c0_226, %c0_227], %376 {strides = array<i32>} : memref<128x128xf32, #tpu.memory_space<vmem>>, vector<128x128xf32>,
    return
  }
  func.func @transform_0(%arg0: i32) -> (i32, i32) {
    %c0_i32 = arith.constant 0 : i32
    %c0_i32_0 = arith.constant 0 : i32
    return %arg0, %c0_i32 : i32, i32
  }
  func.func @transform_1(%arg0: i32) -> (i32, i32, i32) {
    %c0_i32 = arith.constant 0 : i32
    %c0_i32_0 = arith.constant 0 : i32
    %c0_i32_1 = arith.constant 0 : i32
    %c0_i32_2 = arith.constant 0 : i32
    return %c0_i32, %c0_i32_0, %c0_i32_1 : i32, i32, i32
  }
  func.func @transform_2(%arg0: i32) -> (i32, i32, i32) {
    %c0_i32 = arith.constant 0 : i32
    %c0_i32_0 = arith.constant 0 : i32
    %c0_i32_1 = arith.constant 0 : i32
    %c0_i32_2 = arith.constant 0 : i32
    return %c0_i32, %c0_i32_0, %c0_i32_1 : i32, i32, i32
  }
  func.func @transform_3(%arg0: i32) -> (i32, i32, i32) {
    %c0_i32 = arith.constant 0 : i32
    %c0_i32_0 = arith.constant 0 : i32
    %c0_i32_1 = arith.constant 0 : i32
    %c0_i32_2 = arith.constant 0 : i32
    return %c0_i32, %c0_i32_0, %c0_i32_1 : i32, i32, i32
  }
  func.func @transform_4(%arg0: i32) -> (i32, i32, i32) {
    %c0_i32 = arith.constant 0 : i32
    %c0_i32_0 = arith.constant 0 : i32
    %c0_i32_1 = arith.constant 0 : i32
    %c0_i32_2 = arith.constant 0 : i32
    return %c0_i32, %c0_i32_0, %c0_i32_1 : i32, i32, i32
  }
  func.func @transform_5(%arg0: i32) -> (i32, i32, i32) {
    %c0_i32 = arith.constant 0 : i32
    %c0_i32_0 = arith.constant 0 : i32
    %c0_i32_1 = arith.constant 0 : i32
    %c0_i32_2 = arith.constant 0 : i32
    return %c0_i32, %c0_i32_0, %c0_i32_1 : i32, i32, i32
  }
  func.func @transform_6(%arg0: i32) -> (i32, i32, i32) {
    %c0_i32 = arith.constant 0 : i32
    %c0_i32_0 = arith.constant 0 : i32
    %c0_i32_1 = arith.constant 0 : i32
    %c0_i32_2 = arith.constant 0 : i32
    return %c0_i32, %c0_i32_0, %c0_i32_1 : i32, i32, i32
  }
  func.func @transform_7(%arg0: i32) -> (i32, i32, i32) {
    %c0_i32 = arith.constant 0 : i32
    %c0_i32_0 = arith.constant 0 : i32
    %c0_i32_1 = arith.constant 0 : i32
    %c0_i32_2 = arith.constant 0 : i32
    return %c0_i32, %c0_i32_0, %c0_i32_1 : i32, i32, i32
  }
  func.func @transform_8(%arg0: i32) -> (i32, i32) {
    %c0_i32 = arith.constant 0 : i32
    %c0_i32_0 = arith.constant 0 : i32
    return %arg0, %c0_i32 : i32, i32
  }
}

</mosaic_0001>

<bundles_post_ra>
// kernel: decoder_forward.1
= control target key start
LH: loop header
LB: loop body
LE: loop exit
PB: predicated region body
PF: predicated region fallthrough
CT: control target
= control target key end

     0   :  { %13 = vsyncpa [#allocation3], 0  ;;  %s12323_s0 = inlined_call_operand.vmem [shape: f32[4,128], index: 0, kind: input, shape index: {}]   ;;  %s12324_s1 = inlined_call_operand.hbm [shape: bf16[15,384,128], index: 1, kind: input, shape index: {}]   ;;  %s12325_s2 = inlined_call_operand.vmem [shape: bf16[3,24,8], index: 2, kind: input, shape index: {}]   ;;  %s12326_s3 = inlined_call_operand.vmem [shape: bf16[3,48,16], index: 3, kind: input, shape index: {}]   ;;  %s12327_s4 = inlined_call_operand.vmem [shape: bf16[3,96,32], index: 4, kind: input, shape index: {}]   ;;  %s12328_s5 = inlined_call_operand.vmem [shape: bf16[3,192,64], index: 5, kind: input, shape index: {}]   ;;  %s12329_s6 = inlined_call_operand.hbm [shape: bf16[3,384,128], index: 6, kind: input, shape index: {}]   ;;  %s12330_s7 = inlined_call_operand.hbm [shape: f32[15,2,128], index: 7, kind: input, shape index: {}]   ;;  %s12331_s8 = inlined_call_operand.hbm [shape: f32[128,128], index: 8, kind: output, shape index: {}]  }
   0x1   :  { %14 = vsyncpa [#allocation6], 0 }
   0x2   :  { %15 = vsyncpa [#allocation4], 0  ;;  %s11493_s27 = smov [#allocation5]   ;;  %s11494_s29 = smov [#allocation2]  }
   0x3   :  { %s43_s28 = sshll.u32 %s11493_s27, 4  ;;  %s23_s30 = sshll.u32 %s11494_s29, 4  ;;  %s44_s28 = int_to_ptr.vmem [resolvable:$true] %s43_s28  ;;  %s24_s30 = int_to_ptr.vmem [resolvable:$true] %s23_s30 }
   0x4   :  { %s11415_s9 = scalar_lea.vmem %s44_s28, 9216  ;;  %p11420_p1 = scmp.lt.s32.totalorder %s44_s28, %s44_s28 }
   0x5   :  { %p11416_p0 = scmp.ne.s32.totalorder %s44_s28, %s11415_s9  ;;  %p11421_p2 = scmp.lt.s32.totalorder %s11415_s9, %s11415_s9 }
   0x7   :  { %p11422_p3 = por %p11421_p2, %p11420_p1 }
   0x9   :  { %p11423_p4 = pnand %p11422_p3, %p11416_p0 }
   0xb   :  { %11426 = shalt.err (!%p11423_p4)
}
   0xc   :  { %s11495_s10 = smov 64   ;;  %s11496_s11 = smov 4  }
   0xd   :  { %49 = dma.hbm_to_vmem [thread:$0]  %s12329_s6, 9216, %s44_s28, [#allocation6], %s11495_s10, %s11495_s10, %s11496_s11  }
   0xe   :  { %s11435_s14 = scalar_lea.vmem %s24_s30, 46080  ;;  %p11440_p6 = scmp.lt.s32.totalorder %s24_s30, %s24_s30 }
   0xf   :  { %p11436_p5 = scmp.ne.s32.totalorder %s24_s30, %s11435_s14  ;;  %p11441_p7 = scmp.lt.s32.totalorder %s11435_s14, %s11435_s14 }
  0x11   :  { %p11442_p8 = por %p11441_p7, %p11440_p6 }
  0x13   :  { %p11443_p9 = pnand %p11442_p8, %p11436_p5 }
  0x15   :  { %11446 = shalt.err (!%p11443_p9)
}
  0x16   :  { %29 = dma.hbm_to_vmem [thread:$0]  %s12324_s1, 46080, %s24_s30, [#allocation3], %s11495_s10, %s11495_s10, %s11496_s11  }
  0x17   :  { %s11497_s17 = smov [#allocation7]  }
  0x18   :  { %s55_s18 = sshll.u32 %s11497_s17, 4  ;;  %s56_s18 = int_to_ptr.vmem [resolvable:$true] %s55_s18 }
  0x19   :  { %s11455_s19 = scalar_lea.vmem %s56_s18, 480  ;;  %p11460_p11 = scmp.lt.s32.totalorder %s56_s18, %s56_s18 }
  0x1a   :  { %p11456_p10 = scmp.ne.s32.totalorder %s56_s18, %s11455_s19  ;;  %p11461_p12 = scmp.lt.s32.totalorder %s11455_s19, %s11455_s19 }
  0x1c   :  { %p11462_p13 = por %p11461_p12, %p11460_p11 }
  0x1e   :  { %p11463_p0 = pnand %p11462_p13, %p11456_p10 }
  0x20   :  { %11466 = shalt.err (!%p11463_p0)
}
  0x21   :  { %s11498_s6 = smov 32   ;;  %s11499_s20 = smov 2  }
  0x22   :  { %61 = dma.hbm_to_vmem [thread:$0]  %s12330_s7, 480, %s56_s18, [#allocation6], %s11498_s6, %s11498_s6, %s11499_s20  }
  0x23   :  { %11487 = dma.done.wait [#allocation3], 46080  }
  0x24   :  { %11488 = vsyncadd [#allocation3], 4294921216 }
  0x25   :  { %11489 = dma.done.wait [#allocation6], 9696  }
  0x26   :  { %11490 = vsyncadd [#allocation6], 4294957600  ;;  %vm92_vm0 = vcmask 1041408   ;;  %vm85_vm1 = vcmask 31744   ;;  %v72_v0 = vld [vmem:[%s12323_s0] sm:$0xf] }
  0x27   :  { %v76_v1 = vpack.c.bf16 %v72_v0, %v72_v0  ;;  %v10874_v2 = vld [vmem:[%s12325_s2] sm:$0xff]   ;;  %v10875_v3 = vld [vmem:[%s12325_s2 + $0x8] ss:$0 sps:$4 sm:$0xff]   ;;  %v10876_v5 = vld [vmem:[#allocation2 + $0xb8] sm:$0xff]   ;;  %v11500_v7 = vmov 0.0   ;;  %vm11501_vm2 = vmmov 0  }
  0x28   :  { %10131 = vmatprep.mubr.msk.bf16.mxu0 %vm85_vm1, %v10874_v2  ;;  %v10878_v6 = vld [vmem:[#allocation2 + $0x78] sm:$0xff]   ;;  %v10877_v9 = vld [vmem:[#allocation2 + $0xb0] sm:$0xff]   ;;  %v10884_v12 = vld [vmem:[#allocation2 + $0x68] sm:$0xff]   ;;  %vm447_vm3 = vcmask 64512   ;;  %vm454_vm5 = vcmask 1043456   ;;  %vm1573_vm10 = vcmask 130048  }
  0x29   :  { %10859 = vmatprep.subr.msk.bf16.mxu0 %vm92_vm0, %v76_v1  ;;  %v94_v4 = vsel %vm92_vm0, %v76_v1, 0  ;;  %v10879_v8 = vld [vmem:[#allocation2 + $0x38] sm:$0xff]   ;;  %9254 = vmatprep.subr.bf16.mxu1 %v10878_v6  ;;  %v10881_v10 = vld [vmem:[#allocation2 + $0x70] sm:$0xff]   ;;  %v10885_v13 = vld [vmem:[#allocation2 + $0x28] sm:$0xff]   ;;  %vm2842_vm15 = vcmask 261120  }
  0x2a   :  { %10130 = vmatpush3.bf16.msra.mxu0 %v94_v4  ;;  %9255 = vmatpush3.bf16.msra.mxu1 %v10879_v8  ;;  %v10882_v11 = vld [vmem:[#allocation2 + $0x30] sm:$0xff]   ;;  %v10880_v14 = vld [vmem:[#allocation2 + $0xa8] sm:$0xff]   ;;  %v10887_v15 = vld [vmem:[#allocation2 + $0x60] sm:$0xff]  }
  0x2b   :  { %10135 = vmatprep.subr.bf16.mxu0 %v11500_v7  ;;  %9256 = vmatprep.subr.bf16.mxu1 %v10881_v10  ;;  %v10883_v16 = vld [vmem:[#allocation2 + $0xa0] sm:$0xff]   ;;  %v10890_v18 = vld [vmem:[#allocation2 + $0x58] sm:$0xff]   ;;  %v10893_v21 = vld [vmem:[#allocation2 + $0x50] sm:$0xff]  }
  0x2c   :  { %v10888_v17 = vld [vmem:[#allocation2 + $0x20] sm:$0xff]   ;;  %v10886_v19 = vld [vmem:[#allocation2 + $0x98] sm:$0xff]   ;;  %v10894_v22 = vld [vmem:[#allocation2 + $0x10] sm:$0xff]  }
  0x2d   :  { %10132 = vmatmul.mubr.msk.bf16.vlgmr.msra.gmra.mxu0 %vm85_vm1, %v10875_v3  ;;  %v10891_v20 = vld [vmem:[#allocation2 + $0x18] sm:$0xff]   ;;  %v10889_v23 = vld [vmem:[#allocation2 + $0x90] sm:$0xff]   ;;  %v10892_v24 = vld [vmem:[#allocation2 + $0x88] sm:$0xff]  }
  0x2e   :  { %10136 = vmatpush3.bf16.msra.mxu0 %v10876_v5  ;;  %9257 = vmatpush3.bf16.msra.mxu1 %v10882_v11  ;;  %v10895_v25 = vld [vmem:[#allocation2 + $0x80] sm:$0xff]   ;;  %v10896_v26 = vld [vmem:[#allocation2 + $0x48] sm:$0xff]   ;;  %v10904_v38 = vld [vmem:[#allocation2 + $0x138] sm:$0xff]  }
  0x2f   :  { %10137 = vmatprep.subr.bf16.mxu0 %v11500_v7  ;;  %9258 = vmatprep.subr.bf16.mxu1 %v10884_v12  ;;  %v10897_v27 = vld [vmem:[#allocation2 + $0x8] sm:$0xff]   ;;  %v10898_v28 = vld [vmem:[#allocation2 + $0x40] sm:$0xff]   ;;  %v10905_v39 = vld [vmem:[#allocation2 + $0xf8] sm:$0xff]  }
  0x30   :  { %10151 = vmatprep.mubr.msk.bf16.mxu0 %vm11501_vm2, %v11500_v7  ;;  %v10899_v29 = vld [vmem:[#allocation2] sm:$0xff]   ;;  %v10900_v37 = vld [vmem:[%s12325_s2 + $0xc] sm:$0xff]   ;;  %v10916_v46 = vld [vmem:[#allocation2 + $0x118] sm:$0xff]  }
  0x31   :  { %v10907_v40 = vld [vmem:[#allocation2 + $0x130] sm:$0xff]   ;;  %v10910_v42 = vld [vmem:[#allocation2 + $0x128] sm:$0xff]   ;;  %v10913_v44 = vld [vmem:[#allocation2 + $0x120] sm:$0xff]  }
  0x32   :  { %10138 = vmatpush3.bf16.msra.mxu0 %v10877_v9  ;;  %9259 = vmatpush3.bf16.msra.mxu1 %v10885_v13  ;;  %v10908_v41 = vld [vmem:[#allocation2 + $0xf0] sm:$0xff]   ;;  %v10911_v43 = vld [vmem:[#allocation2 + $0xe8] sm:$0xff]   ;;  %v10914_v45 = vld [vmem:[#allocation2 + $0xe0] sm:$0xff]  }
  0x33   :  { %10139 = vmatprep.subr.bf16.mxu0 %v11500_v7  ;;  %9260 = vmatprep.subr.bf16.mxu1 %v10887_v15  ;;  %v10917_v47 = vld [vmem:[#allocation2 + $0xd8] sm:$0xff]   ;;  %v10919_v48 = vld [vmem:[#allocation2 + $0x110] sm:$0xff]   ;;  %v8565_v57 = vld [vmem:[#allocation7] ss:$0 sm:$0xff] }
  0x34   :  { %v10920_v49 = vld [vmem:[#allocation2 + $0xd0] sm:$0xff]   ;;  %v8566_v60 = vld [vmem:[#allocation7 + $0x1] ss:$0 sm:$0xff]  ;;  %v10902_v5 = vld [vmem:[#allocation2 + $0x178] sm:$0xff]  }
  0x35   :  { %v10901_v4 = vld [vmem:[%s12325_s2 + $0x14] ss:$0 sps:$4 sm:$0xff]   ;;  %v10906_v8 = vld [vmem:[#allocation2 + $0x168] sm:$0xff]   ;;  %v10909_v9 = vld [vmem:[#allocation2 + $0x160] sm:$0xff]  }
  0x36   :  { %10140 = vmatpush3.bf16.msra.mxu0 %v10880_v14  ;;  %9261 = vmatpush3.bf16.msra.mxu1 %v10888_v17  ;;  %v10903_v6 = vld [vmem:[#allocation2 + $0x170] sm:$0xff]   ;;  %v10912_v10 = vld [vmem:[#allocation2 + $0x158] sm:$0xff]   ;;  %v10918_v12 = vld [vmem:[#allocation2 + $0x148] sm:$0xff]  }
  0x37   :  { %10141 = vmatprep.subr.bf16.mxu0 %v11500_v7  ;;  %9262 = vmatprep.subr.bf16.mxu1 %v10890_v18  ;;  %v10915_v11 = vld [vmem:[#allocation2 + $0x150] sm:$0xff]   ;;  %v10921_v13 = vld [vmem:[#allocation2 + $0x140] sm:$0xff]   ;;  %v10922_v14 = vld [vmem:[#allocation2 + $0x108] sm:$0xff]  }
  0x38   :  { %v10923_v15 = vld [vmem:[#allocation2 + $0xc8] sm:$0xff]   ;;  %v10925_v17 = vld [vmem:[#allocation2 + $0xc0] sm:$0xff]  }
  0x3a   :  { %10142 = vmatpush3.bf16.msra.mxu0 %v10883_v16  ;;  %9263 = vmatpush3.bf16.msra.mxu1 %v10891_v20  ;;  %v10924_v16 = vld [vmem:[#allocation2 + $0x100] sm:$0xff]  }
  0x3b   :  { %10143 = vmatprep.subr.bf16.mxu0 %v11500_v7  ;;  %9264 = vmatprep.subr.bf16.mxu1 %v10893_v21 }
  0x3e   :  { %10144 = vmatpush3.bf16.msra.mxu0 %v10886_v19  ;;  %9265 = vmatpush3.bf16.msra.mxu1 %v10894_v22 }
  0x3f   :  { %10145 = vmatprep.subr.bf16.mxu0 %v11500_v7  ;;  %9266 = vmatprep.subr.bf16.mxu1 %v10896_v26  ;;  %v10930_v26 = vld [vmem:[#allocation2 + $0x1f8] sm:$0xff]  }
  0x42   :  { %10146 = vmatpush3.bf16.msra.mxu0 %v10889_v23  ;;  %9267 = vmatpush3.bf16.msra.mxu1 %v10897_v27  ;;  %v10931_v27 = vld [vmem:[#allocation2 + $0x1b8] sm:$0xff]  }
  0x43   :  { %10147 = vmatprep.subr.bf16.mxu0 %v11500_v7  ;;  %9268 = vmatprep.subr.bf16.mxu1 %v10898_v28  ;;  %v10933_v28 = vld [vmem:[#allocation2 + $0x1f0] sm:$0xff]  }
  0x46   :  { %10148 = vmatpush3.bf16.msra.mxu0 %v10892_v24  ;;  %9269 = vmatpush3.bf16.msra.mxu1 %v10899_v29  ;;  %v10934_v29 = vld [vmem:[#allocation2 + $0x1b0] sm:$0xff]  }
  0x47   :  { %10149 = vmatprep.subr.bf16.mxu0 %v11500_v7 }
  0x4a   :  { %10150 = vmatpush3.bf16.msra.mxu0 %v10895_v25  ;;  %v10926_v25 = vld [vmem:[%s12325_s2 + $0x18] sm:$0xff]  }
  0x4b   :  { %9288 = vmatprep.subr.bf16.mxu0 %v10904_v38 }
  0xed   :  { %v10133_v30 = vpop.f32.mrf.mxu0 }
  0xee   :  { %v146_v31 = vpack.c.bf16 %v10133_v30, %v10133_v30  ;;  %v10936_v30 = vld [vmem:[#allocation2 + $0x1e8] sm:$0xff]  }
  0xef   :  { %v130_v32 = vpop.f32.mrf.mxu0 }
  0xf0   :  { %10152 = vmatmul.mubr.bf16.vlgmr.msra.gmra.mxu0 %v146_v31  ;;  %v144_v36 = vpack.c.bf16 %v130_v32, %v130_v32  ;;  %v10937_v31 = vld [vmem:[#allocation2 + $0x1a8] sm:$0xff]   ;;  %v10939_v32 = vld [vmem:[#allocation2 + $0x1e0] sm:$0xff]  }
  0xf1   :  { %v10134_v33 = vpop.f32.mrf.mxu0  ;;  %9289 = vmatpush3.bf16.msra.mxu0 %v10905_v39 }
  0xf2   :  { %9290 = vmatprep.subr.bf16.mxu0 %v10907_v40  ;;  %v10940_v33 = vld [vmem:[#allocation2 + $0x1a0] sm:$0xff]  }
  0xf3   :  { %v133_v34 = vpop.f32.mrf.mxu0 }
  0xf4   :  { %v145_v35 = vpack.c.bf16 %v133_v34, %v133_v34  ;;  %v10942_v34 = vld [vmem:[#allocation2 + $0x1d8] sm:$0xff]  }
  0xf5   :  { %9291 = vmatpush3.bf16.msra.mxu0 %v10908_v41 }
  0xf6   :  { %371 = vmatprep.mubr.bf16.mxu1 %v145_v35  ;;  %9292 = vmatprep.subr.bf16.mxu0 %v10910_v42  ;;  %v10943_v35 = vld [vmem:[#allocation2 + $0x198] sm:$0xff]  }
  0xf7   :  { %372 = vmatmul.mubr.bf16.vlgmr.msra.gmra.mxu1 %v144_v36  ;;  %v10945_v36 = vld [vmem:[#allocation2 + $0x1d0] sm:$0xff]  }
  0xf8   :  { %10157 = vmatprep.mubr.msk.bf16.mxu1 %vm447_vm3, %v10900_v37  ;;  %v10946_v37 = vld [vmem:[#allocation2 + $0x190] sm:$0xff]  }
  0xf9   :  { %9293 = vmatpush3.bf16.msra.mxu0 %v10911_v43 }
  0xfa   :  { %9294 = vmatprep.subr.bf16.mxu0 %v10913_v44 }
  0xfd   :  { %9295 = vmatpush3.bf16.msra.mxu0 %v10914_v45  ;;  %v8598_v45 = vld [vmem:[#allocation7 + $0x2] ss:$0 sm:$0xff] }
  0xfe   :  { %9296 = vmatprep.subr.bf16.mxu0 %v10916_v46 }
 0x101   :  { %9297 = vmatpush3.bf16.msra.mxu0 %v10917_v47 }
 0x102   :  { %9298 = vmatprep.subr.bf16.mxu0 %v10919_v48  ;;  %v8599_v48 = vld [vmem:[#allocation7 + $0x3] ss:$0 sm:$0xff] }
 0x105   :  { %9299 = vmatpush3.bf16.msra.mxu0 %v10920_v49 }
 0x106   :  { %9300 = vmatprep.subr.bf16.mxu0 %v10922_v14  ;;  %v10956_v14 = vld [vmem:[#allocation2 + $0x278] sm:$0xff]  }
 0x109   :  { %9301 = vmatpush3.bf16.msra.mxu0 %v10923_v15  ;;  %v10957_v15 = vld [vmem:[#allocation2 + $0x2b0] sm:$0xff]  }
 0x10a   :  { %9302 = vmatprep.subr.bf16.mxu0 %v10924_v16  ;;  %v10958_v16 = vld [vmem:[#allocation2 + $0x270] sm:$0xff]  }
 0x10d   :  { %9303 = vmatpush3.bf16.msra.mxu0 %v10925_v17  ;;  %v10959_v17 = vld [vmem:[#allocation2 + $0x2a8] sm:$0xff]  }
 0x1b0   :  { %v413_v50 = vpop.f32.mrf.mxu0 }
 0x1b2   :  { %v10153_v51 = vpop.f32.mrf.mxu0 }
 0x1b4   :  { %v416_v52 = vpop.f32.mrf.mxu0 }
 0x1b6   :  { %v10154_v53 = vpop.f32.mrf.mxu0 }
 0x1b7   :  { %v9270_v54 = vpop.f32.mrf.mxu1 }
 0x1b9   :  { %v9271_v55 = vpop.f32.mrf.mxu1 }
 0x1ba   :  { %v9272_v56 = vadd.f32 %v9271_v55, %v9270_v54 }
 0x1bb   :  { %v9273_v58 = vpop.f32.mrf.mxu1 }
 0x1bc   :  { %v414_v59 = vadd.f32 %v9272_v56, %v413_v50  ;;  %v10927_v56 = vld [vmem:[%s12325_s2 + $0x20] ss:$0 sps:$4 sm:$0xff]   ;;  %v10929_v58 = vld [vmem:[#allocation2 + $0x230] sm:$0xff]  }
 0x1bd   :  { %v9274_v61 = vpop.f32.mrf.mxu1 }
 0x1be   :  { %v424_v62 = vmul.f32 %v8565_v57, %v414_v59  ;;  %v10928_v57 = vld [vmem:[#allocation2 + $0x238] sm:$0xff]   ;;  %v10932_v59 = vld [vmem:[#allocation2 + $0x228] sm:$0xff]  }
 0x1bf   :  { %v10938_v61 = vld [vmem:[#allocation2 + $0x218] sm:$0xff]  }
 0x1c0   :  { %v430_v63 = vadd.f32 %v8566_v60, %v424_v62  ;;  %v10935_v60 = vld [vmem:[#allocation2 + $0x220] sm:$0xff]   ;;  %v10941_v62 = vld [vmem:[#allocation2 + $0x210] sm:$0xff]  }
 0x1c2   :  { %v432_v0 = vmul.f32 0.1, %v430_v63  ;;  %vm431_vm4 = vcmp.gt.f32.partialorder %v430_v63, 0.0 }
 0x1c4   :  { %v433_v1 = vsel %vm431_vm4, %v430_v63, %v432_v0  ;;  %v10944_v63 = vld [vmem:[#allocation2 + $0x208] sm:$0xff]   ;;  %v10947_v0 = vld [vmem:[#allocation2 + $0x200] sm:$0xff]  }
 0x1c5   :  { %v438_v2 = vpack.c.bf16 %v433_v1, %v433_v1  ;;  %v10948_v1 = vld [vmem:[#allocation2 + $0x1c8] sm:$0xff]  }
 0x1c7   :  { %10860 = vmatprep.subr.msk.bf16.mxu1 %vm454_vm5, %v438_v2  ;;  %v456_v3 = vsel %vm454_vm5, %v438_v2, 0  ;;  %v10949_v2 = vld [vmem:[#allocation2 + $0x188] sm:$0xff]  }
 0x1c8   :  { %10156 = vmatpush3.bf16.msra.mxu1 %v456_v3  ;;  %v10950_v3 = vld [vmem:[#allocation2 + $0x1c0] sm:$0xff]  }
 0x1c9   :  { %10161 = vmatprep.subr.bf16.mxu1 %v11500_v7 }
 0x1cb   :  { %10158 = vmatmul.mubr.msk.bf16.vlgmr.msra.gmra.mxu1 %vm447_vm3, %v10901_v4  ;;  %v10951_v4 = vld [vmem:[#allocation2 + $0x180] sm:$0xff]  }
 0x1cc   :  { %10162 = vmatpush3.bf16.msra.mxu1 %v10902_v5  ;;  %10177 = vmatprep.mubr.msk.bf16.mxu1 %vm11501_vm2, %v11500_v7 }
 0x1cd   :  { %10163 = vmatprep.subr.bf16.mxu1 %v11500_v7 }
 0x1d0   :  { %10164 = vmatpush3.bf16.msra.mxu1 %v10903_v6 }
 0x1d1   :  { %10165 = vmatprep.subr.bf16.mxu1 %v11500_v7 }
 0x1d4   :  { %10166 = vmatpush3.bf16.msra.mxu1 %v10906_v8 }
 0x1d5   :  { %10167 = vmatprep.subr.bf16.mxu1 %v11500_v7 }
 0x1d8   :  { %10168 = vmatpush3.bf16.msra.mxu1 %v10909_v9 }
 0x1d9   :  { %10169 = vmatprep.subr.bf16.mxu1 %v11500_v7 }
 0x1dc   :  { %10170 = vmatpush3.bf16.msra.mxu1 %v10912_v10 }
 0x1dd   :  { %10171 = vmatprep.subr.bf16.mxu1 %v11500_v7 }
 0x1e0   :  { %10172 = vmatpush3.bf16.msra.mxu1 %v10915_v11 }
 0x1e1   :  { %10173 = vmatprep.subr.bf16.mxu1 %v11500_v7 }
 0x1e4   :  { %10174 = vmatpush3.bf16.msra.mxu1 %v10918_v12 }
 0x1e5   :  { %10175 = vmatprep.subr.bf16.mxu1 %v11500_v7 }
 0x1e8   :  { %10176 = vmatpush3.bf16.msra.mxu1 %v10921_v13  ;;  %v10955_v13 = vld [vmem:[#allocation2 + $0x2b8] sm:$0xff]  }
 0x1e9   :  { %9322 = vmatprep.subr.bf16.mxu1 %v10930_v26 }
 0x28b   :  { %v10159_v18 = vpop.f32.mrf.mxu1 }
 0x28c   :  { %v508_v19 = vpack.c.bf16 %v10159_v18, %v10159_v18  ;;  %v10961_v18 = vld [vmem:[#allocation2 + $0x268] sm:$0xff]  }
 0x28d   :  { %v492_v20 = vpop.f32.mrf.mxu1 }
 0x28e   :  { %10178 = vmatmul.mubr.bf16.vlgmr.msra.gmra.mxu1 %v508_v19  ;;  %v506_v24 = vpack.c.bf16 %v492_v20, %v492_v20  ;;  %v10962_v19 = vld [vmem:[#allocation2 + $0x2a0] sm:$0xff]  }
 0x28f   :  { %v10160_v21 = vpop.f32.mrf.mxu1  ;;  %9323 = vmatpush3.bf16.msra.mxu1 %v10931_v27  ;;  %v10964_v20 = vld [vmem:[#allocation2 + $0x260] sm:$0xff]  }
 0x290   :  { %9324 = vmatprep.subr.bf16.mxu1 %v10933_v28  ;;  %v8631_v28 = vld [vmem:[#allocation7 + $0x4] ss:$0 sm:$0xff] }
 0x291   :  { %v495_v22 = vpop.f32.mrf.mxu1 }
 0x292   :  { %v507_v23 = vpack.c.bf16 %v495_v22, %v495_v22 }
 0x293   :  { %9325 = vmatpush3.bf16.msra.mxu1 %v10934_v29 }
 0x294   :  { %734 = vmatprep.mubr.bf16.mxu0 %v507_v23  ;;  %9326 = vmatprep.subr.bf16.mxu1 %v10936_v30 }
 0x295   :  { %735 = vmatmul.mubr.bf16.vlgmr.msra.gmra.mxu0 %v506_v24 }
 0x296   :  { %10183 = vmatprep.mubr.msk.bf16.mxu0 %vm447_vm3, %v10926_v25 }
 0x297   :  { %9327 = vmatpush3.bf16.msra.mxu1 %v10937_v31  ;;  %v8632_v31 = vld [vmem:[#allocation7 + $0x5] ss:$0 sm:$0xff] }
 0x298   :  { %9328 = vmatprep.subr.bf16.mxu1 %v10939_v32 }
 0x29b   :  { %9329 = vmatpush3.bf16.msra.mxu1 %v10940_v33 }
 0x29c   :  { %9330 = vmatprep.subr.bf16.mxu1 %v10942_v34 }
 0x29f   :  { %9331 = vmatpush3.bf16.msra.mxu1 %v10943_v35 }
 0x2a0   :  { %9332 = vmatprep.subr.bf16.mxu1 %v10945_v36 }
 0x2a3   :  { %9333 = vmatpush3.bf16.msra.mxu1 %v10946_v37 }
 0x2a4   :  { %9334 = vmatprep.subr.bf16.mxu1 %v10948_v1 }
 0x2a7   :  { %9335 = vmatpush3.bf16.msra.mxu1 %v10949_v2 }
 0x2a8   :  { %9336 = vmatprep.subr.bf16.mxu1 %v10950_v3 }
 0x2ab   :  { %9337 = vmatpush3.bf16.msra.mxu1 %v10951_v4 }
 0x2ac   :  { %10207 = vmatprep.subr.bf16.mxu1 %v11500_v7 }
 0x34e   :  { %v776_v38 = vpop.f32.mrf.mxu1 }
 0x350   :  { %v10179_v39 = vpop.f32.mrf.mxu1 }
 0x351   :  { %v10952_v39 = vld [vmem:[%s12326_s3] sm:$0xff]  }
 0x352   :  { %v779_v40 = vpop.f32.mrf.mxu1 }
 0x353   :  { %v10960_v40 = vld [vmem:[#allocation2 + $0x2f8] sm:$0xff]  }
 0x354   :  { %v10180_v41 = vpop.f32.mrf.mxu1 }
 0x355   :  { %v9304_v42 = vpop.f32.mrf.mxu0  ;;  %v10963_v41 = vld [vmem:[#allocation2 + $0x2f0] sm:$0xff]  }
 0x357   :  { %v9305_v43 = vpop.f32.mrf.mxu0 }
 0x358   :  { %v9306_v44 = vadd.f32 %v9305_v43, %v9304_v42  ;;  %v10953_v42 = vld [vmem:[%s12326_s3 + $0x8] sm:$0xff]   ;;  %v10954_v43 = vld [vmem:[%s12326_s3 + $0x10] sm:$0xff]  }
 0x359   :  { %v9307_v46 = vpop.f32.mrf.mxu0 }
 0x35a   :  { %v777_v47 = vadd.f32 %v9306_v44, %v776_v38  ;;  %v10965_v44 = vld [vmem:[#allocation2 + $0x298] sm:$0xff]  }
 0x35b   :  { %v9308_v49 = vpop.f32.mrf.mxu0  ;;  %v10967_v46 = vld [vmem:[#allocation2 + $0x258] sm:$0xff]  }
 0x35c   :  { %v788_v50 = vmul.f32 %v8598_v45, %v777_v47  ;;  %v10966_v45 = vld [vmem:[#allocation2 + $0x2e8] sm:$0xff]   ;;  %v10968_v47 = vld [vmem:[#allocation2 + $0x290] sm:$0xff]  }
 0x35d   :  { %v10970_v49 = vld [vmem:[#allocation2 + $0x250] sm:$0xff]  }
 0x35e   :  { %v794_v51 = vadd.f32 %v8599_v48, %v788_v50  ;;  %v10969_v48 = vld [vmem:[#allocation2 + $0x2e0] sm:$0xff]   ;;  %v10971_v50 = vld [vmem:[#allocation2 + $0x288] sm:$0xff]  }
 0x360   :  { %v796_v52 = vmul.f32 0.1, %v794_v51  ;;  %vm795_vm6 = vcmp.gt.f32.partialorder %v794_v51, 0.0 }
 0x362   :  { %v797_v53 = vsel %vm795_vm6, %v794_v51, %v796_v52  ;;  %v10972_v51 = vld [vmem:[#allocation2 + $0x2d8] sm:$0xff]   ;;  %v10973_v52 = vld [vmem:[#allocation2 + $0x248] sm:$0xff]  }
 0x363   :  { %v802_v54 = vpack.c.bf16 %v797_v53, %v797_v53  ;;  %v10974_v53 = vld [vmem:[#allocation2 + $0x280] sm:$0xff]  }
 0x365   :  { %10861 = vmatprep.subr.msk.bf16.mxu0 %vm454_vm5, %v802_v54  ;;  %v818_v55 = vsel %vm454_vm5, %v802_v54, 0  ;;  %v10975_v54 = vld [vmem:[#allocation2 + $0x2d0] sm:$0xff]  }
 0x366   :  { %10182 = vmatpush3.bf16.msra.mxu0 %v818_v55  ;;  %v10976_v55 = vld [vmem:[#allocation2 + $0x240] sm:$0xff]  }
 0x367   :  { %10187 = vmatprep.subr.bf16.mxu0 %v11500_v7 }
 0x369   :  { %10184 = vmatmul.mubr.msk.bf16.vlgmr.msra.gmra.mxu0 %vm447_vm3, %v10927_v56  ;;  %v10977_v56 = vld [vmem:[#allocation2 + $0x2c8] sm:$0xff]  }
 0x36a   :  { %10188 = vmatpush3.bf16.msra.mxu0 %v10928_v57  ;;  %10203 = vmatprep.mubr.msk.bf16.mxu0 %vm11501_vm2, %v11500_v7  ;;  %v10978_v57 = vld [vmem:[#allocation2 + $0x2c0] sm:$0xff]  }
 0x36b   :  { %10189 = vmatprep.subr.bf16.mxu0 %v11500_v7 }
 0x36e   :  { %10190 = vmatpush3.bf16.msra.mxu0 %v10929_v58 }
 0x36f   :  { %10191 = vmatprep.subr.bf16.mxu0 %v11500_v7 }
 0x372   :  { %10192 = vmatpush3.bf16.msra.mxu0 %v10932_v59 }
 0x373   :  { %10193 = vmatprep.subr.bf16.mxu0 %v11500_v7 }
 0x376   :  { %10194 = vmatpush3.bf16.msra.mxu0 %v10935_v60 }
 0x377   :  { %10195 = vmatprep.subr.bf16.mxu0 %v11500_v7 }
 0x37a   :  { %10196 = vmatpush3.bf16.msra.mxu0 %v10938_v61 }
 0x37b   :  { %10197 = vmatprep.subr.bf16.mxu0 %v11500_v7 }
 0x37e   :  { %10198 = vmatpush3.bf16.msra.mxu0 %v10941_v62 }
 0x37f   :  { %10199 = vmatprep.subr.bf16.mxu0 %v11500_v7 }
 0x382   :  { %10200 = vmatpush3.bf16.msra.mxu0 %v10944_v63 }
 0x383   :  { %10201 = vmatprep.subr.bf16.mxu0 %v11500_v7 }
 0x386   :  { %10202 = vmatpush3.bf16.msra.mxu0 %v10947_v0 }
 0x387   :  { %9357 = vmatprep.subr.bf16.mxu0 %v10955_v13  ;;  %v10985_v13 = vld [vmem:[#allocation2 + $0x330] sm:$0xff]  }
 0x429   :  { %v10185_v5 = vpop.f32.mrf.mxu0 }
 0x42a   :  { %v870_v6 = vpack.c.bf16 %v10185_v5, %v10185_v5 }
 0x42b   :  { %v854_v8 = vpop.f32.mrf.mxu0 }
 0x42c   :  { %10204 = vmatmul.mubr.bf16.vlgmr.msra.gmra.mxu0 %v870_v6  ;;  %v868_v12 = vpack.c.bf16 %v854_v8, %v854_v8 }
 0x42d   :  { %v10186_v9 = vpop.f32.mrf.mxu0  ;;  %9358 = vmatpush3.bf16.msra.mxu0 %v10956_v14  ;;  %v10986_v14 = vld [vmem:[#allocation2 + $0x368] sm:$0xff]  }
 0x42e   :  { %9359 = vmatprep.subr.bf16.mxu0 %v10957_v15  ;;  %v10988_v15 = vld [vmem:[#allocation2 + $0x328] sm:$0xff]  }
 0x42f   :  { %v857_v10 = vpop.f32.mrf.mxu0 }
 0x430   :  { %v869_v11 = vpack.c.bf16 %v857_v10, %v857_v10  ;;  %v10982_v10 = vld [vmem:[#allocation2 + $0x378] sm:$0xff]  }
 0x431   :  { %9360 = vmatpush3.bf16.msra.mxu0 %v10958_v16  ;;  %v10989_v16 = vld [vmem:[#allocation2 + $0x360] sm:$0xff]  }
 0x432   :  { %1096 = vmatprep.mubr.bf16.mxu1 %v869_v11  ;;  %9361 = vmatprep.subr.bf16.mxu0 %v10959_v17  ;;  %v10983_v11 = vld [vmem:[#allocation2 + $0x338] sm:$0xff]   ;;  %v10991_v17 = vld [vmem:[#allocation2 + $0x320] sm:$0xff]  }
 0x433   :  { %1097 = vmatmul.mubr.bf16.vlgmr.msra.gmra.mxu1 %v868_v12  ;;  %v10984_v12 = vld [vmem:[#allocation2 + $0x370] sm:$0xff]  }
 0x434   :  { %10209 = vmatprep.mubr.msk.bf16.mxu1 %vm11501_vm2, %v11500_v7 }
 0x435   :  { %9362 = vmatpush3.bf16.msra.mxu0 %v10961_v18 }
 0x436   :  { %9363 = vmatprep.subr.bf16.mxu0 %v10962_v19 }
 0x439   :  { %9364 = vmatpush3.bf16.msra.mxu0 %v10964_v20 }
 0x43a   :  { %9365 = vmatprep.subr.bf16.mxu0 %v10965_v44  ;;  %v10980_v44 = vld [vmem:[%s12326_s3 + $0x20] sm:$0xff]  }
 0x43d   :  { %9366 = vmatpush3.bf16.msra.mxu0 %v10967_v46  ;;  %v10992_v46 = vld [vmem:[#allocation2 + $0x358] sm:$0xff]  }
 0x43e   :  { %9367 = vmatprep.subr.bf16.mxu0 %v10968_v47  ;;  %v10993_v47 = vld [vmem:[#allocation2 + $0x3a8] sm:$0xff]  }
 0x441   :  { %9368 = vmatpush3.bf16.msra.mxu0 %v10970_v49  ;;  %v10995_v49 = vld [vmem:[#allocation2 + $0x350] sm:$0xff]  }
 0x442   :  { %9369 = vmatprep.subr.bf16.mxu0 %v10971_v50  ;;  %v10996_v50 = vld [vmem:[#allocation2 + $0x3a0] sm:$0xff]  }
 0x445   :  { %9370 = vmatpush3.bf16.msra.mxu0 %v10973_v52  ;;  %v10998_v52 = vld [vmem:[#allocation2 + $0x348] sm:$0xff]  }
 0x446   :  { %9371 = vmatprep.subr.bf16.mxu0 %v10974_v53  ;;  %v10999_v53 = vld [vmem:[#allocation2 + $0x398] sm:$0xff]  }
 0x449   :  { %9372 = vmatpush3.bf16.msra.mxu0 %v10976_v55  ;;  %v11001_v55 = vld [vmem:[#allocation2 + $0x340] sm:$0xff]  }
 0x44a   :  { %10241 = vmatprep.subr.bf16.mxu0 %v11500_v7 }
 0x4ec   :  { %v1138_v21 = vpop.f32.mrf.mxu0 }
 0x4ee   :  { %v10205_v22 = vpop.f32.mrf.mxu0 }
 0x4f0   :  { %v1141_v23 = vpop.f32.mrf.mxu0 }
 0x4f2   :  { %v10206_v24 = vpop.f32.mrf.mxu0 }
 0x4f3   :  { %v9338_v25 = vpop.f32.mrf.mxu1  ;;  %v8663_v24 = vld [vmem:[#allocation7 + $0x6] ss:$0 sm:$0xff] }
 0x4f5   :  { %v9339_v26 = vpop.f32.mrf.mxu1 }
 0x4f6   :  { %v9340_v27 = vadd.f32 %v9339_v26, %v9338_v25  ;;  %v8664_v26 = vld [vmem:[#allocation7 + $0x7] ss:$0 sm:$0xff] }
 0x4f7   :  { %v9341_v29 = vpop.f32.mrf.mxu1 }
 0x4f8   :  { %v1139_v30 = vadd.f32 %v9340_v27, %v1138_v21 }
 0x4f9   :  { %v9342_v32 = vpop.f32.mrf.mxu1 }
 0x4fa   :  { %v1150_v33 = vmul.f32 %v8631_v28, %v1139_v30 }
 0x4fc   :  { %v1156_v34 = vadd.f32 %v8632_v31, %v1150_v33 }
 0x4fe   :  { %vm1157_vm7 = vcmp.gt.f32.partialorder %v1156_v34, 0.0  ;;  %v1158_v35 = vmul.f32 0.1, %v1156_v34 }
 0x500   :  { %v1159_v36 = vsel %vm1157_vm7, %v1156_v34, %v1158_v35 }
 0x501   :  { %v1166_v37 = vpack.c.bf16 %v1159_v36, %v1159_v36 }
 0x503   :  { %v1192_v38 = vsel %vm454_vm5, %v1166_v37, 0 }
 0x504   :  { %10208 = vmatpush3.bf16.msra.mxu1 %v1192_v38 }
 0x505   :  { %10221 = vmatprep.subr.bf16.mxu1 %v11500_v7 }
 0x507   :  { %10210 = vmatmul.mubr.msk.bf16.vlgmr.msra.gmra.mxu1 %vm447_vm3, %v10952_v39 }
 0x508   :  { %10213 = vmatprep.mubr.msk.bf16.mxu1 %vm11501_vm2, %v11500_v7  ;;  %10222 = vmatpush3.bf16.msra.mxu1 %v10960_v40 }
 0x509   :  { %10223 = vmatprep.subr.bf16.mxu1 %v11500_v7 }
 0x50c   :  { %10224 = vmatpush3.bf16.msra.mxu1 %v10963_v41  ;;  %v10979_v41 = vld [vmem:[%s12326_s3 + $0x18] sm:$0xff]  }
 0x50d   :  { %10225 = vmatprep.subr.bf16.mxu1 %v11500_v7 }
 0x50f   :  { %10214 = vmatmul.mubr.msk.bf16.gmra.mxu1 %vm447_vm3, %v10953_v42  ;;  %v10987_v42 = vld [vmem:[#allocation2 + $0x3b8] sm:$0xff]  }
 0x510   :  { %10217 = vmatprep.mubr.msk.bf16.mxu1 %vm11501_vm2, %v11500_v7  ;;  %10226 = vmatpush3.bf16.msra.mxu1 %v10966_v45  ;;  %v10981_v45 = vld [vmem:[%s12326_s3 + $0x28] sm:$0xff]  }
 0x511   :  { %10227 = vmatprep.subr.bf16.mxu1 %v11500_v7 }
 0x514   :  { %10228 = vmatpush3.bf16.msra.mxu1 %v10969_v48  ;;  %v10994_v48 = vld [vmem:[#allocation2 + $0x318] sm:$0xff]  }
 0x515   :  { %10229 = vmatprep.subr.bf16.mxu1 %v11500_v7 }
 0x517   :  { %10218 = vmatmul.mubr.msk.bf16.gmra.mxu1 %vm447_vm3, %v10954_v43  ;;  %v10990_v43 = vld [vmem:[#allocation2 + $0x3b0] sm:$0xff]  }
 0x518   :  { %10237 = vmatprep.mubr.msk.bf16.mxu1 %vm11501_vm2, %v11500_v7  ;;  %10230 = vmatpush3.bf16.msra.mxu1 %v10972_v51  ;;  %v10997_v51 = vld [vmem:[#allocation2 + $0x310] sm:$0xff]  }
 0x519   :  { %10231 = vmatprep.subr.bf16.mxu1 %v11500_v7 }
 0x51c   :  { %10232 = vmatpush3.bf16.msra.mxu1 %v10975_v54  ;;  %v11000_v54 = vld [vmem:[#allocation2 + $0x308] sm:$0xff]  }
 0x51d   :  { %10233 = vmatprep.subr.bf16.mxu1 %v11500_v7 }
 0x520   :  { %10234 = vmatpush3.bf16.msra.mxu1 %v10977_v56  ;;  %v11002_v56 = vld [vmem:[#allocation2 + $0x390] sm:$0xff]  }
 0x521   :  { %10235 = vmatprep.subr.bf16.mxu1 %v11500_v7 }
 0x524   :  { %10236 = vmatpush3.bf16.msra.mxu1 %v10978_v57  ;;  %v11003_v57 = vld [vmem:[#allocation2 + $0x300] sm:$0xff]  }
 0x525   :  { %9392 = vmatprep.subr.bf16.mxu1 %v10982_v10 }
 0x5c7   :  { %v1228_v58 = vpop.f32.mrf.mxu1 }
 0x5c9   :  { %v10211_v59 = vpop.f32.mrf.mxu1 }
 0x5ca   :  { %v11005_v59 = vld [vmem:[#allocation2 + $0x380] sm:$0xff]  }
 0x5cb   :  { %v1231_v60 = vpop.f32.mrf.mxu1 }
 0x5cc   :  { %v1251_v2 = vpack.c.bf16 %v1231_v60, %v1228_v58  ;;  %v11004_v58 = vld [vmem:[#allocation2 + $0x388] sm:$0xff]  }
 0x5cd   :  { %v10212_v61 = vpop.f32.mrf.mxu1 }
 0x5cf   :  { %v1236_v62 = vpop.f32.mrf.mxu1 }
 0x5d1   :  { %v10215_v63 = vpop.f32.mrf.mxu1 }
 0x5d3   :  { %v1239_v0 = vpop.f32.mrf.mxu1 }
 0x5d4   :  { %v1252_v1 = vpack.c.bf16 %v1239_v0, %v1236_v62 }
 0x5d5   :  { %v10216_v3 = vpop.f32.mrf.mxu1 }
 0x5d6   :  { %1479 = vmatprep.mubr.bf16.mxu0 %v1252_v1 }
 0x5d7   :  { %v1244_v4 = vpop.f32.mrf.mxu1  ;;  %1480 = vmatmul.mubr.bf16.vlgmr.msra.gmra.mxu0 %v1251_v2 }
 0x5d8   :  { %10243 = vmatprep.mubr.msk.bf16.mxu0 %vm11501_vm2, %v11500_v7 }
 0x5d9   :  { %v10219_v5 = vpop.f32.mrf.mxu1 }
 0x5db   :  { %v1247_v6 = vpop.f32.mrf.mxu1 }
 0x5dc   :  { %v1253_v8 = vpack.c.bf16 %v1247_v6, %v1244_v4 }
 0x5dd   :  { %v10220_v9 = vpop.f32.mrf.mxu1 }
 0x5de   :  { %10238 = vmatmul.mubr.bf16.vlgmr.msra.gmra.mxu1 %v1253_v8 }
 0x5df   :  { %9393 = vmatpush3.bf16.msra.mxu1 %v10983_v11 }
 0x5e0   :  { %9394 = vmatprep.subr.bf16.mxu1 %v10984_v12  ;;  %v11009_v12 = vld [vmem:[#allocation2 + $0x438] sm:$0xff]  }
 0x5e3   :  { %9395 = vmatpush3.bf16.msra.mxu1 %v10985_v13  ;;  %v11010_v13 = vld [vmem:[#allocation2 + $0x3f8] sm:$0xff]  }
 0x5e4   :  { %9396 = vmatprep.subr.bf16.mxu1 %v10986_v14  ;;  %v11011_v14 = vld [vmem:[#allocation2 + $0x430] sm:$0xff]  }
 0x5e7   :  { %9397 = vmatpush3.bf16.msra.mxu1 %v10988_v15  ;;  %v11012_v15 = vld [vmem:[#allocation2 + $0x3f0] sm:$0xff]  }
 0x5e8   :  { %9398 = vmatprep.subr.bf16.mxu1 %v10989_v16  ;;  %v11013_v16 = vld [vmem:[#allocation2 + $0x428] sm:$0xff]  }
 0x5eb   :  { %9399 = vmatpush3.bf16.msra.mxu1 %v10991_v17  ;;  %v11015_v17 = vld [vmem:[#allocation2 + $0x3e8] sm:$0xff]  }
 0x5ec   :  { %9400 = vmatprep.subr.bf16.mxu1 %v10992_v46  ;;  %v11007_v46 = vld [vmem:[%s12326_s3 + $0x38] sm:$0xff]  }
 0x5ef   :  { %9401 = vmatpush3.bf16.msra.mxu1 %v10994_v48  ;;  %v11019_v48 = vld [vmem:[#allocation2 + $0x418] sm:$0xff]  }
 0x5f0   :  { %9402 = vmatprep.subr.bf16.mxu1 %v10995_v49  ;;  %v11020_v49 = vld [vmem:[#allocation2 + $0x468] sm:$0xff]  }
 0x5f3   :  { %9403 = vmatpush3.bf16.msra.mxu1 %v10997_v51  ;;  %v11022_v51 = vld [vmem:[#allocation2 + $0x410] sm:$0xff]  }
 0x5f4   :  { %9404 = vmatprep.subr.bf16.mxu1 %v10998_v52  ;;  %v11023_v52 = vld [vmem:[#allocation2 + $0x460] sm:$0xff]  }
 0x5f7   :  { %9405 = vmatpush3.bf16.msra.mxu1 %v11000_v54  ;;  %v11025_v54 = vld [vmem:[#allocation2 + $0x408] sm:$0xff]  }
 0x5f8   :  { %9406 = vmatprep.subr.bf16.mxu1 %v11001_v55  ;;  %v11026_v55 = vld [vmem:[#allocation2 + $0x458] sm:$0xff]  }
 0x5fb   :  { %9407 = vmatpush3.bf16.msra.mxu1 %v11003_v57  ;;  %v11028_v57 = vld [vmem:[#allocation2 + $0x400] sm:$0xff]  }
 0x5fc   :  { %10275 = vmatprep.subr.bf16.mxu1 %v11500_v7 }
 0x697   :  { %v9373_v18 = vpop.f32.mrf.mxu0 }
 0x699   :  { %v9374_v19 = vpop.f32.mrf.mxu0 }
 0x69a   :  { %v9375_v21 = vadd.f32 %v9374_v19, %v9373_v18  ;;  %v11016_v18 = vld [vmem:[#allocation2 + $0x420] sm:$0xff]  }
 0x69b   :  { %v9376_v20 = vpop.f32.mrf.mxu0  ;;  %v11018_v19 = vld [vmem:[#allocation2 + $0x3e0] sm:$0xff]  }
 0x69d   :  { %v9377_v22 = vpop.f32.mrf.mxu0 }
 0x69e   :  { %v1522_v23 = vpop.f32.mrf.mxu1  ;;  %v9378_v28 = vadd.f32 %v9377_v22, %v9376_v20 }
 0x69f   :  { %v1523_v25 = vadd.f32 %v9375_v21, %v1522_v23 }
 0x6a0   :  { %v10239_v27 = vpop.f32.mrf.mxu1 }
 0x6a1   :  { %v1535_v29 = vmul.f32 %v8663_v24, %v1523_v25 }
 0x6a2   :  { %v1525_v30 = vpop.f32.mrf.mxu1 }
 0x6a3   :  { %v1542_v31 = vadd.f32 %v8664_v26, %v1535_v29  ;;  %v1526_v32 = vadd.f32 %v9378_v28, %v1525_v30  ;;  %v8702_v28 = vld [vmem:[#allocation7 + $0x9] ss:$0 sm:$0xff] }
 0x6a4   :  { %v10240_v33 = vpop.f32.mrf.mxu1 }
 0x6a5   :  { %v1536_v34 = vmul.f32 %v8663_v24, %v1526_v32  ;;  %v1546_v35 = vmul.f32 0.1, %v1542_v31  ;;  %vm1544_vm8 = vcmp.gt.f32.partialorder %v1542_v31, 0.0 }
 0x6a7   :  { %v1543_v36 = vadd.f32 %v8664_v26, %v1536_v34  ;;  %v1548_v38 = vsel %vm1544_vm8, %v1542_v31, %v1546_v35  ;;  %v8701_v26 = vld [vmem:[#allocation7 + $0x8] ss:$0 sm:$0xff] }
 0x6a9   :  { %vm1545_vm9 = vcmp.gt.f32.partialorder %v1543_v36, 0.0  ;;  %v1547_v37 = vmul.f32 0.1, %v1543_v36 }
 0x6ab   :  { %v1549_v39 = vsel %vm1545_vm9, %v1543_v36, %v1547_v37 }
 0x6ac   :  { %v1557_v40 = vpack.c.bf16 %v1549_v39, %v1548_v38 }
 0x6ae   :  { %10242 = vmatpush3.bf16.msra.mxu0 %v1557_v40 }
 0x6af   :  { %10255 = vmatprep.subr.bf16.mxu0 %v11500_v7 }
 0x6b1   :  { %10244 = vmatmul.mubr.msk.bf16.vlgmr.msra.gmra.mxu0 %vm1573_vm10, %v10979_v41 }
 0x6b2   :  { %10247 = vmatprep.mubr.msk.bf16.mxu0 %vm11501_vm2, %v11500_v7  ;;  %10256 = vmatpush3.bf16.msra.mxu0 %v10987_v42 }
 0x6b3   :  { %10257 = vmatprep.subr.bf16.mxu0 %v11500_v7 }
 0x6b6   :  { %10258 = vmatpush3.bf16.msra.mxu0 %v10990_v43  ;;  %v11006_v43 = vld [vmem:[%s12326_s3 + $0x30] sm:$0xff]  }
 0x6b7   :  { %10259 = vmatprep.subr.bf16.mxu0 %v11500_v7 }
 0x6b9   :  { %10248 = vmatmul.mubr.msk.bf16.gmra.mxu0 %vm1573_vm10, %v10980_v44  ;;  %v11014_v44 = vld [vmem:[#allocation2 + $0x478] sm:$0xff]  }
 0x6ba   :  { %10251 = vmatprep.mubr.msk.bf16.mxu0 %vm11501_vm2, %v11500_v7  ;;  %10260 = vmatpush3.bf16.msra.mxu0 %v10993_v47  ;;  %v11008_v47 = vld [vmem:[%s12326_s3 + $0x40] sm:$0xff]  }
 0x6bb   :  { %10261 = vmatprep.subr.bf16.mxu0 %v11500_v7 }
 0x6be   :  { %10262 = vmatpush3.bf16.msra.mxu0 %v10996_v50  ;;  %v11021_v50 = vld [vmem:[#allocation2 + $0x3d8] sm:$0xff]  }
 0x6bf   :  { %10263 = vmatprep.subr.bf16.mxu0 %v11500_v7 }
 0x6c1   :  { %10252 = vmatmul.mubr.msk.bf16.gmra.mxu0 %vm1573_vm10, %v10981_v45  ;;  %v11017_v45 = vld [vmem:[#allocation2 + $0x470] sm:$0xff]  }
 0x6c2   :  { %10271 = vmatprep.mubr.msk.bf16.mxu0 %vm11501_vm2, %v11500_v7  ;;  %10264 = vmatpush3.bf16.msra.mxu0 %v10999_v53  ;;  %v11024_v53 = vld [vmem:[#allocation2 + $0x3d0] sm:$0xff]  }
 0x6c3   :  { %10265 = vmatprep.subr.bf16.mxu0 %v11500_v7 }
 0x6c6   :  { %10266 = vmatpush3.bf16.msra.mxu0 %v11002_v56  ;;  %v11027_v56 = vld [vmem:[#allocation2 + $0x3c8] sm:$0xff]  }
 0x6c7   :  { %10267 = vmatprep.subr.bf16.mxu0 %v11500_v7 }
 0x6ca   :  { %10268 = vmatpush3.bf16.msra.mxu0 %v11004_v58  ;;  %v11029_v58 = vld [vmem:[#allocation2 + $0x450] sm:$0xff]  }
 0x6cb   :  { %10269 = vmatprep.subr.bf16.mxu0 %v11500_v7 }
 0x6ce   :  { %10270 = vmatpush3.bf16.msra.mxu0 %v11005_v59  ;;  %v11030_v59 = vld [vmem:[#allocation2 + $0x3c0] sm:$0xff]  }
 0x6cf   :  { %9427 = vmatprep.subr.bf16.mxu0 %v11009_v12 }
 0x771   :  { %v1617_v60 = vpop.f32.mrf.mxu0 }
 0x773   :  { %v10245_v61 = vpop.f32.mrf.mxu0 }
 0x774   :  { %v11032_v61 = vld [vmem:[#allocation2 + $0x440] sm:$0xff]  }
 0x775   :  { %v1620_v62 = vpop.f32.mrf.mxu0 }
 0x776   :  { %v1640_v4 = vpack.c.bf16 %v1620_v62, %v1617_v60  ;;  %v11031_v60 = vld [vmem:[#allocation2 + $0x448] sm:$0xff]  }
 0x777   :  { %v10246_v63 = vpop.f32.mrf.mxu0 }
 0x779   :  { %v1625_v0 = vpop.f32.mrf.mxu0 }
 0x77b   :  { %v10249_v1 = vpop.f32.mrf.mxu0 }
 0x77d   :  { %v1628_v2 = vpop.f32.mrf.mxu0 }
 0x77e   :  { %v1641_v3 = vpack.c.bf16 %v1628_v2, %v1625_v0 }
 0x77f   :  { %v10250_v5 = vpop.f32.mrf.mxu0 }
 0x780   :  { %1868 = vmatprep.mubr.bf16.mxu1 %v1641_v3 }
 0x781   :  { %v1633_v6 = vpop.f32.mrf.mxu0  ;;  %1869 = vmatmul.mubr.bf16.vlgmr.msra.gmra.mxu1 %v1640_v4 }
 0x782   :  { %10277 = vmatprep.mubr.msk.bf16.mxu1 %vm11501_vm2, %v11500_v7 }
 0x783   :  { %v10253_v8 = vpop.f32.mrf.mxu0 }
 0x785   :  { %v1636_v9 = vpop.f32.mrf.mxu0 }
 0x786   :  { %v1642_v10 = vpack.c.bf16 %v1636_v9, %v1633_v6 }
 0x787   :  { %v10254_v11 = vpop.f32.mrf.mxu0 }
 0x788   :  { %10272 = vmatmul.mubr.bf16.vlgmr.msra.gmra.mxu0 %v1642_v10 }
 0x789   :  { %9428 = vmatpush3.bf16.msra.mxu0 %v11010_v13 }
 0x78a   :  { %9429 = vmatprep.subr.bf16.mxu0 %v11011_v14  ;;  %v11039_v14 = vld [vmem:[#allocation2 + $0x4f8] sm:$0xff]  }
 0x78d   :  { %9430 = vmatpush3.bf16.msra.mxu0 %v11012_v15  ;;  %v11040_v15 = vld [vmem:[#allocation2 + $0x4b8] sm:$0xff]  }
 0x78e   :  { %9431 = vmatprep.subr.bf16.mxu0 %v11013_v16  ;;  %v11041_v16 = vld [vmem:[#allocation2 + $0x4f0] sm:$0xff]  }
 0x791   :  { %9432 = vmatpush3.bf16.msra.mxu0 %v11015_v17  ;;  %v11042_v17 = vld [vmem:[#allocation2 + $0x4b0] sm:$0xff]  }
 0x792   :  { %9433 = vmatprep.subr.bf16.mxu0 %v11016_v18  ;;  %v11043_v18 = vld [vmem:[#allocation2 + $0x4e8] sm:$0xff]  }
 0x795   :  { %9434 = vmatpush3.bf16.msra.mxu0 %v11018_v19  ;;  %v11045_v19 = vld [vmem:[#allocation2 + $0x4a8] sm:$0xff]  }
 0x796   :  { %9435 = vmatprep.subr.bf16.mxu0 %v11019_v48  ;;  %v11047_v48 = vld [vmem:[#allocation2 + $0x530] sm:$0xff]  }
 0x799   :  { %9436 = vmatpush3.bf16.msra.mxu0 %v11021_v50  ;;  %v11037_v50 = vld [vmem:[%s12327_s4 + $0x20] sm:$0xff]  }
 0x79a   :  { %9437 = vmatprep.subr.bf16.mxu0 %v11022_v51  ;;  %v11038_v51 = vld [vmem:[%s12327_s4 + $0x28] sm:$0xff]  }
 0x79d   :  { %9438 = vmatpush3.bf16.msra.mxu0 %v11024_v53  ;;  %v11050_v53 = vld [vmem:[#allocation2 + $0x528] sm:$0xff]  }
 0x79e   :  { %9439 = vmatprep.subr.bf16.mxu0 %v11025_v54  ;;  %v11051_v54 = vld [vmem:[#allocation2 + $0x498] sm:$0xff]  }
 0x7a1   :  { %9440 = vmatpush3.bf16.msra.mxu0 %v11027_v56  ;;  %v11053_v56 = vld [vmem:[#allocation2 + $0x520] sm:$0xff]  }
 0x7a2   :  { %9441 = vmatprep.subr.bf16.mxu0 %v11028_v57  ;;  %v11054_v57 = vld [vmem:[#allocation2 + $0x490] sm:$0xff]  }
 0x7a5   :  { %9442 = vmatpush3.bf16.msra.mxu0 %v11030_v59  ;;  %v11056_v59 = vld [vmem:[#allocation2 + $0x518] sm:$0xff]  }
 0x841   :  { %v9408_v20 = vpop.f32.mrf.mxu1 }
 0x843   :  { %v9409_v21 = vpop.f32.mrf.mxu1 }
 0x844   :  { %v9410_v23 = vadd.f32 %v9409_v21, %v9408_v20  ;;  %v11046_v20 = vld [vmem:[#allocation2 + $0x4e0] sm:$0xff]  }
 0x845   :  { %v9411_v22 = vpop.f32.mrf.mxu1  ;;  %v11048_v21 = vld [vmem:[#allocation2 + $0x4a0] sm:$0xff]  }
 0x847   :  { %v9412_v24 = vpop.f32.mrf.mxu1 }
 0x848   :  { %v1911_v25 = vpop.f32.mrf.mxu0  ;;  %v9413_v30 = vadd.f32 %v9412_v24, %v9411_v22 }
 0x849   :  { %v1912_v27 = vadd.f32 %v9410_v23, %v1911_v25 }
 0x84a   :  { %v10273_v29 = vpop.f32.mrf.mxu0 }
 0x84b   :  { %v1924_v31 = vmul.f32 %v8701_v26, %v1912_v27 }
 0x84c   :  { %v1914_v32 = vpop.f32.mrf.mxu0 }
 0x84d   :  { %v1931_v33 = vadd.f32 %v8702_v28, %v1924_v31  ;;  %v1915_v34 = vadd.f32 %v9413_v30, %v1914_v32  ;;  %v8740_v30 = vld [vmem:[#allocation7 + $0xb] ss:$0 sm:$0xff] }
 0x84e   :  { %v10274_v35 = vpop.f32.mrf.mxu0 }
 0x84f   :  { %v1925_v36 = vmul.f32 %v8701_v26, %v1915_v34  ;;  %v1935_v37 = vmul.f32 0.1, %v1931_v33  ;;  %vm1933_vm11 = vcmp.gt.f32.partialorder %v1931_v33, 0.0 }
 0x851   :  { %v1932_v38 = vadd.f32 %v8702_v28, %v1925_v36  ;;  %v1937_v40 = vsel %vm1933_vm11, %v1931_v33, %v1935_v37  ;;  %v8739_v28 = vld [vmem:[#allocation7 + $0xa] ss:$0 sm:$0xff] }
 0x853   :  { %vm1934_vm12 = vcmp.gt.f32.partialorder %v1932_v38, 0.0  ;;  %v1936_v39 = vmul.f32 0.1, %v1932_v38 }
 0x855   :  { %v1938_v41 = vsel %vm1934_vm12, %v1932_v38, %v1936_v39  ;;  %vm4468_vm12 = vcmask 523264  }
 0x856   :  { %v1946_v42 = vpack.c.bf16 %v1938_v41, %v1937_v40 }
 0x858   :  { %10276 = vmatpush3.bf16.msra.mxu1 %v1946_v42 }
 0x859   :  { %10289 = vmatprep.subr.bf16.mxu1 %v11500_v7 }
 0x85b   :  { %10278 = vmatmul.mubr.msk.bf16.vlgmr.msra.gmra.mxu1 %vm1573_vm10, %v11006_v43 }
 0x85c   :  { %10281 = vmatprep.mubr.msk.bf16.mxu1 %vm11501_vm2, %v11500_v7  ;;  %10290 = vmatpush3.bf16.msra.mxu1 %v11014_v44 }
 0x85d   :  { %10291 = vmatprep.subr.bf16.mxu1 %v11500_v7 }
 0x860   :  { %10292 = vmatpush3.bf16.msra.mxu1 %v11017_v45  ;;  %v11044_v45 = vld [vmem:[#allocation2 + $0x538] sm:$0xff]  }
 0x861   :  { %10293 = vmatprep.subr.bf16.mxu1 %v11500_v7 }
 0x863   :  { %10282 = vmatmul.mubr.msk.bf16.gmra.mxu1 %vm1573_vm10, %v11007_v46  ;;  %v11034_v46 = vld [vmem:[%s12327_s4 + $0x8] sm:$0xff]  }
 0x864   :  { %10285 = vmatprep.mubr.msk.bf16.mxu1 %vm11501_vm2, %v11500_v7  ;;  %10294 = vmatpush3.bf16.msra.mxu1 %v11020_v49  ;;  %v11036_v49 = vld [vmem:[%s12327_s4 + $0x18] sm:$0xff]  }
 0x865   :  { %10295 = vmatprep.subr.bf16.mxu1 %v11500_v7 }
 0x868   :  { %10296 = vmatpush3.bf16.msra.mxu1 %v11023_v52  ;;  %v11049_v52 = vld [vmem:[#allocation2 + $0x4d8] sm:$0xff]  }
 0x869   :  { %10297 = vmatprep.subr.bf16.mxu1 %v11500_v7 }
 0x86b   :  { %10286 = vmatmul.mubr.msk.bf16.gmra.mxu1 %vm1573_vm10, %v11008_v47  ;;  %v11035_v47 = vld [vmem:[%s12327_s4 + $0x10] sm:$0xff]  }
 0x86c   :  { %10305 = vmatprep.mubr.msk.bf16.mxu1 %vm11501_vm2, %v11500_v7  ;;  %10298 = vmatpush3.bf16.msra.mxu1 %v11026_v55  ;;  %v11052_v55 = vld [vmem:[#allocation2 + $0x4d0] sm:$0xff]  }
 0x86d   :  { %10299 = vmatprep.subr.bf16.mxu1 %v11500_v7 }
 0x870   :  { %10300 = vmatpush3.bf16.msra.mxu1 %v11029_v58  ;;  %v11055_v58 = vld [vmem:[#allocation2 + $0x4c8] sm:$0xff]  }
 0x871   :  { %10301 = vmatprep.subr.bf16.mxu1 %v11500_v7 }
 0x874   :  { %10302 = vmatpush3.bf16.msra.mxu1 %v11031_v60  ;;  %v11057_v60 = vld [vmem:[#allocation2 + $0x488] sm:$0xff]  }
 0x875   :  { %10303 = vmatprep.subr.bf16.mxu1 %v11500_v7  ;;  %v11033_v7 = vld [vmem:[%s12327_s4] sm:$0xff]  }
 0x878   :  { %10304 = vmatpush3.bf16.msra.mxu1 %v11032_v61  ;;  %v11058_v61 = vld [vmem:[#allocation2 + $0x4c0] sm:$0xff]  }
 0x879   :  { %9465 = vmatprep.subr.bf16.mxu1 %v11039_v14 }
 0x91b   :  { %v2005_v62 = vpop.f32.mrf.mxu1 }
 0x91d   :  { %v10279_v63 = vpop.f32.mrf.mxu1 }
 0x91e   :  { %v11060_v63 = vld [vmem:[#allocation2 + $0x480] sm:$0xff]  }
 0x91f   :  { %v2008_v0 = vpop.f32.mrf.mxu1 }
 0x920   :  { %v2028_v6 = vpack.c.bf16 %v2008_v0, %v2005_v62  ;;  %v11059_v62 = vld [vmem:[#allocation2 + $0x510] sm:$0xff]   ;;  %v11061_v0 = vld [vmem:[#allocation2 + $0x508] sm:$0xff]  }
 0x921   :  { %v10280_v1 = vpop.f32.mrf.mxu1 }
 0x922   :  { %v11062_v1 = vld [vmem:[#allocation2 + $0x500] sm:$0xff]  }
 0x923   :  { %v2013_v2 = vpop.f32.mrf.mxu1 }
 0x925   :  { %v10283_v3 = vpop.f32.mrf.mxu1 }
 0x927   :  { %v2016_v4 = vpop.f32.mrf.mxu1 }
 0x928   :  { %v2029_v5 = vpack.c.bf16 %v2016_v4, %v2013_v2 }
 0x929   :  { %v10284_v8 = vpop.f32.mrf.mxu1 }
 0x92a   :  { %2256 = vmatprep.mubr.bf16.mxu0 %v2029_v5 }
 0x92b   :  { %v2021_v9 = vpop.f32.mrf.mxu1  ;;  %2257 = vmatmul.mubr.bf16.vlgmr.msra.gmra.mxu0 %v2028_v6 }
 0x92c   :  { %10311 = vmatprep.mubr.msk.bf16.mxu0 %vm1573_vm10, %v11033_v7 }
 0x92d   :  { %v10287_v10 = vpop.f32.mrf.mxu1 }
 0x92f   :  { %v2024_v11 = vpop.f32.mrf.mxu1 }
 0x930   :  { %v2030_v12 = vpack.c.bf16 %v2024_v11, %v2021_v9 }
 0x931   :  { %v10288_v13 = vpop.f32.mrf.mxu1 }
 0x932   :  { %10306 = vmatmul.mubr.bf16.vlgmr.msra.gmra.mxu1 %v2030_v12 }
 0x933   :  { %9466 = vmatpush3.bf16.msra.mxu1 %v11040_v15 }
 0x934   :  { %9467 = vmatprep.subr.bf16.mxu1 %v11041_v16 }
 0x937   :  { %9468 = vmatpush3.bf16.msra.mxu1 %v11042_v17 }
 0x938   :  { %9469 = vmatprep.subr.bf16.mxu1 %v11043_v18 }
 0x93b   :  { %9470 = vmatpush3.bf16.msra.mxu1 %v11045_v19 }
 0x93c   :  { %9471 = vmatprep.subr.bf16.mxu1 %v11046_v20  ;;  %v11063_v20 = vld [vmem:[%s12327_s4 + $0x30] sm:$0xff]  }
 0x93f   :  { %9472 = vmatpush3.bf16.msra.mxu1 %v11048_v21  ;;  %v11069_v21 = vld [vmem:[#allocation2 + $0x5b8] sm:$0xff]  }
 0x940   :  { %9473 = vmatprep.subr.bf16.mxu1 %v11049_v52 }
 0x943   :  { %9474 = vmatpush3.bf16.msra.mxu1 %v11051_v54 }
 0x944   :  { %9475 = vmatprep.subr.bf16.mxu1 %v11052_v55 }
 0x947   :  { %9476 = vmatpush3.bf16.msra.mxu1 %v11054_v57 }
 0x948   :  { %9477 = vmatprep.subr.bf16.mxu1 %v11055_v58 }
 0x94b   :  { %9478 = vmatpush3.bf16.msra.mxu1 %v11057_v60 }
 0x94c   :  { %9479 = vmatprep.subr.bf16.mxu1 %v11058_v61 }
 0x94f   :  { %9480 = vmatpush3.bf16.msra.mxu1 %v11060_v63 }
 0x950   :  { %9511 = vmatprep.subr.bf16.mxu1 %v11069_v21  ;;  %v11088_v21 = vld [vmem:[#allocation2 + $0x580] sm:$0xff]  }
 0x9eb   :  { %v9443_v22 = vpop.f32.mrf.mxu0 }
 0x9ed   :  { %v9444_v23 = vpop.f32.mrf.mxu0 }
 0x9ee   :  { %v9445_v25 = vadd.f32 %v9444_v23, %v9443_v22  ;;  %v11070_v22 = vld [vmem:[#allocation2 + $0x578] sm:$0xff]   ;;  %v11071_v23 = vld [vmem:[#allocation2 + $0x5b0] sm:$0xff]  }
 0x9ef   :  { %v9446_v24 = vpop.f32.mrf.mxu0 }
 0x9f1   :  { %v9447_v26 = vpop.f32.mrf.mxu0 }
 0x9f2   :  { %v2299_v27 = vpop.f32.mrf.mxu1  ;;  %v9448_v32 = vadd.f32 %v9447_v26, %v9446_v24  ;;  %v11072_v24 = vld [vmem:[#allocation2 + $0x570] sm:$0xff]   ;;  %v11075_v26 = vld [vmem:[#allocation2 + $0x568] sm:$0xff]  }
 0x9f3   :  { %v2300_v29 = vadd.f32 %v9445_v25, %v2299_v27  ;;  %v11073_v25 = vld [vmem:[#allocation2 + $0x5a8] sm:$0xff]   ;;  %v11076_v27 = vld [vmem:[#allocation2 + $0x5a0] sm:$0xff]  }
 0x9f4   :  { %v10307_v31 = vpop.f32.mrf.mxu1 }
 0x9f5   :  { %v2312_v33 = vmul.f32 %v8739_v28, %v2300_v29 }
 0x9f6   :  { %v2302_v34 = vpop.f32.mrf.mxu1 }
 0x9f7   :  { %v2319_v35 = vadd.f32 %v8740_v30, %v2312_v33  ;;  %v2303_v36 = vadd.f32 %v9448_v32, %v2302_v34 }
 0x9f8   :  { %v10308_v37 = vpop.f32.mrf.mxu1 }
 0x9f9   :  { %v2313_v38 = vmul.f32 %v8739_v28, %v2303_v36  ;;  %v2323_v39 = vmul.f32 0.1, %v2319_v35  ;;  %vm2321_vm13 = vcmp.gt.f32.partialorder %v2319_v35, 0.0  ;;  %v11078_v28 = vld [vmem:[#allocation2 + $0x560] sm:$0xff]  }
 0x9fb   :  { %v2320_v40 = vadd.f32 %v8740_v30, %v2313_v38  ;;  %v2325_v42 = vsel %vm2321_vm13, %v2319_v35, %v2323_v39 }
 0x9fd   :  { %v2324_v41 = vmul.f32 0.1, %v2320_v40  ;;  %vm2322_vm14 = vcmp.gt.f32.partialorder %v2320_v40, 0.0 }
 0x9ff   :  { %v2326_v43 = vsel %vm2322_vm14, %v2320_v40, %v2324_v41  ;;  %v8777_v40 = vld [vmem:[#allocation7 + $0xc] ss:$0 sm:$0xff] }
 0xa00   :  { %v2339_v44 = vpack.c.bf16 %v2326_v43, %v2325_v42 }
 0xa02   :  { %10309 = vmatprep.subr.bf16.mxu0 %v2339_v44 }
 0xa03   :  { %10310 = vmatpush3.bf16.msra.mxu0 %v2339_v44 }
 0xa04   :  { %10323 = vmatprep.subr.bf16.mxu0 %v11044_v45 }
 0xa06   :  { %10312 = vmatmul.mubr.msk.bf16.vlgmr.msra.gmra.mxu0 %vm1573_vm10, %v11034_v46 }
 0xa07   :  { %10315 = vmatprep.mubr.msk.bf16.mxu0 %vm1573_vm10, %v11035_v47  ;;  %10324 = vmatpush3.bf16.msra.mxu0 %v11044_v45 }
 0xa08   :  { %10325 = vmatprep.subr.bf16.mxu0 %v11047_v48 }
 0xa0b   :  { %10326 = vmatpush3.bf16.msra.mxu0 %v11047_v48 }
 0xa0c   :  { %10327 = vmatprep.subr.bf16.mxu0 %v11050_v53 }
 0xa0e   :  { %10316 = vmatmul.mubr.msk.bf16.gmra.mxu0 %vm1573_vm10, %v11036_v49 }
 0xa0f   :  { %10319 = vmatprep.mubr.msk.bf16.mxu0 %vm1573_vm10, %v11037_v50  ;;  %10328 = vmatpush3.bf16.msra.mxu0 %v11050_v53 }
 0xa10   :  { %10329 = vmatprep.subr.bf16.mxu0 %v11053_v56 }
 0xa13   :  { %10330 = vmatpush3.bf16.msra.mxu0 %v11053_v56 }
 0xa14   :  { %10331 = vmatprep.subr.bf16.mxu0 %v11056_v59 }
 0xa16   :  { %10320 = vmatmul.mubr.msk.bf16.gmra.mxu0 %vm1573_vm10, %v11038_v51  ;;  %v8778_v51 = vld [vmem:[#allocation7 + $0xd] ss:$0 sm:$0xff] }
 0xa17   :  { %10332 = vmatpush3.bf16.msra.mxu0 %v11056_v59 }
 0xa18   :  { %10333 = vmatprep.subr.bf16.mxu0 %v11059_v62 }
 0xa1b   :  { %10334 = vmatpush3.bf16.msra.mxu0 %v11059_v62 }
 0xa1c   :  { %10335 = vmatprep.subr.bf16.mxu0 %v11061_v0 }
 0xa1f   :  { %10336 = vmatpush3.bf16.msra.mxu0 %v11061_v0 }
 0xa20   :  { %10337 = vmatprep.subr.bf16.mxu0 %v11062_v1 }
 0xa23   :  { %10338 = vmatpush3.bf16.msra.mxu0 %v11062_v1 }
 0xac6   :  { %v10313_v2 = vpop.f32.mrf.mxu0 }
 0xac8   :  { %v2422_v3 = vpop.f32.mrf.mxu0 }
 0xaca   :  { %v10314_v4 = vpop.f32.mrf.mxu0 }
 0xacb   :  { %v2472_v18 = vpack.c.bf16 %v10314_v4, %v10313_v2 }
 0xacc   :  { %v2425_v5 = vpop.f32.mrf.mxu0 }
 0xacd   :  { %v2469_v12 = vpack.c.bf16 %v2425_v5, %v2422_v3  ;;  %v11074_v5 = vld [vmem:[#allocation2 + $0x5f8] sm:$0xff]  }
 0xace   :  { %v10317_v6 = vpop.f32.mrf.mxu0 }
 0xad0   :  { %v2438_v8 = vpop.f32.mrf.mxu0 }
 0xad2   :  { %v10318_v9 = vpop.f32.mrf.mxu0 }
 0xad3   :  { %v2473_v7 = vpack.c.bf16 %v10318_v9, %v10317_v6  ;;  %v11064_v6 = vld [vmem:[%s12327_s4 + $0x38] sm:$0xff]   ;;  %v11077_v9 = vld [vmem:[#allocation2 + $0x5f0] sm:$0xff]  }
 0xad4   :  { %v2441_v10 = vpop.f32.mrf.mxu0 }
 0xad5   :  { %v2470_v11 = vpack.c.bf16 %v2441_v10, %v2438_v8  ;;  %v11065_v8 = vld [vmem:[%s12327_s4 + $0x40] sm:$0xff]   ;;  %v11066_v10 = vld [vmem:[%s12327_s4 + $0x48] sm:$0xff]  }
 0xad6   :  { %v10321_v13 = vpop.f32.mrf.mxu0 }
 0xad7   :  { %2700 = vmatprep.mubr.bf16.mxu1 %v2470_v11  ;;  %v11067_v11 = vld [vmem:[%s12327_s4 + $0x50] sm:$0xff]  }
 0xad8   :  { %v2454_v14 = vpop.f32.mrf.mxu0  ;;  %2701 = vmatmul.mubr.bf16.vlgmr.msra.gmra.mxu1 %v2469_v12  ;;  %v11068_v12 = vld [vmem:[%s12327_s4 + $0x58] sm:$0xff]  }
 0xad9   :  { %2708 = vmatprep.mubr.bf16.mxu1 %v2473_v7  ;;  %9512 = vmatpush3.bf16.msra.mxu1 %v11070_v22  ;;  %v11080_v7 = vld [vmem:[#allocation2 + $0x5e8] sm:$0xff]   ;;  %v11089_v22 = vld [vmem:[#allocation2 + $0x5d0] sm:$0xff]  }
 0xada   :  { %v10322_v15 = vpop.f32.mrf.mxu0  ;;  %9513 = vmatprep.subr.bf16.mxu1 %v11071_v23  ;;  %v11090_v23 = vld [vmem:[#allocation2 + $0x540] sm:$0xff]  }
 0xadb   :  { %v2474_v19 = vpack.c.bf16 %v10322_v15, %v10321_v13  ;;  %v11079_v13 = vld [vmem:[#allocation2 + $0x598] sm:$0xff]   ;;  %v11082_v15 = vld [vmem:[#allocation2 + $0x590] sm:$0xff]  }
 0xadc   :  { %v2457_v16 = vpop.f32.mrf.mxu0 }
 0xadd   :  { %v2471_v17 = vpack.c.bf16 %v2457_v16, %v2454_v14  ;;  %9514 = vmatpush3.bf16.msra.mxu1 %v11072_v24  ;;  %v11081_v14 = vld [vmem:[#allocation2 + $0x558] sm:$0xff]   ;;  %v11083_v16 = vld [vmem:[#allocation2 + $0x5e0] sm:$0xff]   ;;  %v11091_v24 = vld [vmem:[#allocation2 + $0x5c8] sm:$0xff]  }
 0xade   :  { %9515 = vmatprep.subr.bf16.mxu1 %v11073_v25  ;;  %v11092_v25 = vld [vmem:[#allocation2 + $0x5c0] sm:$0xff]  }
 0xadf   :  { %10339 = vmatprep.mubr.bf16.mxu0 %v2471_v17  ;;  %v11084_v17 = vld [vmem:[#allocation2 + $0x550] sm:$0xff]  }
 0xae0   :  { %2709 = vmatmul.mubr.bf16.gmra.mxu1 %v2472_v18  ;;  %10340 = vmatmul.mubr.bf16.vlgmr.msra.gmra.mxu0 %v2474_v19  ;;  %v11085_v18 = vld [vmem:[#allocation2 + $0x588] sm:$0xff]   ;;  %v11086_v19 = vld [vmem:[#allocation2 + $0x5d8] sm:$0xff]  }
 0xae1   :  { %10347 = vmatprep.mubr.msk.bf16.mxu0 %vm2842_vm15, %v11063_v20  ;;  %9516 = vmatpush3.bf16.msra.mxu1 %v11075_v26  ;;  %v11087_v20 = vld [vmem:[#allocation2 + $0x548] sm:$0xff]  }
 0xae2   :  { %9517 = vmatprep.subr.bf16.mxu1 %v11076_v27 }
 0xae5   :  { %9518 = vmatpush3.bf16.msra.mxu1 %v11078_v28 }
 0xae6   :  { %9519 = vmatprep.subr.bf16.mxu1 %v11079_v13 }
 0xae9   :  { %9520 = vmatpush3.bf16.msra.mxu1 %v11081_v14 }
 0xaea   :  { %9521 = vmatprep.subr.bf16.mxu1 %v11082_v15 }
 0xaed   :  { %9522 = vmatpush3.bf16.msra.mxu1 %v11084_v17 }
 0xaee   :  { %9523 = vmatprep.subr.bf16.mxu1 %v11085_v18 }
 0xaf1   :  { %9524 = vmatpush3.bf16.msra.mxu1 %v11087_v20 }
 0xaf2   :  { %9525 = vmatprep.subr.bf16.mxu1 %v11088_v21 }
 0xaf5   :  { %9526 = vmatpush3.bf16.msra.mxu1 %v11090_v23  ;;  %v11099_v23 = vld [vmem:[#allocation2 + $0x678] sm:$0xff]  }
 0xb98   :  { %v9481_v29 = vpop.f32.mrf.mxu1 }
 0xb9a   :  { %v9482_v30 = vpop.f32.mrf.mxu1 }
 0xb9b   :  { %v9483_v35 = vadd.f32 %v9482_v30, %v9481_v29 }
 0xb9c   :  { %v9484_v31 = vpop.f32.mrf.mxu1 }
 0xb9e   :  { %v9485_v32 = vpop.f32.mrf.mxu1 }
 0xb9f   :  { %v9486_v43 = vadd.f32 %v9485_v32, %v9484_v31 }
 0xba0   :  { %v9487_v33 = vpop.f32.mrf.mxu1  ;;  %v10341_v34 = vpop.f32.mrf.mxu0 }
 0xba2   :  { %v9488_v36 = vpop.f32.mrf.mxu1  ;;  %v2751_v37 = vpop.f32.mrf.mxu0 }
 0xba3   :  { %v9489_v38 = vadd.f32 %v9488_v36, %v9487_v33  ;;  %v2752_v39 = vadd.f32 %v9483_v35, %v2751_v37 }
 0xba4   :  { %v9490_v41 = vpop.f32.mrf.mxu1  ;;  %v10342_v42 = vpop.f32.mrf.mxu0 }
 0xba5   :  { %v2760_v44 = vadd.f32 %v10341_v34, %v9489_v38  ;;  %v2772_v48 = vmul.f32 %v8777_v40, %v2752_v39 }
 0xba6   :  { %v9491_v45 = vpop.f32.mrf.mxu1  ;;  %v2754_v46 = vpop.f32.mrf.mxu0 }
 0xba7   :  { %v2774_v47 = vmul.f32 %v8777_v40, %v2760_v44  ;;  %v9492_v49 = vadd.f32 %v9491_v45, %v9490_v41  ;;  %v2755_v50 = vadd.f32 %v9486_v43, %v2754_v46  ;;  %v2781_v55 = vadd.f32 %v8778_v51, %v2772_v48  ;;  %v11093_v44 = vld [vmem:[%s12327_s4 + $0x60] sm:$0xff]   ;;  %v11104_v45 = vld [vmem:[#allocation2 + $0x6b8] sm:$0xff]   ;;  %v11107_v46 = vld [vmem:[#allocation2 + $0x6b0] sm:$0xff]  }
 0xba8   :  { %10395 = vmatprep.subr.bf16.mxu1 %v11104_v45 }
 0xba9   :  { %v2783_v52 = vadd.f32 %v8778_v51, %v2774_v47  ;;  %v2763_v53 = vadd.f32 %v10342_v42, %v9492_v49  ;;  %v2773_v54 = vmul.f32 %v8777_v40, %v2755_v50  ;;  %v2789_v61 = vmul.f32 0.1, %v2781_v55 }
 0xbaa   :  { %vm2785_vm3 = vcmp.gt.f32.partialorder %v2781_v55, 0.0 }
 0xbab   :  { %v2775_v56 = vmul.f32 %v8777_v40, %v2763_v53  ;;  %v2782_v57 = vadd.f32 %v8778_v51, %v2773_v54  ;;  %v2791_v59 = vmul.f32 0.1, %v2783_v52  ;;  %vm2787_vm0 = vcmp.gt.f32.partialorder %v2783_v52, 0.0 }
 0xbac   :  { %v2793_v3 = vsel %vm2785_vm3, %v2781_v55, %v2789_v61 }
 0xbad   :  { %v2784_v58 = vadd.f32 %v8778_v51, %v2775_v56  ;;  %v2790_v60 = vmul.f32 0.1, %v2782_v57  ;;  %vm2786_vm1 = vcmp.gt.f32.partialorder %v2782_v57, 0.0  ;;  %v2795_v63 = vsel %vm2787_vm0, %v2783_v52, %v2791_v59 }
 0xbaf   :  { %vm2788_vm2 = vcmp.gt.f32.partialorder %v2784_v58, 0.0  ;;  %v2792_v62 = vmul.f32 0.1, %v2784_v58  ;;  %v2794_v1 = vsel %vm2786_vm1, %v2782_v57, %v2790_v60 }
 0xbb0   :  { %v2810_v4 = vpack.c.bf16 %v2794_v1, %v2793_v3 }
 0xbb1   :  { %v2796_v0 = vsel %vm2788_vm2, %v2784_v58, %v2792_v62  ;;  %v8827_v58 = vld [vmem:[#allocation7 + $0xe] ss:$0 sm:$0xff] }
 0xbb2   :  { %v2811_v2 = vpack.c.bf16 %v2796_v0, %v2795_v63 }
 0xbb4   :  { %10343 = vmatprep.subr.bf16.mxu0 %v2811_v2 }
 0xbb5   :  { %10344 = vmatpush3.bf16.msra.mxu0 %v2811_v2 }
 0xbb6   :  { %10345 = vmatprep.subr.bf16.mxu0 %v2810_v4 }
 0xbb9   :  { %10346 = vmatpush3.bf16.msra.mxu0 %v2810_v4 }
 0xbba   :  { %10359 = vmatprep.subr.bf16.mxu0 %v11074_v5 }
 0xbbc   :  { %10348 = vmatmul.mubr.msk.bf16.vlgmr.msra.gmra.mxu0 %vm2842_vm15, %v11064_v6 }
 0xbbd   :  { %10351 = vmatprep.mubr.msk.bf16.mxu0 %vm2842_vm15, %v11065_v8  ;;  %10360 = vmatpush3.bf16.msra.mxu0 %v11074_v5  ;;  %v8828_v5 = vld [vmem:[#allocation7 + $0xf] ss:$0 sm:$0xff] }
 0xbbe   :  { %10361 = vmatprep.subr.bf16.mxu0 %v11077_v9 }
 0xbc1   :  { %10362 = vmatpush3.bf16.msra.mxu0 %v11077_v9 }
 0xbc2   :  { %10363 = vmatprep.subr.bf16.mxu0 %v11080_v7 }
 0xbc4   :  { %10352 = vmatmul.mubr.msk.bf16.gmra.mxu0 %vm2842_vm15, %v11066_v10 }
 0xbc5   :  { %10355 = vmatprep.mubr.msk.bf16.mxu0 %vm2842_vm15, %v11067_v11  ;;  %10364 = vmatpush3.bf16.msra.mxu0 %v11080_v7 }
 0xbc6   :  { %10365 = vmatprep.subr.bf16.mxu0 %v11083_v16 }
 0xbc9   :  { %10366 = vmatpush3.bf16.msra.mxu0 %v11083_v16 }
 0xbca   :  { %10367 = vmatprep.subr.bf16.mxu0 %v11086_v19 }
 0xbcc   :  { %10356 = vmatmul.mubr.msk.bf16.gmra.mxu0 %vm2842_vm15, %v11068_v12 }
 0xbcd   :  { %10368 = vmatpush3.bf16.msra.mxu0 %v11086_v19 }
 0xbce   :  { %10369 = vmatprep.subr.bf16.mxu0 %v11089_v22 }
 0xbd1   :  { %10370 = vmatpush3.bf16.msra.mxu0 %v11089_v22 }
 0xbd2   :  { %10371 = vmatprep.subr.bf16.mxu0 %v11091_v24 }
 0xbd5   :  { %10372 = vmatpush3.bf16.msra.mxu0 %v11091_v24  ;;  %v11094_v24 = vld [vmem:[%s12327_s4 + $0x68] sm:$0xff]  }
 0xbd6   :  { %10373 = vmatprep.subr.bf16.mxu0 %v11092_v25 }
 0xbd9   :  { %10374 = vmatpush3.bf16.msra.mxu0 %v11092_v25  ;;  %v11095_v25 = vld [vmem:[%s12327_s4 + $0x70] sm:$0xff]  }
 0xc7c   :  { %v10349_v26 = vpop.f32.mrf.mxu0 }
 0xc7e   :  { %v2895_v27 = vpop.f32.mrf.mxu0 }
 0xc80   :  { %v10350_v28 = vpop.f32.mrf.mxu0 }
 0xc81   :  { %v2945_v42 = vpack.c.bf16 %v10350_v28, %v10349_v26  ;;  %v11100_v26 = vld [vmem:[#allocation2 + $0x638] sm:$0xff]   ;;  %v11102_v28 = vld [vmem:[#allocation2 + $0x630] sm:$0xff]  }
 0xc82   :  { %v2898_v29 = vpop.f32.mrf.mxu0 }
 0xc83   :  { %v2942_v35 = vpack.c.bf16 %v2898_v29, %v2895_v27  ;;  %v11101_v27 = vld [vmem:[#allocation2 + $0x670] sm:$0xff]   ;;  %v11103_v29 = vld [vmem:[#allocation2 + $0x668] sm:$0xff]  }
 0xc84   :  { %v10353_v30 = vpop.f32.mrf.mxu0 }
 0xc86   :  { %v2911_v31 = vpop.f32.mrf.mxu0 }
 0xc88   :  { %v10354_v32 = vpop.f32.mrf.mxu0 }
 0xc89   :  { %v2946_v37 = vpack.c.bf16 %v10354_v32, %v10353_v30  ;;  %v11096_v30 = vld [vmem:[%s12327_s4 + $0x78] sm:$0xff]   ;;  %v11105_v32 = vld [vmem:[#allocation2 + $0x628] sm:$0xff]  }
 0xc8a   :  { %v2914_v33 = vpop.f32.mrf.mxu0 }
 0xc8b   :  { %v2943_v34 = vpack.c.bf16 %v2914_v33, %v2911_v31  ;;  %v11097_v31 = vld [vmem:[%s12327_s4 + $0x80] sm:$0xff]  }
 0xc8c   :  { %v10357_v36 = vpop.f32.mrf.mxu0  ;;  %v11106_v33 = vld [vmem:[#allocation2 + $0x660] sm:$0xff]  }
 0xc8d   :  { %3173 = vmatprep.mubr.bf16.mxu1 %v2943_v34  ;;  %v11108_v34 = vld [vmem:[#allocation2 + $0x620] sm:$0xff]  }
 0xc8e   :  { %v2927_v38 = vpop.f32.mrf.mxu0  ;;  %3174 = vmatmul.mubr.bf16.vlgmr.msra.gmra.mxu1 %v2942_v35  ;;  %v11098_v35 = vld [vmem:[%s12327_s4 + $0x88] sm:$0xff]  }
 0xc8f   :  { %3181 = vmatprep.mubr.bf16.mxu1 %v2946_v37  ;;  %10396 = vmatpush3.bf16.msra.mxu1 %v11104_v45  ;;  %v11110_v37 = vld [vmem:[#allocation2 + $0x6a8] sm:$0xff]   ;;  %v11118_v45 = vld [vmem:[#allocation2 + $0x640] sm:$0xff]  }
 0xc90   :  { %v10358_v39 = vpop.f32.mrf.mxu0  ;;  %10397 = vmatprep.subr.bf16.mxu1 %v11107_v46 }
 0xc91   :  { %v2947_v43 = vpack.c.bf16 %v10358_v39, %v10357_v36  ;;  %v11109_v36 = vld [vmem:[#allocation2 + $0x658] sm:$0xff]   ;;  %v11112_v39 = vld [vmem:[#allocation2 + $0x650] sm:$0xff]  }
 0xc92   :  { %v2930_v40 = vpop.f32.mrf.mxu0 }
 0xc93   :  { %v2944_v41 = vpack.c.bf16 %v2930_v40, %v2927_v38  ;;  %10398 = vmatpush3.bf16.msra.mxu1 %v11107_v46  ;;  %v11111_v38 = vld [vmem:[#allocation2 + $0x618] sm:$0xff]   ;;  %v11113_v40 = vld [vmem:[#allocation2 + $0x6a0] sm:$0xff]   ;;  %v11119_v46 = vld [vmem:[#allocation2 + $0x690] sm:$0xff]  }
 0xc94   :  { %10399 = vmatprep.subr.bf16.mxu1 %v11110_v37 }
 0xc95   :  { %10375 = vmatprep.mubr.bf16.mxu0 %v2944_v41  ;;  %v11114_v41 = vld [vmem:[#allocation2 + $0x610] sm:$0xff]  }
 0xc96   :  { %3182 = vmatmul.mubr.bf16.gmra.mxu1 %v2945_v42  ;;  %10376 = vmatmul.mubr.bf16.vlgmr.msra.gmra.mxu0 %v2947_v43  ;;  %v11115_v42 = vld [vmem:[#allocation2 + $0x648] sm:$0xff]   ;;  %v11116_v43 = vld [vmem:[#allocation2 + $0x698] sm:$0xff]  }
 0xc97   :  { %10383 = vmatprep.mubr.msk.bf16.mxu0 %vm2842_vm15, %v11093_v44  ;;  %10400 = vmatpush3.bf16.msra.mxu1 %v11110_v37  ;;  %v11117_v44 = vld [vmem:[#allocation2 + $0x608] sm:$0xff]  }
 0xc98   :  { %10401 = vmatprep.subr.bf16.mxu1 %v11113_v40 }
 0xc9b   :  { %10402 = vmatpush3.bf16.msra.mxu1 %v11113_v40 }
 0xc9c   :  { %10403 = vmatprep.subr.bf16.mxu1 %v11116_v43 }
 0xc9f   :  { %10404 = vmatpush3.bf16.msra.mxu1 %v11116_v43 }
 0xca0   :  { %10405 = vmatprep.subr.bf16.mxu1 %v11119_v46 }
 0xca3   :  { %10406 = vmatpush3.bf16.msra.mxu1 %v11119_v46 }
 0xd4e   :  { %v9527_v47 = vpop.f32.mrf.mxu1 }
 0xd50   :  { %v9528_v48 = vpop.f32.mrf.mxu1 }
 0xd51   :  { %v9529_v53 = vadd.f32 %v9528_v48, %v9527_v47  ;;  %v11120_v47 = vld [vmem:[#allocation2 + $0x600] sm:$0xff]   ;;  %v11121_v48 = vld [vmem:[#allocation2 + $0x688] sm:$0xff]  }
 0xd52   :  { %v9530_v49 = vpop.f32.mrf.mxu1  ;;  %10407 = vmatprep.subr.bf16.mxu1 %v11121_v48 }
 0xd53   :  { %10408 = vmatpush3.bf16.msra.mxu1 %v11121_v48 }
 0xd54   :  { %v9531_v50 = vpop.f32.mrf.mxu1 }
 0xd55   :  { %v9532_v61 = vadd.f32 %v9531_v50, %v9530_v49  ;;  %v11122_v49 = vld [vmem:[#allocation2 + $0x680] sm:$0xff]  }
 0xd56   :  { %v9533_v51 = vpop.f32.mrf.mxu1  ;;  %v10377_v52 = vpop.f32.mrf.mxu0  ;;  %10409 = vmatprep.subr.bf16.mxu1 %v11122_v49 }
 0xd57   :  { %10410 = vmatpush3.bf16.msra.mxu1 %v11122_v49  ;;  %v11124_v49 = vld [vmem:[%s12328_s5 + $0x8] sm:$0xff]  }
 0xd58   :  { %v9534_v54 = vpop.f32.mrf.mxu1  ;;  %v3224_v55 = vpop.f32.mrf.mxu0 }
 0xd59   :  { %v9535_v56 = vadd.f32 %v9534_v54, %v9533_v51  ;;  %v3225_v57 = vadd.f32 %v9529_v53, %v3224_v55 }
 0xd5a   :  { %v9536_v59 = vpop.f32.mrf.mxu1  ;;  %v10378_v60 = vpop.f32.mrf.mxu0 }
 0xd5b   :  { %v3233_v62 = vadd.f32 %v10377_v52, %v9535_v56  ;;  %v3245_v2 = vmul.f32 %v8827_v58, %v3225_v57 }
 0xd5c   :  { %v9537_v63 = vpop.f32.mrf.mxu1  ;;  %v3227_v0 = vpop.f32.mrf.mxu0 }
 0xd5d   :  { %v3247_v1 = vmul.f32 %v8827_v58, %v3233_v62  ;;  %v9538_v3 = vadd.f32 %v9537_v63, %v9536_v59  ;;  %v3228_v4 = vadd.f32 %v9532_v61, %v3227_v0  ;;  %v3254_v10 = vadd.f32 %v8828_v5, %v3245_v2 }
 0xd5f   :  { %v3256_v6 = vadd.f32 %v8828_v5, %v3247_v1  ;;  %v3236_v8 = vadd.f32 %v10378_v60, %v9538_v3  ;;  %v3246_v9 = vmul.f32 %v8827_v58, %v3228_v4  ;;  %v3262_v15 = vmul.f32 0.1, %v3254_v10  ;;  %v11123_v4 = vld [vmem:[%s12328_s5] sm:$0xff]  }
 0xd60   :  { %vm3258_vm7 = vcmp.gt.f32.partialorder %v3254_v10, 0.0 }
 0xd61   :  { %v3248_v11 = vmul.f32 %v8827_v58, %v3236_v8  ;;  %v3255_v12 = vadd.f32 %v8828_v5, %v3246_v9  ;;  %v3264_v7 = vmul.f32 0.1, %v3256_v6  ;;  %vm3260_vm4 = vcmp.gt.f32.partialorder %v3256_v6, 0.0  ;;  %v11137_v8 = vld [vmem:[#allocation2 + $0x730] sm:$0xff]  }
 0xd62   :  { %v3266_v21 = vsel %vm3258_vm7, %v3254_v10, %v3262_v15  ;;  %v11138_v9 = vld [vmem:[#allocation2 + $0x6f0] sm:$0xff]  }
 0xd63   :  { %v3257_v13 = vadd.f32 %v8828_v5, %v3248_v11  ;;  %v3263_v14 = vmul.f32 0.1, %v3255_v12  ;;  %vm3259_vm5 = vcmp.gt.f32.partialorder %v3255_v12, 0.0  ;;  %v3268_v17 = vsel %vm3260_vm4, %v3256_v6, %v3264_v7  ;;  %v11135_v5 = vld [vmem:[#allocation2 + $0x738] sm:$0xff]  }
 0xd64   :  { %v11136_v6 = vld [vmem:[#allocation2 + $0x6f8] sm:$0xff]  }
 0xd65   :  { %vm3261_vm6 = vcmp.gt.f32.partialorder %v3257_v13, 0.0  ;;  %v3265_v16 = vmul.f32 0.1, %v3257_v13  ;;  %v3267_v19 = vsel %vm3259_vm5, %v3255_v12, %v3263_v14 }
 0xd66   :  { %v3283_v22 = vpack.c.bf16 %v3267_v19, %v3266_v21 }
 0xd67   :  { %v3269_v18 = vsel %vm3261_vm6, %v3257_v13, %v3265_v16 }
 0xd68   :  { %v3284_v20 = vpack.c.bf16 %v3269_v18, %v3268_v17 }
 0xd6a   :  { %10379 = vmatprep.subr.bf16.mxu0 %v3284_v20 }
 0xd6b   :  { %10380 = vmatpush3.bf16.msra.mxu0 %v3284_v20  ;;  %v8877_v20 = vld [vmem:[#allocation7 + $0x10] ss:$0 sm:$0xff] }
 0xd6c   :  { %10381 = vmatprep.subr.bf16.mxu0 %v3283_v22 }
 0xd6f   :  { %10382 = vmatpush3.bf16.msra.mxu0 %v3283_v22 }
 0xd70   :  { %9557 = vmatprep.subr.bf16.mxu0 %v11099_v23 }
 0xd72   :  { %10384 = vmatmul.mubr.msk.bf16.vlgmr.msra.gmra.mxu0 %vm2842_vm15, %v11094_v24 }
 0xd73   :  { %10387 = vmatprep.mubr.msk.bf16.mxu0 %vm2842_vm15, %v11095_v25  ;;  %9558 = vmatpush3.bf16.msra.mxu0 %v11100_v26 }
 0xd74   :  { %9559 = vmatprep.subr.bf16.mxu0 %v11101_v27 }
 0xd77   :  { %9560 = vmatpush3.bf16.msra.mxu0 %v11102_v28 }
 0xd78   :  { %9561 = vmatprep.subr.bf16.mxu0 %v11103_v29 }
 0xd7a   :  { %10388 = vmatmul.mubr.msk.bf16.gmra.mxu0 %vm2842_vm15, %v11096_v30 }
 0xd7b   :  { %10391 = vmatprep.mubr.msk.bf16.mxu0 %vm2842_vm15, %v11097_v31  ;;  %9562 = vmatpush3.bf16.msra.mxu0 %v11105_v32  ;;  %v8878_v31 = vld [vmem:[#allocation7 + $0x11] ss:$0 sm:$0xff] }
 0xd7c   :  { %9563 = vmatprep.subr.bf16.mxu0 %v11106_v33 }
 0xd7f   :  { %9564 = vmatpush3.bf16.msra.mxu0 %v11108_v34 }
 0xd80   :  { %9565 = vmatprep.subr.bf16.mxu0 %v11109_v36 }
 0xd82   :  { %10392 = vmatmul.mubr.msk.bf16.gmra.mxu0 %vm2842_vm15, %v11098_v35 }
 0xd83   :  { %9566 = vmatpush3.bf16.msra.mxu0 %v11111_v38 }
 0xd84   :  { %9567 = vmatprep.subr.bf16.mxu0 %v11112_v39 }
 0xd87   :  { %9568 = vmatpush3.bf16.msra.mxu0 %v11114_v41 }
 0xd88   :  { %9569 = vmatprep.subr.bf16.mxu0 %v11115_v42 }
 0xd8b   :  { %9570 = vmatpush3.bf16.msra.mxu0 %v11117_v44 }
 0xd8c   :  { %9571 = vmatprep.subr.bf16.mxu0 %v11118_v45 }
 0xd8f   :  { %9572 = vmatpush3.bf16.msra.mxu0 %v11120_v47 }
 0xd90   :  { %9609 = vmatprep.subr.bf16.mxu0 %v11135_v5  ;;  %v11148_v5 = vld [vmem:[#allocation2 + $0x6d0] sm:$0xff]  }
 0xe32   :  { %v10385_v50 = vpop.f32.mrf.mxu0 }
 0xe34   :  { %v3367_v51 = vpop.f32.mrf.mxu0 }
 0xe36   :  { %v10386_v52 = vpop.f32.mrf.mxu0 }
 0xe37   :  { %v3417_v2 = vpack.c.bf16 %v10386_v52, %v10385_v50  ;;  %v11125_v50 = vld [vmem:[%s12328_s5 + $0x10] sm:$0xff]   ;;  %v11127_v52 = vld [vmem:[%s12328_s5 + $0x20] sm:$0xff]  }
 0xe38   :  { %v3370_v53 = vpop.f32.mrf.mxu0 }
 0xe39   :  { %v3414_v59 = vpack.c.bf16 %v3370_v53, %v3367_v51  ;;  %v11126_v51 = vld [vmem:[%s12328_s5 + $0x18] sm:$0xff]   ;;  %v11128_v53 = vld [vmem:[%s12328_s5 + $0x28] sm:$0xff]  }
 0xe3a   :  { %v10389_v54 = vpop.f32.mrf.mxu0 }
 0xe3c   :  { %v3383_v55 = vpop.f32.mrf.mxu0 }
 0xe3e   :  { %v10390_v56 = vpop.f32.mrf.mxu0 }
 0xe3f   :  { %v3418_v61 = vpack.c.bf16 %v10390_v56, %v10389_v54  ;;  %v11129_v54 = vld [vmem:[%s12328_s5 + $0x30] sm:$0xff]   ;;  %v11131_v56 = vld [vmem:[%s12328_s5 + $0x40] sm:$0xff]  }
 0xe40   :  { %v3386_v57 = vpop.f32.mrf.mxu0 }
 0xe41   :  { %v3415_v58 = vpack.c.bf16 %v3386_v57, %v3383_v55  ;;  %v11130_v55 = vld [vmem:[%s12328_s5 + $0x38] sm:$0xff]   ;;  %v11132_v57 = vld [vmem:[%s12328_s5 + $0x48] sm:$0xff]  }
 0xe42   :  { %v10393_v60 = vpop.f32.mrf.mxu0 }
 0xe43   :  { %3645 = vmatprep.mubr.bf16.mxu0 %v3415_v58  ;;  %v11133_v58 = vld [vmem:[%s12328_s5 + $0x50] sm:$0xff]  }
 0xe44   :  { %v3399_v62 = vpop.f32.mrf.mxu0  ;;  %3646 = vmatmul.mubr.bf16.vlgmr.msra.gmra.mxu0 %v3414_v59  ;;  %v11134_v59 = vld [vmem:[%s12328_s5 + $0x58] sm:$0xff]  }
 0xe45   :  { %3653 = vmatprep.mubr.bf16.mxu0 %v3418_v61  ;;  %9610 = vmatpush3.bf16.msra.mxu0 %v11136_v6  ;;  %v11140_v61 = vld [vmem:[#allocation2 + $0x6e8] sm:$0xff]  }
 0xe46   :  { %v10394_v63 = vpop.f32.mrf.mxu0  ;;  %9611 = vmatprep.subr.bf16.mxu0 %v11137_v8  ;;  %v11149_v6 = vld [vmem:[#allocation2 + $0x708] sm:$0xff]  }
 0xe47   :  { %v3419_v3 = vpack.c.bf16 %v10394_v63, %v10393_v60  ;;  %v11139_v60 = vld [vmem:[#allocation2 + $0x728] sm:$0xff]   ;;  %v11142_v63 = vld [vmem:[#allocation2 + $0x6e0] sm:$0xff]  }
 0xe48   :  { %v3402_v0 = vpop.f32.mrf.mxu0  ;;  %v11150_v8 = vld [vmem:[#allocation2 + $0x768] sm:$0xff]  }
 0xe49   :  { %v3416_v1 = vpack.c.bf16 %v3402_v0, %v3399_v62  ;;  %9612 = vmatpush3.bf16.msra.mxu0 %v11138_v9  ;;  %v11141_v62 = vld [vmem:[#allocation2 + $0x720] sm:$0xff]   ;;  %v11143_v0 = vld [vmem:[#allocation2 + $0x718] sm:$0xff]   ;;  %v11151_v9 = vld [vmem:[#allocation2 + $0x6c8] sm:$0xff]  }
 0xe4a   :  { %9613 = vmatprep.subr.bf16.mxu0 %v11139_v60 }
 0xe4b   :  { %10411 = vmatprep.mubr.bf16.mxu1 %v3416_v1  ;;  %v11144_v1 = vld [vmem:[#allocation2 + $0x778] sm:$0xff]  }
 0xe4c   :  { %3654 = vmatmul.mubr.bf16.gmra.mxu0 %v3417_v2  ;;  %10412 = vmatmul.mubr.bf16.vlgmr.msra.gmra.mxu1 %v3419_v3  ;;  %v11145_v2 = vld [vmem:[#allocation2 + $0x6d8] sm:$0xff]   ;;  %v11146_v3 = vld [vmem:[#allocation2 + $0x710] sm:$0xff]  }
 0xe4d   :  { %10419 = vmatprep.mubr.msk.bf16.mxu1 %vm2842_vm15, %v11123_v4  ;;  %9614 = vmatpush3.bf16.msra.mxu0 %v11140_v61  ;;  %v11147_v4 = vld [vmem:[#allocation2 + $0x770] sm:$0xff]  }
 0xe4e   :  { %9615 = vmatprep.subr.bf16.mxu0 %v11141_v62 }
 0xe51   :  { %9616 = vmatpush3.bf16.msra.mxu0 %v11142_v63 }
 0xe52   :  { %9617 = vmatprep.subr.bf16.mxu0 %v11143_v0 }
 0xe55   :  { %9618 = vmatpush3.bf16.msra.mxu0 %v11145_v2 }
 0xe56   :  { %9619 = vmatprep.subr.bf16.mxu0 %v11146_v3 }
 0xe59   :  { %9620 = vmatpush3.bf16.msra.mxu0 %v11148_v5 }
 0xe5a   :  { %9621 = vmatprep.subr.bf16.mxu0 %v11149_v6 }
 0xe5d   :  { %9622 = vmatpush3.bf16.msra.mxu0 %v11151_v9 }
 0xf04   :  { %v9573_v10 = vpop.f32.mrf.mxu0 }
 0xf06   :  { %v9574_v11 = vpop.f32.mrf.mxu0 }
 0xf07   :  { %v9575_v15 = vadd.f32 %v9574_v11, %v9573_v10  ;;  %v11152_v10 = vld [vmem:[#allocation2 + $0x700] sm:$0xff]  }
 0xf08   :  { %v9576_v12 = vpop.f32.mrf.mxu0  ;;  %v11153_v11 = vld [vmem:[#allocation2 + $0x760] sm:$0xff]   ;;  %9623 = vmatprep.subr.bf16.mxu0 %v11152_v10 }
 0xf0a   :  { %v9577_v13 = vpop.f32.mrf.mxu0 }
 0xf0b   :  { %v9578_v23 = vadd.f32 %v9577_v13, %v9576_v12  ;;  %v11154_v12 = vld [vmem:[#allocation2 + $0x6c0] sm:$0xff]   ;;  %v11155_v13 = vld [vmem:[#allocation2 + $0x758] sm:$0xff]  }
 0xf0c   :  { %v9579_v7 = vpop.f32.mrf.mxu0  ;;  %v10413_v14 = vpop.f32.mrf.mxu1  ;;  %9624 = vmatpush3.bf16.msra.mxu0 %v11154_v12 }
 0xf0e   :  { %v9580_v16 = vpop.f32.mrf.mxu0  ;;  %v3696_v17 = vpop.f32.mrf.mxu1 }
 0xf0f   :  { %v9581_v18 = vadd.f32 %v9580_v16, %v9579_v7  ;;  %v3697_v19 = vadd.f32 %v9575_v15, %v3696_v17  ;;  %v11156_v7 = vld [vmem:[#allocation2 + $0x750] sm:$0xff]   ;;  %v11158_v15 = vld [vmem:[#allocation2 + $0x740] sm:$0xff]  }
 0xf10   :  { %v9582_v21 = vpop.f32.mrf.mxu0  ;;  %v10414_v22 = vpop.f32.mrf.mxu1 }
 0xf11   :  { %v3705_v24 = vadd.f32 %v10413_v14, %v9581_v18  ;;  %v3717_v28 = vmul.f32 %v8877_v20, %v3697_v19  ;;  %v11157_v14 = vld [vmem:[#allocation2 + $0x748] sm:$0xff]  }
 0xf12   :  { %v9583_v25 = vpop.f32.mrf.mxu0  ;;  %v3699_v26 = vpop.f32.mrf.mxu1 }
 0xf13   :  { %v3719_v27 = vmul.f32 %v8877_v20, %v3705_v24  ;;  %v9584_v29 = vadd.f32 %v9583_v25, %v9582_v21  ;;  %v3700_v30 = vadd.f32 %v9578_v23, %v3699_v26  ;;  %v3726_v35 = vadd.f32 %v8878_v31, %v3717_v28 }
 0xf15   :  { %v3728_v32 = vadd.f32 %v8878_v31, %v3719_v27  ;;  %v3708_v33 = vadd.f32 %v10414_v22, %v9584_v29  ;;  %v3718_v34 = vmul.f32 %v8877_v20, %v3700_v30  ;;  %v3734_v41 = vmul.f32 0.1, %v3726_v35 }
 0xf16   :  { %vm3730_vm11 = vcmp.gt.f32.partialorder %v3726_v35, 0.0 }
 0xf17   :  { %v3720_v36 = vmul.f32 %v8877_v20, %v3708_v33  ;;  %v3727_v37 = vadd.f32 %v8878_v31, %v3718_v34  ;;  %v3736_v39 = vmul.f32 0.1, %v3728_v32  ;;  %vm3732_vm8 = vcmp.gt.f32.partialorder %v3728_v32, 0.0 }
 0xf18   :  { %v3738_v47 = vsel %vm3730_vm11, %v3726_v35, %v3734_v41 }
 0xf19   :  { %v3729_v38 = vadd.f32 %v8878_v31, %v3720_v36  ;;  %v3735_v40 = vmul.f32 0.1, %v3727_v37  ;;  %vm3731_vm9 = vcmp.gt.f32.partialorder %v3727_v37, 0.0  ;;  %v3740_v43 = vsel %vm3732_vm8, %v3728_v32, %v3736_v39 }
 0xf1b   :  { %vm3733_vm10 = vcmp.gt.f32.partialorder %v3729_v38, 0.0  ;;  %v3737_v42 = vmul.f32 0.1, %v3729_v38  ;;  %v3739_v45 = vsel %vm3731_vm9, %v3727_v37, %v3735_v40 }
 0xf1c   :  { %v3766_v48 = vpack.c.bf16 %v3739_v45, %v3738_v47 }
 0xf1d   :  { %v3741_v44 = vsel %vm3733_vm10, %v3729_v38, %v3737_v42 }
 0xf1e   :  { %v3767_v46 = vpack.c.bf16 %v3741_v44, %v3740_v43 }
 0xf20   :  { %10415 = vmatprep.subr.bf16.mxu1 %v3767_v46 }
 0xf21   :  { %10416 = vmatpush3.bf16.msra.mxu1 %v3767_v46 }
 0xf22   :  { %10417 = vmatprep.subr.bf16.mxu1 %v3766_v48 }
 0xf25   :  { %10418 = vmatpush3.bf16.msra.mxu1 %v3766_v48 }
 0xf26   :  { %10443 = vmatprep.subr.bf16.mxu1 %v11144_v1 }
 0xf28   :  { %10420 = vmatmul.mubr.msk.bf16.vlgmr.msra.gmra.mxu1 %vm2842_vm15, %v11124_v49 }
 0xf29   :  { %10423 = vmatprep.mubr.msk.bf16.mxu1 %vm2842_vm15, %v11125_v50  ;;  %10444 = vmatpush3.bf16.msra.mxu1 %v11144_v1 }
 0xf2a   :  { %10445 = vmatprep.subr.bf16.mxu1 %v11147_v4 }
 0xf2d   :  { %10446 = vmatpush3.bf16.msra.mxu1 %v11147_v4 }
 0xf2e   :  { %10447 = vmatprep.subr.bf16.mxu1 %v11150_v8 }
 0xf30   :  { %10424 = vmatmul.mubr.msk.bf16.gmra.mxu1 %vm2842_vm15, %v11126_v51 }
 0xf31   :  { %10427 = vmatprep.mubr.msk.bf16.mxu1 %vm2842_vm15, %v11127_v52  ;;  %10448 = vmatpush3.bf16.msra.mxu1 %v11150_v8  ;;  %v11159_v52 = vld [vmem:[%s12328_s5 + $0x60] sm:$0xff]  }
 0xf32   :  { %10449 = vmatprep.subr.bf16.mxu1 %v11153_v11 }
 0xf35   :  { %10450 = vmatpush3.bf16.msra.mxu1 %v11153_v11 }
 0xf36   :  { %10451 = vmatprep.subr.bf16.mxu1 %v11155_v13 }
 0xf38   :  { %10428 = vmatmul.mubr.msk.bf16.gmra.mxu1 %vm2842_vm15, %v11128_v53  ;;  %v11171_v53 = vld [vmem:[#allocation2 + $0x7f8] sm:$0xff]  }
 0xf39   :  { %10431 = vmatprep.mubr.msk.bf16.mxu1 %vm2842_vm15, %v11129_v54  ;;  %10452 = vmatpush3.bf16.msra.mxu1 %v11155_v13  ;;  %v11172_v54 = vld [vmem:[#allocation2 + $0x7b8] sm:$0xff]  }
 0xf3a   :  { %10453 = vmatprep.subr.bf16.mxu1 %v11156_v7 }
 0xf3d   :  { %10454 = vmatpush3.bf16.msra.mxu1 %v11156_v7 }
 0xf3e   :  { %10455 = vmatprep.subr.bf16.mxu1 %v11157_v14 }
 0xf40   :  { %10432 = vmatmul.mubr.msk.bf16.gmra.mxu1 %vm2842_vm15, %v11130_v55  ;;  %v11173_v55 = vld [vmem:[#allocation2 + $0x7f0] sm:$0xff]  }
 0xf41   :  { %10435 = vmatprep.mubr.msk.bf16.mxu1 %vm2842_vm15, %v11131_v56  ;;  %10456 = vmatpush3.bf16.msra.mxu1 %v11157_v14  ;;  %v11174_v56 = vld [vmem:[#allocation2 + $0x7b0] sm:$0xff]  }
 0xf42   :  { %10457 = vmatprep.subr.bf16.mxu1 %v11158_v15 }
 0xf45   :  { %10458 = vmatpush3.bf16.msra.mxu1 %v11158_v15 }
 0xf46   :  { %9677 = vmatprep.subr.bf16.mxu1 %v11171_v53 }
 0xf48   :  { %10436 = vmatmul.mubr.msk.bf16.gmra.mxu1 %vm2842_vm15, %v11132_v57 }
 0xf49   :  { %10439 = vmatprep.mubr.msk.bf16.mxu1 %vm2842_vm15, %v11133_v58 }
 0xf50   :  { %10440 = vmatmul.mubr.msk.bf16.gmra.mxu1 %vm2842_vm15, %v11134_v59 }
 0xfe8   :  { %v10421_v16 = vpop.f32.mrf.mxu1 }
 0xfea   :  { %v3898_v17 = vpop.f32.mrf.mxu1 }
 0xfec   :  { %v10422_v18 = vpop.f32.mrf.mxu1 }
 0xfed   :  { %v3996_v35 = vpack.c.bf16 %v10422_v18, %v10421_v16 }
 0xfee   :  { %v3901_v19 = vpop.f32.mrf.mxu1 }
 0xfef   :  { %v3993_v29 = vpack.c.bf16 %v3901_v19, %v3898_v17 }
 0xff0   :  { %v10425_v20 = vpop.f32.mrf.mxu1 }
 0xff2   :  { %v3914_v21 = vpop.f32.mrf.mxu1 }
 0xff4   :  { %v10426_v22 = vpop.f32.mrf.mxu1 }
 0xff5   :  { %v4002_v50 = vpack.c.bf16 %v10426_v22, %v10425_v20 }
 0xff6   :  { %v3917_v23 = vpop.f32.mrf.mxu1 }
 0xff7   :  { %v3999_v42 = vpack.c.bf16 %v3917_v23, %v3914_v21 }
 0xff8   :  { %v10429_v24 = vpop.f32.mrf.mxu1 }
 0xffa   :  { %v3930_v25 = vpop.f32.mrf.mxu1 }
 0xffc   :  { %v10430_v26 = vpop.f32.mrf.mxu1 }
 0xffd   :  { %v3997_v31 = vpack.c.bf16 %v10430_v26, %v10429_v24 }
 0xffe   :  { %v3933_v27 = vpop.f32.mrf.mxu1 }
 0xfff   :  { %v3994_v28 = vpack.c.bf16 %v3933_v27, %v3930_v25  ;;  %v8927_v25 = vld [vmem:[#allocation7 + $0x12] ss:$0 sm:$0xff] }
0x1000   :  { %v10433_v30 = vpop.f32.mrf.mxu1 }
0x1001   :  { %4230 = vmatprep.mubr.bf16.mxu0 %v3994_v28 }
0x1002   :  { %v3946_v32 = vpop.f32.mrf.mxu1  ;;  %4231 = vmatmul.mubr.bf16.vlgmr.msra.gmra.mxu0 %v3993_v29 }
0x1003   :  { %4238 = vmatprep.mubr.bf16.mxu0 %v3997_v31 }
0x1004   :  { %v10434_v33 = vpop.f32.mrf.mxu1 }
0x1005   :  { %v4003_v45 = vpack.c.bf16 %v10434_v33, %v10433_v30  ;;  %v8928_v33 = vld [vmem:[#allocation7 + $0x13] ss:$0 sm:$0xff] }
0x1006   :  { %v3949_v34 = vpop.f32.mrf.mxu1 }
0x1007   :  { %v4000_v37 = vpack.c.bf16 %v3949_v34, %v3946_v32 }
0x1008   :  { %v10437_v36 = vpop.f32.mrf.mxu1 }
0x100a   :  { %v3962_v38 = vpop.f32.mrf.mxu1  ;;  %4239 = vmatmul.mubr.bf16.gmra.mxu0 %v3996_v35 }
0x100b   :  { %4246 = vmatprep.mubr.bf16.mxu0 %v4000_v37 }
0x100c   :  { %v10438_v39 = vpop.f32.mrf.mxu1 }
0x100d   :  { %v3998_v43 = vpack.c.bf16 %v10438_v39, %v10437_v36 }
0x100e   :  { %v3965_v40 = vpop.f32.mrf.mxu1 }
0x100f   :  { %v3995_v41 = vpack.c.bf16 %v3965_v40, %v3962_v38 }
0x1010   :  { %v10441_v44 = vpop.f32.mrf.mxu1 }
0x1011   :  { %10459 = vmatprep.mubr.bf16.mxu1 %v3995_v41 }
0x1012   :  { %v3978_v46 = vpop.f32.mrf.mxu1  ;;  %4247 = vmatmul.mubr.bf16.gmra.mxu0 %v3999_v42  ;;  %10460 = vmatmul.mubr.bf16.vlgmr.msra.gmra.mxu1 %v3998_v43 }
0x1013   :  { %4254 = vmatprep.mubr.bf16.mxu0 %v4003_v45  ;;  %9678 = vmatpush3.bf16.msra.mxu1 %v11172_v54 }
0x1014   :  { %v10442_v47 = vpop.f32.mrf.mxu1  ;;  %9679 = vmatprep.subr.bf16.mxu1 %v11173_v55 }
0x1015   :  { %v4004_v51 = vpack.c.bf16 %v10442_v47, %v10441_v44 }
0x1016   :  { %v3981_v48 = vpop.f32.mrf.mxu1 }
0x1017   :  { %v4001_v49 = vpack.c.bf16 %v3981_v48, %v3978_v46  ;;  %9680 = vmatpush3.bf16.msra.mxu1 %v11174_v56 }
0x1019   :  { %10463 = vmatprep.mubr.bf16.mxu1 %v4001_v49 }
0x101a   :  { %4255 = vmatmul.mubr.bf16.gmra.mxu0 %v4002_v50  ;;  %10464 = vmatmul.mubr.bf16.gmra.mxu1 %v4004_v51 }
0x101b   :  { %10475 = vmatprep.mubr.msk.bf16.mxu0 %vm4468_vm12, %v11159_v52 }
0x10c2   :  { %v9625_v57 = vpop.f32.mrf.mxu0 }
0x10c4   :  { %v9626_v58 = vpop.f32.mrf.mxu0 }
0x10c5   :  { %v9627_v32 = vadd.f32 %v9626_v58, %v9625_v57 }
0x10c6   :  { %v9628_v59 = vpop.f32.mrf.mxu0 }
0x10c8   :  { %v9629_v60 = vpop.f32.mrf.mxu0 }
0x10c9   :  { %v9630_v23 = vadd.f32 %v9629_v60, %v9628_v59 }
0x10ca   :  { %v9631_v61 = vpop.f32.mrf.mxu0 }
0x10cc   :  { %v9632_v62 = vpop.f32.mrf.mxu0 }
0x10cd   :  { %v9633_v17 = vadd.f32 %v9632_v62, %v9631_v61 }
0x10ce   :  { %v9634_v63 = vpop.f32.mrf.mxu0 }
0x10d0   :  { %v9635_v0 = vpop.f32.mrf.mxu0 }
0x10d1   :  { %v9636_v13 = vadd.f32 %v9635_v0, %v9634_v63 }
0x10d2   :  { %v9637_v1 = vpop.f32.mrf.mxu0  ;;  %v10461_v2 = vpop.f32.mrf.mxu1 }
0x10d3   :  { %v4306_v24 = vadd.f32 %v10461_v2, %v9633_v17  ;;  %v11170_v17 = vld [vmem:[%s12328_s5 + $0xb8] sm:$0xff]  }
0x10d4   :  { %v9638_v3 = vpop.f32.mrf.mxu0  ;;  %v4297_v4 = vpop.f32.mrf.mxu1 }
0x10d5   :  { %v9639_v12 = vadd.f32 %v9638_v3, %v9637_v1  ;;  %v4336_v39 = vmul.f32 %v8927_v25, %v4306_v24  ;;  %v4298_v40 = vadd.f32 %v9627_v32, %v4297_v4  ;;  %v11181_v24 = vld [vmem:[#allocation2 + $0x798] sm:$0xff]   ;;  %v11189_v32 = vld [vmem:[#allocation2 + $0x820] sm:$0xff]  }
0x10d6   :  { %v9640_v5 = vpop.f32.mrf.mxu0  ;;  %v10462_v6 = vpop.f32.mrf.mxu1 }
0x10d7   :  { %v4309_v18 = vadd.f32 %v10462_v6, %v9636_v13  ;;  %v4349_v49 = vadd.f32 %v8928_v33, %v4336_v39  ;;  %v4334_v50 = vmul.f32 %v8927_v25, %v4298_v40  ;;  %v11165_v13 = vld [vmem:[%s12328_s5 + $0x90] sm:$0xff]  }
0x10d8   :  { %v9641_v8 = vpop.f32.mrf.mxu0  ;;  %v4300_v9 = vpop.f32.mrf.mxu1 }
0x10d9   :  { %v9642_v21 = vadd.f32 %v9641_v8, %v9640_v5  ;;  %v4337_v34 = vmul.f32 %v8927_v25, %v4309_v18  ;;  %v4301_v35 = vadd.f32 %v9630_v23, %v4300_v9  ;;  %v4365_v59 = vmul.f32 0.1, %v4349_v49  ;;  %v11160_v8 = vld [vmem:[%s12328_s5 + $0x68] sm:$0xff]   ;;  %v11161_v9 = vld [vmem:[%s12328_s5 + $0x70] sm:$0xff]   ;;  %v11180_v23 = vld [vmem:[#allocation2 + $0x838] sm:$0xff]  }
0x10da   :  { %v9643_v10 = vpop.f32.mrf.mxu0  ;;  %v10465_v11 = vpop.f32.mrf.mxu1  ;;  %v4347_v60 = vadd.f32 %v8928_v33, %v4334_v50  ;;  %vm4357_vm2 = vcmp.gt.f32.partialorder %v4349_v49, 0.0  ;;  %v11175_v18 = vld [vmem:[#allocation2 + $0x7e8] sm:$0xff]  }
0x10db   :  { %v4350_v44 = vadd.f32 %v8928_v33, %v4337_v34  ;;  %v4335_v45 = vmul.f32 %v8927_v25, %v4301_v35  ;;  %v4373_v2 = vsel %vm4357_vm2, %v4349_v49, %v4365_v59  ;;  %9681 = vmatprep.subr.bf16.mxu1 %v11175_v18  ;;  %v11191_v34 = vld [vmem:[#allocation2 + $0x818] sm:$0xff]   ;;  %v11192_v35 = vld [vmem:[#allocation2 + $0x810] sm:$0xff]  }
0x10dc   :  { %v9644_v7 = vpop.f32.mrf.mxu0  ;;  %v4313_v14 = vpop.f32.mrf.mxu1  ;;  %v4363_v1 = vmul.f32 0.1, %v4347_v60  ;;  %vm4355_vm4 = vcmp.gt.f32.partialorder %v4347_v60, 0.0 }
0x10dd   :  { %v9645_v15 = vadd.f32 %v9644_v7, %v9643_v10  ;;  %v4314_v16 = vadd.f32 %v9639_v12, %v4313_v14  ;;  %v4366_v53 = vmul.f32 0.1, %v4350_v44  ;;  %v4348_v54 = vadd.f32 %v8928_v33, %v4335_v45  ;;  %v11162_v10 = vld [vmem:[%s12328_s5 + $0x78] sm:$0xff]   ;;  %v11164_v12 = vld [vmem:[%s12328_s5 + $0x88] sm:$0xff]   ;;  %v11167_v14 = vld [vmem:[%s12328_s5 + $0xa0] sm:$0xff]  }
0x10de   :  { %v9646_v19 = vpop.f32.mrf.mxu0  ;;  %v10466_v20 = vpop.f32.mrf.mxu1  ;;  %vm4358_vm1 = vcmp.gt.f32.partialorder %v4350_v44, 0.0  ;;  %v4371_v5 = vsel %vm4355_vm4, %v4347_v60, %v4363_v1  ;;  %v11166_v7 = vld [vmem:[%s12328_s5 + $0x98] sm:$0xff]  }
0x10df   :  { %v4322_v22 = vadd.f32 %v10465_v11, %v9645_v15  ;;  %v4338_v29 = vmul.f32 %v8927_v25, %v4314_v16  ;;  %v4374_v63 = vsel %vm4358_vm1, %v4350_v44, %v4366_v53  ;;  %v4364_v0 = vmul.f32 0.1, %v4348_v54  ;;  %v11163_v11 = vld [vmem:[%s12328_s5 + $0x80] sm:$0xff]   ;;  %v11168_v15 = vld [vmem:[%s12328_s5 + $0xa8] sm:$0xff]   ;;  %v11169_v16 = vld [vmem:[%s12328_s5 + $0xb0] sm:$0xff]  }
0x10e0   :  { %v9647_v26 = vpop.f32.mrf.mxu0  ;;  %v4316_v27 = vpop.f32.mrf.mxu1  ;;  %vm4356_vm3 = vcmp.gt.f32.partialorder %v4348_v54, 0.0  ;;  %v4405_v3 = vpack.c.bf16 %v4374_v63, %v4373_v2 }
0x10e1   :  { %v4340_v28 = vmul.f32 %v8927_v25, %v4322_v22  ;;  %v9648_v30 = vadd.f32 %v9647_v26, %v9646_v19  ;;  %v4317_v31 = vadd.f32 %v9642_v21, %v4316_v27  ;;  %v4351_v41 = vadd.f32 %v8928_v33, %v4338_v29  ;;  %v11176_v19 = vld [vmem:[#allocation2 + $0x7a8] sm:$0xff]   ;;  %v11178_v21 = vld [vmem:[#allocation2 + $0x7a0] sm:$0xff]   ;;  %v11179_v22 = vld [vmem:[#allocation2 + $0x7d8] sm:$0xff]  }
0x10e2   :  { %v4372_v4 = vsel %vm4356_vm3, %v4348_v54, %v4364_v0  ;;  %9682 = vmatpush3.bf16.msra.mxu1 %v11176_v19  ;;  %v11183_v26 = vld [vmem:[#allocation2 + $0x830] sm:$0xff]   ;;  %v11186_v29 = vld [vmem:[#allocation2 + $0x828] sm:$0xff]  }
0x10e3   :  { %v4353_v36 = vadd.f32 %v8928_v33, %v4340_v28  ;;  %v4325_v37 = vadd.f32 %v10466_v20, %v9648_v30  ;;  %v4339_v38 = vmul.f32 %v8927_v25, %v4317_v31  ;;  %v4367_v51 = vmul.f32 0.1, %v4351_v41  ;;  %v11177_v20 = vld [vmem:[#allocation2 + $0x7e0] sm:$0xff]   ;;  %v11184_v27 = vld [vmem:[#allocation2 + $0x790] sm:$0xff]   ;;  %v11185_v28 = vld [vmem:[#allocation2 + $0x7c8] sm:$0xff]  }
0x10e4   :  { %vm4359_vm0 = vcmp.gt.f32.partialorder %v4351_v41, 0.0  ;;  %v4404_v6 = vpack.c.bf16 %v4372_v4, %v4371_v5  ;;  %9683 = vmatprep.subr.bf16.mxu1 %v11177_v20  ;;  %v11187_v30 = vld [vmem:[#allocation2 + $0x788] sm:$0xff]   ;;  %v11188_v31 = vld [vmem:[#allocation2 + $0x7c0] sm:$0xff]  }
0x10e5   :  { %v4341_v42 = vmul.f32 %v8927_v25, %v4325_v37  ;;  %v4352_v43 = vadd.f32 %v8928_v33, %v4339_v38  ;;  %v4369_v47 = vmul.f32 0.1, %v4353_v36  ;;  %vm4361_vm13 = vcmp.gt.f32.partialorder %v4353_v36, 0.0  ;;  %v11182_v25 = vld [vmem:[#allocation2 + $0x7d0] sm:$0xff]   ;;  %v11194_v37 = vld [vmem:[#allocation2 + $0x800] sm:$0xff]  }
0x10e6   :  { %v4375_v61 = vsel %vm4359_vm0, %v4351_v41, %v4367_v51  ;;  %9684 = vmatpush3.bf16.msra.mxu1 %v11178_v21 }
0x10e7   :  { %v4354_v46 = vadd.f32 %v8928_v33, %v4341_v42  ;;  %v4368_v48 = vmul.f32 0.1, %v4352_v43  ;;  %vm4360_vm14 = vcmp.gt.f32.partialorder %v4352_v43, 0.0  ;;  %v4377_v55 = vsel %vm4361_vm13, %v4353_v36, %v4369_v47  ;;  %9685 = vmatprep.subr.bf16.mxu1 %v11179_v22  ;;  %v11190_v33 = vld [vmem:[#allocation2 + $0x780] sm:$0xff]   ;;  %v11193_v36 = vld [vmem:[#allocation2 + $0x808] sm:$0xff]  }
0x10e9   :  { %vm4362_vm15 = vcmp.gt.f32.partialorder %v4354_v46, 0.0  ;;  %v4370_v52 = vmul.f32 0.1, %v4354_v46  ;;  %v4376_v57 = vsel %vm4360_vm14, %v4352_v43, %v4368_v48 }
0x10ea   :  { %v4406_v62 = vpack.c.bf16 %v4376_v57, %v4375_v61  ;;  %9686 = vmatpush3.bf16.msra.mxu1 %v11181_v24 }
0x10eb   :  { %v4378_v56 = vsel %vm4362_vm15, %v4354_v46, %v4370_v52  ;;  %9687 = vmatprep.subr.bf16.mxu1 %v11182_v25 }
0x10ec   :  { %v4407_v58 = vpack.c.bf16 %v4378_v56, %v4377_v55 }
0x10ee   :  { %10467 = vmatprep.subr.bf16.mxu0 %v4407_v58  ;;  %9688 = vmatpush3.bf16.msra.mxu1 %v11184_v27 }
0x10ef   :  { %10468 = vmatpush3.bf16.msra.mxu0 %v4407_v58  ;;  %9689 = vmatprep.subr.bf16.mxu1 %v11185_v28 }
0x10f0   :  { %10469 = vmatprep.subr.bf16.mxu0 %v4406_v62 }
0x10f2   :  { %9690 = vmatpush3.bf16.msra.mxu1 %v11187_v30 }
0x10f3   :  { %10470 = vmatpush3.bf16.msra.mxu0 %v4406_v62  ;;  %9691 = vmatprep.subr.bf16.mxu1 %v11188_v31 }
0x10f4   :  { %10471 = vmatprep.subr.bf16.mxu0 %v4405_v3 }
0x10f6   :  { %9692 = vmatpush3.bf16.msra.mxu1 %v11190_v33 }
0x10f7   :  { %10472 = vmatpush3.bf16.msra.mxu0 %v4405_v3 }
0x10f8   :  { %10473 = vmatprep.subr.bf16.mxu0 %v4404_v6 }
0x10fb   :  { %10474 = vmatpush3.bf16.msra.mxu0 %v4404_v6 }
0x10fc   :  { %10499 = vmatprep.subr.bf16.mxu0 %v11180_v23 }
0x10fe   :  { %10476 = vmatmul.mubr.msk.bf16.vlgmr.msra.gmra.mxu0 %vm4468_vm12, %v11160_v8 }
0x10ff   :  { %10479 = vmatprep.mubr.msk.bf16.mxu0 %vm4468_vm12, %v11161_v9  ;;  %10500 = vmatpush3.bf16.msra.mxu0 %v11180_v23 }
0x1100   :  { %10501 = vmatprep.subr.bf16.mxu0 %v11183_v26 }
0x1103   :  { %10502 = vmatpush3.bf16.msra.mxu0 %v11183_v26 }
0x1104   :  { %10503 = vmatprep.subr.bf16.mxu0 %v11186_v29 }
0x1106   :  { %10480 = vmatmul.mubr.msk.bf16.gmra.mxu0 %vm4468_vm12, %v11162_v10 }
0x1107   :  { %10483 = vmatprep.mubr.msk.bf16.mxu0 %vm4468_vm12, %v11163_v11  ;;  %10504 = vmatpush3.bf16.msra.mxu0 %v11186_v29  ;;  %v11195_v11 = vld [vmem:[%s12328_s5 + $0xc0] sm:$0xff]  }
0x1108   :  { %10505 = vmatprep.subr.bf16.mxu0 %v11189_v32 }
0x110b   :  { %10506 = vmatpush3.bf16.msra.mxu0 %v11189_v32 }
0x110c   :  { %10507 = vmatprep.subr.bf16.mxu0 %v11191_v34 }
0x110e   :  { %10484 = vmatmul.mubr.msk.bf16.gmra.mxu0 %vm4468_vm12, %v11164_v12  ;;  %v11207_v12 = vld [vmem:[#allocation2 + $0x8b8] sm:$0xff]  }
0x110f   :  { %10487 = vmatprep.mubr.msk.bf16.mxu0 %vm4468_vm12, %v11165_v13  ;;  %10508 = vmatpush3.bf16.msra.mxu0 %v11191_v34  ;;  %v11208_v13 = vld [vmem:[#allocation2 + $0x878] sm:$0xff]  }
0x1110   :  { %10509 = vmatprep.subr.bf16.mxu0 %v11192_v35 }
0x1113   :  { %10510 = vmatpush3.bf16.msra.mxu0 %v11192_v35 }
0x1114   :  { %10511 = vmatprep.subr.bf16.mxu0 %v11193_v36 }
0x1116   :  { %10488 = vmatmul.mubr.msk.bf16.gmra.mxu0 %vm4468_vm12, %v11166_v7  ;;  %v11209_v7 = vld [vmem:[#allocation2 + $0x8b0] sm:$0xff]  }
0x1117   :  { %10491 = vmatprep.mubr.msk.bf16.mxu0 %vm4468_vm12, %v11167_v14  ;;  %10512 = vmatpush3.bf16.msra.mxu0 %v11193_v36  ;;  %v11210_v14 = vld [vmem:[#allocation2 + $0x870] sm:$0xff]  }
0x1118   :  { %10513 = vmatprep.subr.bf16.mxu0 %v11194_v37 }
0x111b   :  { %10514 = vmatpush3.bf16.msra.mxu0 %v11194_v37 }
0x111c   :  { %9745 = vmatprep.subr.bf16.mxu0 %v11207_v12 }
0x111e   :  { %10492 = vmatmul.mubr.msk.bf16.gmra.mxu0 %vm4468_vm12, %v11168_v15 }
0x111f   :  { %10495 = vmatprep.mubr.msk.bf16.mxu0 %vm4468_vm12, %v11169_v16 }
0x1126   :  { %10496 = vmatmul.mubr.msk.bf16.gmra.mxu0 %vm4468_vm12, %v11170_v17 }
0x11be   :  { %v10477_v38 = vpop.f32.mrf.mxu0 }
0x11c0   :  { %v4539_v39 = vpop.f32.mrf.mxu0 }
0x11c2   :  { %v10478_v40 = vpop.f32.mrf.mxu0 }
0x11c3   :  { %v4637_v57 = vpack.c.bf16 %v10478_v40, %v10477_v38 }
0x11c4   :  { %v4542_v41 = vpop.f32.mrf.mxu0 }
0x11c5   :  { %v4634_v51 = vpack.c.bf16 %v4542_v41, %v4539_v39 }
0x11c6   :  { %v10481_v42 = vpop.f32.mrf.mxu0 }
0x11c8   :  { %v4555_v43 = vpop.f32.mrf.mxu0 }
0x11ca   :  { %v10482_v44 = vpop.f32.mrf.mxu0 }
0x11cb   :  { %v4643_v9 = vpack.c.bf16 %v10482_v44, %v10481_v42 }
0x11cc   :  { %v4558_v45 = vpop.f32.mrf.mxu0 }
0x11cd   :  { %v4640_v0 = vpack.c.bf16 %v4558_v45, %v4555_v43 }
0x11ce   :  { %v10485_v46 = vpop.f32.mrf.mxu0 }
0x11d0   :  { %v4571_v47 = vpop.f32.mrf.mxu0 }
0x11d2   :  { %v10486_v48 = vpop.f32.mrf.mxu0 }
0x11d3   :  { %v4638_v53 = vpack.c.bf16 %v10486_v48, %v10485_v46 }
0x11d4   :  { %v4574_v49 = vpop.f32.mrf.mxu0 }
0x11d5   :  { %v4635_v50 = vpack.c.bf16 %v4574_v49, %v4571_v47  ;;  %v9001_v47 = vld [vmem:[#allocation7 + $0x14] ss:$0 sm:$0xff] }
0x11d6   :  { %v10489_v52 = vpop.f32.mrf.mxu0 }
0x11d7   :  { %4871 = vmatprep.mubr.bf16.mxu1 %v4635_v50 }
0x11d8   :  { %v4587_v54 = vpop.f32.mrf.mxu0  ;;  %4872 = vmatmul.mubr.bf16.vlgmr.msra.gmra.mxu1 %v4634_v51 }
0x11d9   :  { %4879 = vmatprep.mubr.bf16.mxu1 %v4638_v53 }
0x11da   :  { %v10490_v55 = vpop.f32.mrf.mxu0 }
0x11db   :  { %v4644_v3 = vpack.c.bf16 %v10490_v55, %v10489_v52  ;;  %v9002_v55 = vld [vmem:[#allocation7 + $0x15] ss:$0 sm:$0xff] }
0x11dc   :  { %v4590_v56 = vpop.f32.mrf.mxu0 }
0x11dd   :  { %v4641_v59 = vpack.c.bf16 %v4590_v56, %v4587_v54 }
0x11de   :  { %v10493_v58 = vpop.f32.mrf.mxu0 }
0x11e0   :  { %v4603_v60 = vpop.f32.mrf.mxu0  ;;  %4880 = vmatmul.mubr.bf16.gmra.mxu1 %v4637_v57 }
0x11e1   :  { %4887 = vmatprep.mubr.bf16.mxu1 %v4641_v59 }
0x11e2   :  { %v10494_v61 = vpop.f32.mrf.mxu0 }
0x11e3   :  { %v4639_v1 = vpack.c.bf16 %v10494_v61, %v10493_v58 }
0x11e4   :  { %v4606_v62 = vpop.f32.mrf.mxu0 }
0x11e5   :  { %v4636_v63 = vpack.c.bf16 %v4606_v62, %v4603_v60 }
0x11e6   :  { %v10497_v2 = vpop.f32.mrf.mxu0 }
0x11e7   :  { %10515 = vmatprep.mubr.bf16.mxu0 %v4636_v63 }
0x11e8   :  { %v4619_v4 = vpop.f32.mrf.mxu0  ;;  %4888 = vmatmul.mubr.bf16.gmra.mxu1 %v4640_v0  ;;  %10516 = vmatmul.mubr.bf16.vlgmr.msra.gmra.mxu0 %v4639_v1 }
0x11e9   :  { %4895 = vmatprep.mubr.bf16.mxu1 %v4644_v3  ;;  %9746 = vmatpush3.bf16.msra.mxu0 %v11208_v13 }
0x11ea   :  { %v10498_v5 = vpop.f32.mrf.mxu0  ;;  %9747 = vmatprep.subr.bf16.mxu0 %v11209_v7 }
0x11eb   :  { %v4645_v10 = vpack.c.bf16 %v10498_v5, %v10497_v2 }
0x11ec   :  { %v4622_v6 = vpop.f32.mrf.mxu0 }
0x11ed   :  { %v4642_v8 = vpack.c.bf16 %v4622_v6, %v4619_v4  ;;  %9748 = vmatpush3.bf16.msra.mxu0 %v11210_v14 }
0x11ef   :  { %10519 = vmatprep.mubr.bf16.mxu0 %v4642_v8 }
0x11f0   :  { %4896 = vmatmul.mubr.bf16.gmra.mxu1 %v4643_v9  ;;  %10520 = vmatmul.mubr.bf16.gmra.mxu0 %v4645_v10 }
0x11f1   :  { %10531 = vmatprep.mubr.msk.bf16.mxu1 %vm4468_vm12, %v11195_v11 }
0x1298   :  { %v9693_v15 = vpop.f32.mrf.mxu1 }
0x129a   :  { %v9694_v16 = vpop.f32.mrf.mxu1 }
0x129b   :  { %v9695_v54 = vadd.f32 %v9694_v16, %v9693_v15 }
0x129c   :  { %v9696_v17 = vpop.f32.mrf.mxu1 }
0x129e   :  { %v9697_v18 = vpop.f32.mrf.mxu1 }
0x129f   :  { %v9698_v45 = vadd.f32 %v9697_v18, %v9696_v17 }
0x12a0   :  { %v9699_v19 = vpop.f32.mrf.mxu1 }
0x12a2   :  { %v9700_v20 = vpop.f32.mrf.mxu1 }
0x12a3   :  { %v9701_v39 = vadd.f32 %v9700_v20, %v9699_v19 }
0x12a4   :  { %v9702_v21 = vpop.f32.mrf.mxu1 }
0x12a6   :  { %v9703_v22 = vpop.f32.mrf.mxu1 }
0x12a7   :  { %v9704_v34 = vadd.f32 %v9703_v22, %v9702_v21 }
0x12a8   :  { %v9705_v23 = vpop.f32.mrf.mxu1  ;;  %v10517_v24 = vpop.f32.mrf.mxu0 }
0x12a9   :  { %v4947_v46 = vadd.f32 %v10517_v24, %v9701_v39  ;;  %v11206_v39 = vld [vmem:[%s12328_s5 + $0x118] sm:$0xff]  }
0x12aa   :  { %v9706_v25 = vpop.f32.mrf.mxu1  ;;  %v4938_v26 = vpop.f32.mrf.mxu0 }
0x12ab   :  { %v9707_v33 = vadd.f32 %v9706_v25, %v9705_v23  ;;  %v4977_v61 = vmul.f32 %v9001_v47, %v4947_v46  ;;  %v4939_v62 = vadd.f32 %v9695_v54, %v4938_v26  ;;  %v11217_v46 = vld [vmem:[#allocation2 + $0x858] sm:$0xff]   ;;  %v11225_v54 = vld [vmem:[#allocation2 + $0x8e0] sm:$0xff]  }
0x12ac   :  { %v9708_v27 = vpop.f32.mrf.mxu1  ;;  %v10518_v28 = vpop.f32.mrf.mxu0 }
0x12ad   :  { %v4950_v40 = vadd.f32 %v10518_v28, %v9704_v34  ;;  %v4990_v8 = vadd.f32 %v9002_v55, %v4977_v61  ;;  %v4975_v9 = vmul.f32 %v9001_v47, %v4939_v62  ;;  %v11201_v34 = vld [vmem:[%s12328_s5 + $0xf0] sm:$0xff]  }
0x12ae   :  { %v9709_v29 = vpop.f32.mrf.mxu1  ;;  %v4941_v30 = vpop.f32.mrf.mxu0 }
0x12af   :  { %v9710_v43 = vadd.f32 %v9709_v29, %v9708_v27  ;;  %v4978_v56 = vmul.f32 %v9001_v47, %v4950_v40  ;;  %v4942_v57 = vadd.f32 %v9698_v45, %v4941_v30  ;;  %v5006_v17 = vmul.f32 0.1, %v4990_v8  ;;  %v11196_v29 = vld [vmem:[%s12328_s5 + $0xc8] sm:$0xff]   ;;  %v11197_v30 = vld [vmem:[%s12328_s5 + $0xd0] sm:$0xff]   ;;  %v11216_v45 = vld [vmem:[#allocation2 + $0x8f8] sm:$0xff]  }
0x12b0   :  { %v9711_v31 = vpop.f32.mrf.mxu1  ;;  %v10521_v32 = vpop.f32.mrf.mxu0  ;;  %v4988_v18 = vadd.f32 %v9002_v55, %v4975_v9  ;;  %vm4998_vm10 = vcmp.gt.f32.partialorder %v4990_v8, 0.0  ;;  %v11211_v40 = vld [vmem:[#allocation2 + $0x8a8] sm:$0xff]  }
0x12b1   :  { %v4991_v2 = vadd.f32 %v9002_v55, %v4978_v56  ;;  %v4976_v3 = vmul.f32 %v9001_v47, %v4942_v57  ;;  %v5014_v24 = vsel %vm4998_vm10, %v4990_v8, %v5006_v17  ;;  %9749 = vmatprep.subr.bf16.mxu0 %v11211_v40  ;;  %v11227_v56 = vld [vmem:[#allocation2 + $0x8d8] sm:$0xff]   ;;  %v11228_v57 = vld [vmem:[#allocation2 + $0x8d0] sm:$0xff]  }
0x12b2   :  { %v9712_v35 = vpop.f32.mrf.mxu1  ;;  %v4954_v36 = vpop.f32.mrf.mxu0  ;;  %v5004_v23 = vmul.f32 0.1, %v4988_v18  ;;  %vm4996_vm13 = vcmp.gt.f32.partialorder %v4988_v18, 0.0 }
0x12b3   :  { %v9713_v37 = vadd.f32 %v9712_v35, %v9711_v31  ;;  %v4955_v38 = vadd.f32 %v9707_v33, %v4954_v36  ;;  %v5007_v12 = vmul.f32 0.1, %v4991_v2  ;;  %v4989_v13 = vadd.f32 %v9002_v55, %v4976_v3  ;;  %v11198_v31 = vld [vmem:[%s12328_s5 + $0xd8] sm:$0xff]   ;;  %v11200_v33 = vld [vmem:[%s12328_s5 + $0xe8] sm:$0xff]   ;;  %v11203_v36 = vld [vmem:[%s12328_s5 + $0x100] sm:$0xff]  }
0x12b4   :  { %v9714_v41 = vpop.f32.mrf.mxu1  ;;  %v10522_v42 = vpop.f32.mrf.mxu0  ;;  %vm4999_vm9 = vcmp.gt.f32.partialorder %v4991_v2, 0.0  ;;  %v5012_v27 = vsel %vm4996_vm13, %v4988_v18, %v5004_v23  ;;  %v11202_v35 = vld [vmem:[%s12328_s5 + $0xf8] sm:$0xff]  }
0x12b5   :  { %v4963_v44 = vadd.f32 %v10521_v32, %v9713_v37  ;;  %v4979_v51 = vmul.f32 %v9001_v47, %v4955_v38  ;;  %v5015_v21 = vsel %vm4999_vm9, %v4991_v2, %v5007_v12  ;;  %v5005_v22 = vmul.f32 0.1, %v4989_v13  ;;  %v11199_v32 = vld [vmem:[%s12328_s5 + $0xe0] sm:$0xff]   ;;  %v11204_v37 = vld [vmem:[%s12328_s5 + $0x108] sm:$0xff]   ;;  %v11205_v38 = vld [vmem:[%s12328_s5 + $0x110] sm:$0xff]   ;;  %s11502_s5 = smov [#allocation8]  }
0x12b6   :  { %v9715_v48 = vpop.f32.mrf.mxu1  ;;  %v4957_v49 = vpop.f32.mrf.mxu0  ;;  %vm4997_vm11 = vcmp.gt.f32.partialorder %v4989_v13, 0.0  ;;  %v5046_v25 = vpack.c.bf16 %v5015_v21, %v5014_v24  ;;  %s8524_s21 = sshll.u32 %s11502_s5, 4  ;;  %s8525_s21 = int_to_ptr.vmem [resolvable:$true] %s8524_s21 }
0x12b7   :  { %v4981_v50 = vmul.f32 %v9001_v47, %v4963_v44  ;;  %v9716_v52 = vadd.f32 %v9715_v48, %v9714_v41  ;;  %v4958_v53 = vadd.f32 %v9710_v43, %v4957_v49  ;;  %v4992_v63 = vadd.f32 %v9002_v55, %v4979_v51  ;;  %v11212_v41 = vld [vmem:[#allocation2 + $0x868] sm:$0xff]   ;;  %v11214_v43 = vld [vmem:[#allocation2 + $0x860] sm:$0xff]   ;;  %v11215_v44 = vld [vmem:[#allocation2 + $0x898] sm:$0xff]   ;;  %s11467_s22 = scalar_lea.vmem %s8525_s21, 2048  ;;  %p11472_p2 = scmp.lt.s32.totalorder %s8525_s21, %s8525_s21 }
0x12b8   :  { %v5013_v26 = vsel %vm4997_vm11, %v4989_v13, %v5005_v22  ;;  %9750 = vmatpush3.bf16.msra.mxu0 %v11212_v41  ;;  %v11219_v48 = vld [vmem:[#allocation2 + $0x8f0] sm:$0xff]   ;;  %v11222_v51 = vld [vmem:[#allocation2 + $0x8e8] sm:$0xff]   ;;  %p11468_p1 = scmp.ne.s32.totalorder %s8525_s21, %s11467_s22  ;;  %p11473_p3 = scmp.lt.s32.totalorder %s11467_s22, %s11467_s22 }
0x12b9   :  { %v4994_v58 = vadd.f32 %v9002_v55, %v4981_v50  ;;  %v4966_v59 = vadd.f32 %v10522_v42, %v9716_v52  ;;  %v4980_v60 = vmul.f32 %v9001_v47, %v4958_v53  ;;  %v5008_v10 = vmul.f32 0.1, %v4992_v63  ;;  %v11213_v42 = vld [vmem:[#allocation2 + $0x8a0] sm:$0xff]   ;;  %v11220_v49 = vld [vmem:[#allocation2 + $0x850] sm:$0xff]   ;;  %v11221_v50 = vld [vmem:[#allocation2 + $0x888] sm:$0xff]  }
0x12ba   :  { %vm5000_vm8 = vcmp.gt.f32.partialorder %v4992_v63, 0.0  ;;  %v5045_v28 = vpack.c.bf16 %v5013_v26, %v5012_v27  ;;  %9751 = vmatprep.subr.bf16.mxu0 %v11213_v42  ;;  %v11223_v52 = vld [vmem:[#allocation2 + $0x848] sm:$0xff]   ;;  %v11224_v53 = vld [vmem:[#allocation2 + $0x880] sm:$0xff]   ;;  %p11474_p4 = por %p11473_p3, %p11472_p2 }
0x12bb   :  { %v4982_v0 = vmul.f32 %v9001_v47, %v4966_v59  ;;  %v4993_v1 = vadd.f32 %v9002_v55, %v4980_v60  ;;  %v5010_v5 = vmul.f32 0.1, %v4994_v58  ;;  %vm5002_vm5 = vcmp.gt.f32.partialorder %v4994_v58, 0.0  ;;  %v11218_v47 = vld [vmem:[#allocation2 + $0x890] sm:$0xff]   ;;  %v11230_v59 = vld [vmem:[#allocation2 + $0x8c0] sm:$0xff]  }
0x12bc   :  { %v5016_v19 = vsel %vm5000_vm8, %v4992_v63, %v5008_v10  ;;  %9752 = vmatpush3.bf16.msra.mxu0 %v11214_v43  ;;  %p11475_p5 = pnand %p11474_p4, %p11468_p1 }
0x12bd   :  { %v4995_v4 = vadd.f32 %v9002_v55, %v4982_v0  ;;  %v5009_v6 = vmul.f32 0.1, %v4993_v1  ;;  %vm5001_vm6 = vcmp.gt.f32.partialorder %v4993_v1, 0.0  ;;  %v5018_v7 = vsel %vm5002_vm5, %v4994_v58, %v5010_v5  ;;  %9753 = vmatprep.subr.bf16.mxu0 %v11215_v44  ;;  %v11226_v55 = vld [vmem:[#allocation2 + $0x840] sm:$0xff]   ;;  %v11229_v58 = vld [vmem:[#allocation2 + $0x8c8] sm:$0xff]  }
0x12bf   :  { %vm5003_vm7 = vcmp.gt.f32.partialorder %v4995_v4, 0.0  ;;  %v5011_v11 = vmul.f32 0.1, %v4995_v4  ;;  %v5017_v15 = vsel %vm5001_vm6, %v4993_v1, %v5009_v6 }
0x12c0   :  { %v5047_v20 = vpack.c.bf16 %v5017_v15, %v5016_v19  ;;  %9754 = vmatpush3.bf16.msra.mxu0 %v11217_v46 }
0x12c1   :  { %v5019_v14 = vsel %vm5003_vm7, %v4995_v4, %v5011_v11  ;;  %9755 = vmatprep.subr.bf16.mxu0 %v11218_v47 }
0x12c2   :  { %v5048_v16 = vpack.c.bf16 %v5019_v14, %v5018_v7 }
0x12c4   :  { %10523 = vmatprep.subr.bf16.mxu1 %v5048_v16  ;;  %9756 = vmatpush3.bf16.msra.mxu0 %v11220_v49 }
0x12c5   :  { %10524 = vmatpush3.bf16.msra.mxu1 %v5048_v16  ;;  %9757 = vmatprep.subr.bf16.mxu0 %v11221_v50 }
0x12c6   :  { %10525 = vmatprep.subr.bf16.mxu1 %v5047_v20 }
0x12c8   :  { %9758 = vmatpush3.bf16.msra.mxu0 %v11223_v52 }
0x12c9   :  { %10526 = vmatpush3.bf16.msra.mxu1 %v5047_v20  ;;  %9759 = vmatprep.subr.bf16.mxu0 %v11224_v53 }
0x12ca   :  { %10527 = vmatprep.subr.bf16.mxu1 %v5046_v25 }
0x12cc   :  { %9760 = vmatpush3.bf16.msra.mxu0 %v11226_v55 }
0x12cd   :  { %10528 = vmatpush3.bf16.msra.mxu1 %v5046_v25 }
0x12ce   :  { %10529 = vmatprep.subr.bf16.mxu1 %v5045_v28 }
0x12d1   :  { %10530 = vmatpush3.bf16.msra.mxu1 %v5045_v28 }
0x12d2   :  { %10555 = vmatprep.subr.bf16.mxu1 %v11216_v45 }
0x12d4   :  { %10532 = vmatmul.mubr.msk.bf16.vlgmr.msra.gmra.mxu1 %vm4468_vm12, %v11196_v29 }
0x12d5   :  { %10535 = vmatprep.mubr.msk.bf16.mxu1 %vm4468_vm12, %v11197_v30  ;;  %10556 = vmatpush3.bf16.msra.mxu1 %v11216_v45 }
0x12d6   :  { %10557 = vmatprep.subr.bf16.mxu1 %v11219_v48 }
0x12d9   :  { %10558 = vmatpush3.bf16.msra.mxu1 %v11219_v48 }
0x12da   :  { %10559 = vmatprep.subr.bf16.mxu1 %v11222_v51 }
0x12dc   :  { %10536 = vmatmul.mubr.msk.bf16.gmra.mxu1 %vm4468_vm12, %v11198_v31 }
0x12dd   :  { %10539 = vmatprep.mubr.msk.bf16.mxu1 %vm4468_vm12, %v11199_v32  ;;  %10560 = vmatpush3.bf16.msra.mxu1 %v11222_v51  ;;  %v11231_v32 = vld [vmem:[#allocation5] sm:$0xff]  }
0x12de   :  { %10561 = vmatprep.subr.bf16.mxu1 %v11225_v54 }
0x12e1   :  { %10562 = vmatpush3.bf16.msra.mxu1 %v11225_v54 }
0x12e2   :  { %10563 = vmatprep.subr.bf16.mxu1 %v11227_v56 }
0x12e4   :  { %10540 = vmatmul.mubr.msk.bf16.gmra.mxu1 %vm4468_vm12, %v11200_v33 }
0x12e5   :  { %10543 = vmatprep.mubr.msk.bf16.mxu1 %vm4468_vm12, %v11201_v34  ;;  %10564 = vmatpush3.bf16.msra.mxu1 %v11227_v56 }
0x12e6   :  { %10565 = vmatprep.subr.bf16.mxu1 %v11228_v57 }
0x12e9   :  { %10566 = vmatpush3.bf16.msra.mxu1 %v11228_v57 }
0x12ea   :  { %10567 = vmatprep.subr.bf16.mxu1 %v11229_v58 }
0x12ec   :  { %10544 = vmatmul.mubr.msk.bf16.gmra.mxu1 %vm4468_vm12, %v11202_v35 }
0x12ed   :  { %10547 = vmatprep.mubr.msk.bf16.mxu1 %vm4468_vm12, %v11203_v36  ;;  %10568 = vmatpush3.bf16.msra.mxu1 %v11229_v58 }
0x12ee   :  { %10569 = vmatprep.subr.bf16.mxu1 %v11230_v59 }
0x12f1   :  { %10570 = vmatpush3.bf16.msra.mxu1 %v11230_v59 }
0x12f4   :  { %10548 = vmatmul.mubr.msk.bf16.gmra.mxu1 %vm4468_vm12, %v11204_v37 }
0x12f5   :  { %10551 = vmatprep.mubr.msk.bf16.mxu1 %vm4468_vm12, %v11205_v38 }
0x12fc   :  { %10552 = vmatmul.mubr.msk.bf16.gmra.mxu1 %vm4468_vm12, %v11206_v39 }
0x1394   :  { %v10533_v60 = vpop.f32.mrf.mxu1 }
0x1396   :  { %v5179_v61 = vpop.f32.mrf.mxu1 }
0x1398   :  { %v10534_v62 = vpop.f32.mrf.mxu1 }
0x1399   :  { %v5277_v15 = vpack.c.bf16 %v10534_v62, %v10533_v60 }
0x139a   :  { %v5182_v63 = vpop.f32.mrf.mxu1 }
0x139b   :  { %v5274_v10 = vpack.c.bf16 %v5182_v63, %v5179_v61 }
0x139c   :  { %v10537_v0 = vpop.f32.mrf.mxu1 }
0x139e   :  { %v5195_v1 = vpop.f32.mrf.mxu1 }
0x13a0   :  { %v10538_v2 = vpop.f32.mrf.mxu1 }
0x13a1   :  { %v5283_v30 = vpack.c.bf16 %v10538_v2, %v10537_v0 }
0x13a2   :  { %v5198_v3 = vpop.f32.mrf.mxu1 }
0x13a3   :  { %v5280_v22 = vpack.c.bf16 %v5198_v3, %v5195_v1  ;;  %v9075_v1 = vld [vmem:[#allocation7 + $0x16] ss:$0 sm:$0xff] }
0x13a4   :  { %v10541_v4 = vpop.f32.mrf.mxu1 }
0x13a6   :  { %v5211_v5 = vpop.f32.mrf.mxu1 }
0x13a8   :  { %v10542_v6 = vpop.f32.mrf.mxu1 }
0x13a9   :  { %v5278_v12 = vpack.c.bf16 %v10542_v6, %v10541_v4 }
0x13aa   :  { %v5214_v8 = vpop.f32.mrf.mxu1 }
0x13ab   :  { %v5275_v9 = vpack.c.bf16 %v5214_v8, %v5211_v5 }
0x13ac   :  { %v10545_v11 = vpop.f32.mrf.mxu1 }
0x13ad   :  { %5511 = vmatprep.mubr.bf16.mxu0 %v5275_v9 }
0x13ae   :  { %v5227_v13 = vpop.f32.mrf.mxu1  ;;  %5512 = vmatmul.mubr.bf16.vlgmr.msra.gmra.mxu0 %v5274_v10  ;;  %v9076_v10 = vld [vmem:[#allocation7 + $0x17] ss:$0 sm:$0xff] }
0x13af   :  { %5519 = vmatprep.mubr.bf16.mxu0 %v5278_v12 }
0x13b0   :  { %v10546_v7 = vpop.f32.mrf.mxu1 }
0x13b1   :  { %v5284_v25 = vpack.c.bf16 %v10546_v7, %v10545_v11 }
0x13b2   :  { %v5230_v14 = vpop.f32.mrf.mxu1 }
0x13b3   :  { %v5281_v17 = vpack.c.bf16 %v5230_v14, %v5227_v13 }
0x13b4   :  { %v10549_v16 = vpop.f32.mrf.mxu1 }
0x13b6   :  { %v5243_v18 = vpop.f32.mrf.mxu1  ;;  %5520 = vmatmul.mubr.bf16.gmra.mxu0 %v5277_v15 }
0x13b7   :  { %5527 = vmatprep.mubr.bf16.mxu0 %v5281_v17 }
0x13b8   :  { %v10550_v19 = vpop.f32.mrf.mxu1 }
0x13b9   :  { %v5279_v23 = vpack.c.bf16 %v10550_v19, %v10549_v16 }
0x13ba   :  { %v5246_v20 = vpop.f32.mrf.mxu1 }
0x13bb   :  { %v5276_v21 = vpack.c.bf16 %v5246_v20, %v5243_v18 }
0x13bc   :  { %v10553_v24 = vpop.f32.mrf.mxu1 }
0x13bd   :  { %10571 = vmatprep.mubr.bf16.mxu1 %v5276_v21 }
0x13be   :  { %v5259_v26 = vpop.f32.mrf.mxu1  ;;  %5528 = vmatmul.mubr.bf16.gmra.mxu0 %v5280_v22  ;;  %10572 = vmatmul.mubr.bf16.vlgmr.msra.gmra.mxu1 %v5279_v23 }
0x13bf   :  { %5535 = vmatprep.mubr.bf16.mxu0 %v5284_v25 }
0x13c0   :  { %v10554_v27 = vpop.f32.mrf.mxu1 }
0x13c1   :  { %v5285_v31 = vpack.c.bf16 %v10554_v27, %v10553_v24 }
0x13c2   :  { %v5262_v28 = vpop.f32.mrf.mxu1 }
0x13c3   :  { %v5282_v29 = vpack.c.bf16 %v5262_v28, %v5259_v26 }
0x13c5   :  { %10575 = vmatprep.mubr.bf16.mxu1 %v5282_v29 }
0x13c6   :  { %5536 = vmatmul.mubr.bf16.gmra.mxu0 %v5283_v30  ;;  %10576 = vmatmul.mubr.bf16.gmra.mxu1 %v5285_v31 }
0x13c7   :  { %10587 = vmatprep.mubr.msk.bf16.mxu0 %vm4468_vm12, %v11231_v32 }
0x146e   :  { %v9761_v33 = vpop.f32.mrf.mxu0 }
0x1470   :  { %v9762_v34 = vpop.f32.mrf.mxu0 }
0x1471   :  { %v9763_v9 = vadd.f32 %v9762_v34, %v9761_v33 }
0x1472   :  { %v9764_v35 = vpop.f32.mrf.mxu0 }
0x1474   :  { %v9765_v36 = vpop.f32.mrf.mxu0 }
0x1475   :  { %v9766_v63 = vadd.f32 %v9765_v36, %v9764_v35 }
0x1476   :  { %v9767_v37 = vpop.f32.mrf.mxu0 }
0x1478   :  { %v9768_v38 = vpop.f32.mrf.mxu0 }
0x1479   :  { %v9769_v57 = vadd.f32 %v9768_v38, %v9767_v37 }
0x147a   :  { %v9770_v39 = vpop.f32.mrf.mxu0 }
0x147c   :  { %v9771_v40 = vpop.f32.mrf.mxu0 }
0x147d   :  { %v9772_v52 = vadd.f32 %v9771_v40, %v9770_v39 }
0x147e   :  { %v9773_v41 = vpop.f32.mrf.mxu0  ;;  %v10573_v42 = vpop.f32.mrf.mxu1 }
0x147f   :  { %v5587_v0 = vadd.f32 %v10573_v42, %v9769_v57  ;;  %v11242_v57 = vld [vmem:[#allocation5 + $0x58] sm:$0xff]  }
0x1480   :  { %v9774_v43 = vpop.f32.mrf.mxu0  ;;  %v5578_v44 = vpop.f32.mrf.mxu1 }
0x1481   :  { %v9775_v51 = vadd.f32 %v9774_v43, %v9773_v41  ;;  %v5617_v15 = vmul.f32 %v9075_v1, %v5587_v0  ;;  %v5579_v16 = vadd.f32 %v9763_v9, %v5578_v44  ;;  %v11249_v0 = vld [vmem:[#allocation5 + $0x90] sm:$0xff]  }
0x1482   :  { %v9776_v45 = vpop.f32.mrf.mxu0  ;;  %v10574_v46 = vpop.f32.mrf.mxu1  ;;  %v11258_v9 = vld [vmem:[#allocation2 + $0x930] sm:$0xff]  }
0x1483   :  { %v5590_v58 = vadd.f32 %v10574_v46, %v9772_v52  ;;  %v5630_v25 = vadd.f32 %v9076_v10, %v5617_v15  ;;  %v5615_v26 = vmul.f32 %v9075_v1, %v5579_v16  ;;  %v11237_v52 = vld [vmem:[#allocation5 + $0x30] sm:$0xff]   ;;  %v11264_v15 = vld [vmem:[#allocation2 + $0x918] sm:$0xff]  }
0x1484   :  { %v9777_v47 = vpop.f32.mrf.mxu0  ;;  %v5581_v48 = vpop.f32.mrf.mxu1  ;;  %v11265_v16 = vld [vmem:[#allocation2 + $0x950] sm:$0xff]  }
0x1485   :  { %v9778_v61 = vadd.f32 %v9777_v47, %v9776_v45  ;;  %v5618_v11 = vmul.f32 %v9075_v1, %v5590_v58  ;;  %v5582_v12 = vadd.f32 %v9766_v63, %v5581_v48  ;;  %v5646_v35 = vmul.f32 0.1, %v5630_v25  ;;  %v11232_v47 = vld [vmem:[#allocation5 + $0x8] sm:$0xff]   ;;  %v11233_v48 = vld [vmem:[#allocation5 + $0x10] sm:$0xff]   ;;  %v11243_v58 = vld [vmem:[#allocation5 + $0x60] sm:$0xff]  }
0x1486   :  { %v9779_v49 = vpop.f32.mrf.mxu0  ;;  %v10577_v50 = vpop.f32.mrf.mxu1  ;;  %v5628_v36 = vadd.f32 %v9076_v10, %v5615_v26  ;;  %vm5638_vm3 = vcmp.gt.f32.partialorder %v5630_v25, 0.0  ;;  %v11248_v63 = vld [vmem:[#allocation5 + $0x88] sm:$0xff]  }
0x1487   :  { %v5631_v20 = vadd.f32 %v9076_v10, %v5618_v11  ;;  %v5616_v21 = vmul.f32 %v9075_v1, %v5582_v12  ;;  %v5654_v42 = vsel %vm5638_vm3, %v5630_v25, %v5646_v35  ;;  %v11260_v11 = vld [vmem:[#allocation2 + $0x928] sm:$0xff]   ;;  %v11254_v12 = vld [vmem:[#allocation5 + $0xb8] sm:$0xff]  }
0x1488   :  { %v9780_v53 = vpop.f32.mrf.mxu0  ;;  %v5594_v54 = vpop.f32.mrf.mxu1  ;;  %v5644_v41 = vmul.f32 0.1, %v5628_v36  ;;  %vm5636_vm5 = vcmp.gt.f32.partialorder %v5628_v36, 0.0 }
0x1489   :  { %v9781_v55 = vadd.f32 %v9780_v53, %v9779_v49  ;;  %v5595_v56 = vadd.f32 %v9775_v51, %v5594_v54  ;;  %v5647_v29 = vmul.f32 0.1, %v5631_v20  ;;  %v5629_v30 = vadd.f32 %v9076_v10, %v5616_v21  ;;  %v11234_v49 = vld [vmem:[#allocation5 + $0x18] sm:$0xff]   ;;  %v11236_v51 = vld [vmem:[#allocation5 + $0x28] sm:$0xff]   ;;  %v11239_v54 = vld [vmem:[#allocation5 + $0x40] sm:$0xff]  }
0x148a   :  { %v9782_v59 = vpop.f32.mrf.mxu0  ;;  %v10578_v60 = vpop.f32.mrf.mxu1  ;;  %vm5639_vm2 = vcmp.gt.f32.partialorder %v5631_v20, 0.0  ;;  %v5652_v45 = vsel %vm5636_vm5, %v5628_v36, %v5644_v41  ;;  %v11238_v53 = vld [vmem:[#allocation5 + $0x38] sm:$0xff]   ;;  %v11270_v21 = vld [vmem:[#allocation2 + $0x900] sm:$0xff]  }
0x148b   :  { %v5603_v62 = vadd.f32 %v10577_v50, %v9781_v55  ;;  %v5619_v5 = vmul.f32 %v9075_v1, %v5595_v56  ;;  %v5655_v39 = vsel %vm5639_vm2, %v5631_v20, %v5647_v29  ;;  %v5645_v40 = vmul.f32 0.1, %v5629_v30  ;;  %v11235_v50 = vld [vmem:[#allocation5 + $0x20] sm:$0xff]   ;;  %v11240_v55 = vld [vmem:[#allocation5 + $0x48] sm:$0xff]   ;;  %v11241_v56 = vld [vmem:[#allocation5 + $0x50] sm:$0xff]  }
0x148c   :  { %v9783_v2 = vpop.f32.mrf.mxu0  ;;  %v5597_v3 = vpop.f32.mrf.mxu1  ;;  %vm5637_vm4 = vcmp.gt.f32.partialorder %v5629_v30, 0.0  ;;  %v5709_v43 = vpack.c.bf16 %v5655_v39, %v5654_v42  ;;  %v11269_v20 = vld [vmem:[#allocation2 + $0x940] sm:$0xff]  }
0x148d   :  { %v5621_v4 = vmul.f32 %v9075_v1, %v5603_v62  ;;  %v9784_v6 = vadd.f32 %v9783_v2, %v9782_v59  ;;  %v5598_v8 = vadd.f32 %v9778_v61, %v5597_v3  ;;  %v5632_v17 = vadd.f32 %v9076_v10, %v5619_v5  ;;  %v11244_v59 = vld [vmem:[#allocation5 + $0x68] sm:$0xff]   ;;  %v11246_v61 = vld [vmem:[#allocation5 + $0x78] sm:$0xff]   ;;  %v11247_v62 = vld [vmem:[#allocation5 + $0x80] sm:$0xff]  }
0x148e   :  { %v5653_v44 = vsel %vm5637_vm4, %v5629_v30, %v5645_v40  ;;  %v11251_v2 = vld [vmem:[#allocation5 + $0xa0] sm:$0xff]   ;;  %v11255_v3 = vld [vmem:[#allocation2 + $0x978] sm:$0xff]   ;;  %v11252_v5 = vld [vmem:[#allocation5 + $0xa8] sm:$0xff]  }
0x148f   :  { %v5634_v13 = vadd.f32 %v9076_v10, %v5621_v4  ;;  %v5606_v7 = vadd.f32 %v10578_v60, %v9784_v6  ;;  %v5620_v14 = vmul.f32 %v9075_v1, %v5598_v8  ;;  %v5648_v27 = vmul.f32 0.1, %v5632_v17  ;;  %v11245_v60 = vld [vmem:[#allocation5 + $0x70] sm:$0xff]   ;;  %v11256_v4 = vld [vmem:[#allocation2 + $0x938] sm:$0xff]   ;;  %9825 = vmatprep.subr.bf16.mxu1 %v11255_v3  ;;  %v11277_v3 = vld [vmem:[#allocation2 + $0x988] sm:$0xff]  }
0x1490   :  { %vm5640_vm1 = vcmp.gt.f32.partialorder %v5632_v17, 0.0  ;;  %v5708_v46 = vpack.c.bf16 %v5653_v44, %v5652_v45  ;;  %v11253_v6 = vld [vmem:[#allocation5 + $0xb0] sm:$0xff]   ;;  %9826 = vmatpush3.bf16.msra.mxu1 %v11256_v4 }
0x1491   :  { %v5622_v18 = vmul.f32 %v9075_v1, %v5606_v7  ;;  %v5633_v19 = vadd.f32 %v9076_v10, %v5620_v14  ;;  %v5650_v23 = vmul.f32 0.1, %v5634_v13  ;;  %vm5642_vm14 = vcmp.gt.f32.partialorder %v5634_v13, 0.0  ;;  %v11250_v1 = vld [vmem:[#allocation5 + $0x98] sm:$0xff]   ;;  %v11257_v8 = vld [vmem:[#allocation2 + $0x970] sm:$0xff]   ;;  %v11262_v7 = vld [vmem:[#allocation2 + $0x920] sm:$0xff]  }
0x1492   :  { %v5656_v37 = vsel %vm5640_vm1, %v5632_v17, %v5648_v27  ;;  %9827 = vmatprep.subr.bf16.mxu1 %v11257_v8  ;;  %v11263_v14 = vld [vmem:[#allocation2 + $0x958] sm:$0xff]   ;;  %v11266_v17 = vld [vmem:[#allocation2 + $0x910] sm:$0xff]  }
0x1493   :  { %v5635_v22 = vadd.f32 %v9076_v10, %v5622_v18  ;;  %v5649_v24 = vmul.f32 0.1, %v5633_v19  ;;  %vm5641_vm15 = vcmp.gt.f32.partialorder %v5633_v19, 0.0  ;;  %v5658_v31 = vsel %vm5642_vm14, %v5634_v13, %v5650_v23  ;;  %v11259_v10 = vld [vmem:[#allocation2 + $0x968] sm:$0xff]   ;;  %v11261_v13 = vld [vmem:[#allocation2 + $0x960] sm:$0xff]  }
0x1494   :  { %9828 = vmatpush3.bf16.msra.mxu1 %v11258_v9  ;;  %v11267_v18 = vld [vmem:[#allocation2 + $0x948] sm:$0xff]   ;;  %v11278_v9 = vld [vmem:[#allocation2 + $0x980] sm:$0xff]  }
0x1495   :  { %vm5643_vm0 = vcmp.gt.f32.partialorder %v5635_v22, 0.0  ;;  %v5651_v28 = vmul.f32 0.1, %v5635_v22  ;;  %v5657_v33 = vsel %vm5641_vm15, %v5633_v19, %v5649_v24  ;;  %9829 = vmatprep.subr.bf16.mxu1 %v11259_v10  ;;  %v11268_v19 = vld [vmem:[#allocation2 + $0x908] sm:$0xff]  }
0x1496   :  { %v5710_v38 = vpack.c.bf16 %v5657_v33, %v5656_v37 }
0x1497   :  { %v5659_v32 = vsel %vm5643_vm0, %v5635_v22, %v5651_v28  ;;  %v11271_v22 = vld [vmem:[#allocation2 + $0x9b8] sm:$0xff]  }
0x1498   :  { %v5711_v34 = vpack.c.bf16 %v5659_v32, %v5658_v31  ;;  %9830 = vmatpush3.bf16.msra.mxu1 %v11260_v11 }
0x1499   :  { %9831 = vmatprep.subr.bf16.mxu1 %v11261_v13 }
0x149a   :  { %10579 = vmatprep.subr.bf16.mxu0 %v5711_v34 }
0x149b   :  { %10580 = vmatpush3.bf16.msra.mxu0 %v5711_v34 }
0x149c   :  { %10581 = vmatprep.subr.bf16.mxu0 %v5710_v38  ;;  %9832 = vmatpush3.bf16.msra.mxu1 %v11262_v7 }
0x149d   :  { %9833 = vmatprep.subr.bf16.mxu1 %v11263_v14 }
0x149f   :  { %10582 = vmatpush3.bf16.msra.mxu0 %v5710_v38 }
0x14a0   :  { %10583 = vmatprep.subr.bf16.mxu0 %v5709_v43  ;;  %9834 = vmatpush3.bf16.msra.mxu1 %v11264_v15 }
0x14a1   :  { %9835 = vmatprep.subr.bf16.mxu1 %v11265_v16 }
0x14a3   :  { %10584 = vmatpush3.bf16.msra.mxu0 %v5709_v43 }
0x14a4   :  { %10585 = vmatprep.subr.bf16.mxu0 %v5708_v46  ;;  %9836 = vmatpush3.bf16.msra.mxu1 %v11266_v17 }
0x14a5   :  { %9837 = vmatprep.subr.bf16.mxu1 %v11267_v18 }
0x14a7   :  { %10586 = vmatpush3.bf16.msra.mxu0 %v5708_v46 }
0x14a8   :  { %9838 = vmatpush3.bf16.msra.mxu1 %v11268_v19 }
0x14a9   :  { %9839 = vmatprep.subr.bf16.mxu1 %v11269_v20 }
0x14aa   :  { %10588 = vmatmul.mubr.msk.bf16.vlgmr.msra.gmra.mxu0 %vm4468_vm12, %v11232_v47  ;;  %v11272_v47 = vld [vmem:[#allocation2 + $0x9b0] sm:$0xff]  }
0x14ab   :  { %10591 = vmatprep.mubr.msk.bf16.mxu0 %vm4468_vm12, %v11233_v48 }
0x14ac   :  { %9840 = vmatpush3.bf16.msra.mxu1 %v11270_v21 }
0x14ad   :  { %10635 = vmatprep.subr.bf16.mxu1 %v11271_v22 }
0x14b2   :  { %10592 = vmatmul.mubr.msk.bf16.gmra.mxu0 %vm4468_vm12, %v11234_v49 }
0x14b3   :  { %10595 = vmatprep.mubr.msk.bf16.mxu0 %vm4468_vm12, %v11235_v50 }
0x14ba   :  { %10596 = vmatmul.mubr.msk.bf16.gmra.mxu0 %vm4468_vm12, %v11236_v51  ;;  %v11273_v51 = vld [vmem:[#allocation2 + $0x9a8] sm:$0xff]  }
0x14bb   :  { %10599 = vmatprep.mubr.msk.bf16.mxu0 %vm4468_vm12, %v11237_v52 }
0x14c2   :  { %10600 = vmatmul.mubr.msk.bf16.gmra.mxu0 %vm4468_vm12, %v11238_v53 }
0x14c3   :  { %10603 = vmatprep.mubr.msk.bf16.mxu0 %vm4468_vm12, %v11239_v54 }
0x14ca   :  { %10604 = vmatmul.mubr.msk.bf16.gmra.mxu0 %vm4468_vm12, %v11240_v55 }
0x14cb   :  { %10607 = vmatprep.mubr.msk.bf16.mxu0 %vm4468_vm12, %v11241_v56  ;;  %v11274_v56 = vld [vmem:[#allocation2 + $0x9a0] sm:$0xff]  }
0x14d2   :  { %10608 = vmatmul.mubr.msk.bf16.gmra.mxu0 %vm4468_vm12, %v11242_v57 }
0x14d3   :  { %10611 = vmatprep.mubr.msk.bf16.mxu0 %vm4468_vm12, %v11243_v58 }
0x14da   :  { %10612 = vmatmul.mubr.msk.bf16.gmra.mxu0 %vm4468_vm12, %v11244_v59  ;;  %v11275_v59 = vld [vmem:[#allocation2 + $0x998] sm:$0xff]  }
0x14db   :  { %10615 = vmatprep.mubr.msk.bf16.mxu0 %vm4468_vm12, %v11245_v60 }
0x14e2   :  { %10616 = vmatmul.mubr.msk.bf16.gmra.mxu0 %vm4468_vm12, %v11246_v61 }
0x14e3   :  { %10619 = vmatprep.mubr.msk.bf16.mxu0 %vm4468_vm12, %v11247_v62 }
0x14ea   :  { %10620 = vmatmul.mubr.msk.bf16.gmra.mxu0 %vm4468_vm12, %v11248_v63  ;;  %v11276_v63 = vld [vmem:[#allocation2 + $0x990] sm:$0xff]  }
0x14eb   :  { %10623 = vmatprep.mubr.msk.bf16.mxu0 %vm4468_vm12, %v11249_v0 }
0x14f2   :  { %10624 = vmatmul.mubr.msk.bf16.gmra.mxu0 %vm4468_vm12, %v11250_v1 }
0x14f3   :  { %10627 = vmatprep.mubr.msk.bf16.mxu0 %vm4468_vm12, %v11251_v2 }
0x14fa   :  { %10628 = vmatmul.mubr.msk.bf16.gmra.mxu0 %vm4468_vm12, %v11252_v5 }
0x14fb   :  { %10631 = vmatprep.mubr.msk.bf16.mxu0 %vm4468_vm12, %v11253_v6 }
0x1502   :  { %10632 = vmatmul.mubr.msk.bf16.gmra.mxu0 %vm4468_vm12, %v11254_v12 }
0x156a   :  { %v10589_v23 = vpop.f32.mrf.mxu0 }
0x156c   :  { %v5938_v24 = vpop.f32.mrf.mxu0 }
0x156e   :  { %v10590_v25 = vpop.f32.mrf.mxu0 }
0x156f   :  { %v6132_v54 = vpack.c.bf16 %v10590_v25, %v10589_v23 }
0x1570   :  { %v5941_v26 = vpop.f32.mrf.mxu0 }
0x1571   :  { %v6129_v45 = vpack.c.bf16 %v5941_v26, %v5938_v24 }
0x1572   :  { %v11948_v27 = vpop.f32.mrf.mxu0 }
0x1574   :  { %v5954_v28 = vpop.f32.mrf.mxu0 }
0x1576   :  { %v11950_v29 = vpop.f32.mrf.mxu0 }
0x1577   :  { %v6138_v6 = vpack.c.bf16 %v11950_v29, %v11948_v27 }
0x1578   :  { %v5957_v30 = vpop.f32.mrf.mxu0 }
0x1579   :  { %v6135_v61 = vpack.c.bf16 %v5957_v30, %v5954_v28 }
0x157a   :  { %v11952_v31 = vpop.f32.mrf.mxu0 }
0x157c   :  { %v11954_v32 = vpop.f32.mrf.mxu0 }
0x157e   :  { %v11956_v33 = vpop.f32.mrf.mxu0 }
0x157f   :  { %v6144_v17 = vpack.c.bf16 %v11956_v33, %v11952_v31 }
0x1580   :  { %v11958_v34 = vpop.f32.mrf.mxu0 }
0x1581   :  { %v6141_v13 = vpack.c.bf16 %v11958_v34, %v11954_v32 }
0x1582   :  { %v11960_v35 = vpop.f32.mrf.mxu0 }
0x1584   :  { %v11962_v36 = vpop.f32.mrf.mxu0 }
0x1586   :  { %v11964_v37 = vpop.f32.mrf.mxu0 }
0x1587   :  { %v6150_v38 = vpack.c.bf16 %v11964_v37, %v11960_v35 }
0x1588   :  { %v11968_v39 = vpop.f32.mrf.mxu0 }
0x1589   :  { %v6147_v20 = vpack.c.bf16 %v11968_v39, %v11962_v36 }
0x158a   :  { %v10605_v40 = vpop.f32.mrf.mxu0 }
0x158c   :  { %v6002_v41 = vpop.f32.mrf.mxu0 }
0x158e   :  { %v10606_v42 = vpop.f32.mrf.mxu0 }
0x158f   :  { %v6133_v48 = vpack.c.bf16 %v10606_v42, %v10605_v40  ;;  %v11279_v42 = vld [vmem:[#allocation5 + $0xc0] sm:$0xff]  }
0x1590   :  { %v6005_v43 = vpop.f32.mrf.mxu0  ;;  %10683 = vmatprep.mubr.bf16.mxu0 %v11279_v42 }
0x1591   :  { %v6130_v44 = vpack.c.bf16 %v6005_v43, %v6002_v41 }
0x1592   :  { %v10609_v46 = vpop.f32.mrf.mxu0 }
0x1593   :  { %6378 = vmatprep.mubr.bf16.mxu1 %v6130_v44 }
0x1594   :  { %6379 = vmatmul.mubr.bf16.vlgmr.msra.gmra.mxu1 %v6129_v45  ;;  %v6018_v49 = vpop.f32.mrf.mxu0 }
0x1595   :  { %6386 = vmatprep.mubr.bf16.mxu1 %v6133_v48  ;;  %10636 = vmatpush3.bf16.msra.mxu1 %v11271_v22 }
0x1596   :  { %v10610_v50 = vpop.f32.mrf.mxu0  ;;  %10637 = vmatprep.subr.bf16.mxu1 %v11272_v47 }
0x1597   :  { %v6139_v0 = vpack.c.bf16 %v10610_v50, %v10609_v46 }
0x1598   :  { %v6021_v52 = vpop.f32.mrf.mxu0 }
0x1599   :  { %v6136_v53 = vpack.c.bf16 %v6021_v52, %v6018_v49  ;;  %10638 = vmatpush3.bf16.msra.mxu1 %v11272_v47 }
0x159a   :  { %v10613_v55 = vpop.f32.mrf.mxu0  ;;  %10639 = vmatprep.subr.bf16.mxu1 %v11273_v51 }
0x159c   :  { %6387 = vmatmul.mubr.bf16.gmra.mxu1 %v6132_v54  ;;  %v6034_v57 = vpop.f32.mrf.mxu0 }
0x159d   :  { %6394 = vmatprep.mubr.bf16.mxu1 %v6136_v53  ;;  %10640 = vmatpush3.bf16.msra.mxu1 %v11273_v51 }
0x159e   :  { %v10614_v58 = vpop.f32.mrf.mxu0  ;;  %10641 = vmatprep.subr.bf16.mxu1 %v11274_v56 }
0x159f   :  { %v6145_v14 = vpack.c.bf16 %v10614_v58, %v10613_v55 }
0x15a0   :  { %v6037_v60 = vpop.f32.mrf.mxu0 }
0x15a1   :  { %10642 = vmatpush3.bf16.msra.mxu1 %v11274_v56  ;;  %v6142_v5 = vpack.c.bf16 %v6037_v60, %v6034_v57 }
0x15a2   :  { %v10617_v62 = vpop.f32.mrf.mxu0  ;;  %10643 = vmatprep.subr.bf16.mxu1 %v11275_v59 }
0x15a4   :  { %6395 = vmatmul.mubr.bf16.gmra.mxu1 %v6135_v61  ;;  %v6050_v1 = vpop.f32.mrf.mxu0 }
0x15a5   :  { %6402 = vmatprep.mubr.bf16.mxu1 %v6139_v0  ;;  %10644 = vmatpush3.bf16.msra.mxu1 %v11275_v59 }
0x15a6   :  { %v10618_v2 = vpop.f32.mrf.mxu0  ;;  %10645 = vmatprep.subr.bf16.mxu1 %v11276_v63 }
0x15a7   :  { %v6151_v22 = vpack.c.bf16 %v10618_v2, %v10617_v62 }
0x15a8   :  { %v6053_v4 = vpop.f32.mrf.mxu0 }
0x15a9   :  { %10646 = vmatpush3.bf16.msra.mxu1 %v11276_v63  ;;  %v6148_v16 = vpack.c.bf16 %v6053_v4, %v6050_v1 }
0x15aa   :  { %v10621_v8 = vpop.f32.mrf.mxu0  ;;  %10647 = vmatprep.subr.bf16.mxu1 %v11277_v3 }
0x15ac   :  { %6403 = vmatmul.mubr.bf16.gmra.mxu1 %v6138_v6  ;;  %v6066_v10 = vpop.f32.mrf.mxu0 }
0x15ad   :  { %6410 = vmatprep.mubr.bf16.mxu1 %v6142_v5  ;;  %10648 = vmatpush3.bf16.msra.mxu1 %v11277_v3 }
0x15ae   :  { %v10622_v11 = vpop.f32.mrf.mxu0  ;;  %10649 = vmatprep.subr.bf16.mxu1 %v11278_v9 }
0x15af   :  { %v6134_v28 = vpack.c.bf16 %v10622_v11, %v10621_v8 }
0x15b0   :  { %v6069_v12 = vpop.f32.mrf.mxu0 }
0x15b1   :  { %10650 = vmatpush3.bf16.msra.mxu1 %v11278_v9  ;;  %v6131_v24 = vpack.c.bf16 %v6069_v12, %v6066_v10 }
0x15b2   :  { %v10625_v7 = vpop.f32.mrf.mxu0 }
0x15b4   :  { %6411 = vmatmul.mubr.bf16.gmra.mxu1 %v6141_v13  ;;  %v6082_v15 = vpop.f32.mrf.mxu0 }
0x15b5   :  { %6418 = vmatprep.mubr.bf16.mxu1 %v6145_v14 }
0x15b6   :  { %v10626_v18 = vpop.f32.mrf.mxu0 }
0x15b7   :  { %v6140_v32 = vpack.c.bf16 %v10626_v18, %v10625_v7  ;;  %v12011_v7 = vld [vmem:[#allocation7 + $0x18] ss:$0 sm:$0xff]  ;;  %v12014_v18 = vld [vmem:[#allocation7 + $0x19] ss:$0 sm:$0xff] }
0x15b8   :  { %v6085_v19 = vpop.f32.mrf.mxu0 }
0x15b9   :  { %v6137_v27 = vpack.c.bf16 %v6085_v19, %v6082_v15 }
0x15ba   :  { %v10629_v21 = vpop.f32.mrf.mxu0 }
0x15bc   :  { %6419 = vmatmul.mubr.bf16.gmra.mxu1 %v6144_v17  ;;  %v6098_v23 = vpop.f32.mrf.mxu0 }
0x15bd   :  { %6426 = vmatprep.mubr.bf16.mxu1 %v6148_v16 }
0x15be   :  { %v10630_v25 = vpop.f32.mrf.mxu0 }
0x15bf   :  { %v6146_v39 = vpack.c.bf16 %v10630_v25, %v10629_v21 }
0x15c0   :  { %v6101_v26 = vpop.f32.mrf.mxu0 }
0x15c1   :  { %v6143_v31 = vpack.c.bf16 %v6101_v26, %v6098_v23 }
0x15c2   :  { %v10633_v29 = vpop.f32.mrf.mxu0 }
0x15c4   :  { %6427 = vmatmul.mubr.bf16.gmra.mxu1 %v6147_v20  ;;  %v6114_v30 = vpop.f32.mrf.mxu0 }
0x15c5   :  { %6434 = vmatprep.mubr.bf16.mxu1 %v6151_v22 }
0x15c6   :  { %v10634_v33 = vpop.f32.mrf.mxu0 }
0x15c7   :  { %v6152_v35 = vpack.c.bf16 %v10634_v33, %v10633_v29 }
0x15c8   :  { %v6117_v34 = vpop.f32.mrf.mxu0 }
0x15c9   :  { %v6149_v36 = vpack.c.bf16 %v6117_v34, %v6114_v30 }
0x15cc   :  { %6435 = vmatmul.mubr.bf16.gmra.mxu1 %v6150_v38 }
0x15cd   :  { %10651 = vmatprep.mubr.bf16.mxu1 %v6131_v24 }
0x15d4   :  { %10652 = vmatmul.mubr.bf16.vlgmr.msra.gmra.mxu1 %v6134_v28 }
0x15d5   :  { %10655 = vmatprep.mubr.bf16.mxu1 %v6137_v27 }
0x15dc   :  { %10656 = vmatmul.mubr.bf16.gmra.mxu1 %v6140_v32 }
0x15dd   :  { %10659 = vmatprep.mubr.bf16.mxu1 %v6143_v31 }
0x15e4   :  { %10660 = vmatmul.mubr.bf16.gmra.mxu1 %v6146_v39 }
0x15e5   :  { %10663 = vmatprep.mubr.bf16.mxu1 %v6149_v36 }
0x15ec   :  { %10664 = vmatmul.mubr.bf16.gmra.mxu1 %v6152_v35 }
0x1654   :  { %v9841_v37 = vpop.f32.mrf.mxu1 }
0x1656   :  { %v9842_v38 = vpop.f32.mrf.mxu1 }
0x1657   :  { %v9843_v40 = vadd.f32 %v9842_v38, %v9841_v37 }
0x1658   :  { %v9844_v41 = vpop.f32.mrf.mxu1 }
0x165a   :  { %v9845_v43 = vpop.f32.mrf.mxu1 }
0x165b   :  { %v9846_v21 = vadd.f32 %v9845_v43, %v9844_v41 }
0x165c   :  { %v9847_v44 = vpop.f32.mrf.mxu1 }
0x165e   :  { %v9848_v45 = vpop.f32.mrf.mxu1 }
0x165f   :  { %v9849_v46 = vadd.f32 %v9848_v45, %v9847_v44 }
0x1660   :  { %v9850_v47 = vpop.f32.mrf.mxu1 }
0x1662   :  { %v9851_v48 = vpop.f32.mrf.mxu1 }
0x1663   :  { %v9852_v16 = vadd.f32 %v9851_v48, %v9850_v47 }
0x1664   :  { %v9853_v49 = vpop.f32.mrf.mxu1 }
0x1666   :  { %v9854_v50 = vpop.f32.mrf.mxu1 }
0x1667   :  { %v9855_v51 = vadd.f32 %v9854_v50, %v9853_v49 }
0x1668   :  { %v9856_v52 = vpop.f32.mrf.mxu1 }
0x166a   :  { %v9857_v53 = vpop.f32.mrf.mxu1 }
0x166c   :  { %v9859_v54 = vpop.f32.mrf.mxu1 }
0x166e   :  { %v9860_v55 = vpop.f32.mrf.mxu1 }
0x166f   :  { %v9861_v56 = vadd.f32 %v9860_v55, %v9859_v54 }
0x1670   :  { %v9862_v57 = vpop.f32.mrf.mxu1 }
0x1672   :  { %v9863_v58 = vpop.f32.mrf.mxu1 }
0x1673   :  { %v9864_v33 = vadd.f32 %v9863_v58, %v9862_v57 }
0x1674   :  { %v9865_v59 = vpop.f32.mrf.mxu1 }
0x1676   :  { %v9866_v60 = vpop.f32.mrf.mxu1 }
0x1677   :  { %v11981_v61 = vadd.f32 %v9866_v60, %v9865_v59 }
0x1678   :  { %v11983_v62 = vpop.f32.mrf.mxu1 }
0x167a   :  { %v11985_v63 = vpop.f32.mrf.mxu1 }
0x167c   :  { %v11987_v0 = vpop.f32.mrf.mxu1 }
0x167e   :  { %v11989_v1 = vpop.f32.mrf.mxu1 }
0x1680   :  { %v11991_v2 = vpop.f32.mrf.mxu1 }
0x1682   :  { %v11993_v3 = vpop.f32.mrf.mxu1 }
0x1684   :  { %v11995_v4 = vpop.f32.mrf.mxu1 }
0x1686   :  { %v11997_v5 = vpop.f32.mrf.mxu1 }
0x1688   :  { %v11999_v6 = vpop.f32.mrf.mxu1 }
0x168a   :  { %v12001_v8 = vpop.f32.mrf.mxu1 }
0x168c   :  { %v12003_v9 = vpop.f32.mrf.mxu1 }
0x168e   :  { %v12005_v10 = vpop.f32.mrf.mxu1 }
0x1690   :  { %v12007_v11 = vpop.f32.mrf.mxu1 }
0x1692   :  { %v12009_v12 = vpop.f32.mrf.mxu1 }
0x1694   :  { %v10653_v13 = vpop.f32.mrf.mxu1 }
0x1695   :  { %v6486_v14 = vadd.f32 %v10653_v13, %v9849_v46 }
0x1696   :  { %v6477_v15 = vpop.f32.mrf.mxu1 }
0x1697   :  { %v6548_v17 = vmul.f32 %v12011_v7, %v6486_v14  ;;  %v6478_v19 = vadd.f32 %v9843_v40, %v6477_v15  ;;  %v9858_v40 = vadd.f32 %v9857_v53, %v9856_v52 }
0x1698   :  { %v10654_v20 = vpop.f32.mrf.mxu1 }
0x1699   :  { %v6546_v22 = vmul.f32 %v12011_v7, %v6478_v19  ;;  %v6489_v23 = vadd.f32 %v10654_v20, %v9852_v16  ;;  %v6569_v24 = vadd.f32 %v12014_v18, %v6548_v17  ;;  %v9870_v19 = vadd.f32 %v11985_v63, %v11983_v62 }
0x169a   :  { %v6480_v25 = vpop.f32.mrf.mxu1 }
0x169b   :  { %v6549_v26 = vmul.f32 %v12011_v7, %v6489_v23  ;;  %v6481_v27 = vadd.f32 %v9846_v21, %v6480_v25  ;;  %v6567_v29 = vadd.f32 %v12014_v18, %v6546_v22  ;;  %v6601_v34 = vmul.f32 0.1, %v6569_v24 }
0x169c   :  { %v10657_v28 = vpop.f32.mrf.mxu1  ;;  %vm6585_vm12 = vcmp.gt.f32.partialorder %v6569_v24, 0.0  ;;  %v9876_v23 = vadd.f32 %v11993_v3, %v11991_v2  ;;  %v9879_v2 = vadd.f32 %v11997_v5, %v11995_v4 }
0x169d   :  { %v6570_v30 = vadd.f32 %v12014_v18, %v6549_v26  ;;  %v6547_v31 = vmul.f32 %v12011_v7, %v6481_v27  ;;  %v6502_v32 = vadd.f32 %v10657_v28, %v9861_v56  ;;  %v6599_v42 = vmul.f32 0.1, %v6567_v29 }
0x169e   :  { %v6493_v36 = vpop.f32.mrf.mxu1  ;;  %vm6583_vm7 = vcmp.gt.f32.partialorder %v6567_v29, 0.0  ;;  %v6617_v54 = vsel %vm6585_vm12, %v6569_v24, %v6601_v34  ;;  %v9885_v26 = vadd.f32 %v12005_v10, %v12003_v9  ;;  %v9888_v9 = vadd.f32 %v12009_v12, %v12007_v11 }
0x169f   :  { %v6602_v39 = vmul.f32 0.1, %v6570_v30  ;;  %v6568_v35 = vadd.f32 %v12014_v18, %v6547_v31  ;;  %v6552_v37 = vmul.f32 %v12011_v7, %v6502_v32  ;;  %v6494_v38 = vadd.f32 %v9855_v51, %v6493_v36 }
0x16a0   :  { %v10658_v41 = vpop.f32.mrf.mxu1  ;;  %vm6586_vm6 = vcmp.gt.f32.partialorder %v6570_v30, 0.0  ;;  %v6615_v58 = vsel %vm6583_vm7, %v6567_v29, %v6599_v42 }
0x16a1   :  { %v6600_v43 = vmul.f32 0.1, %v6568_v35  ;;  %v6550_v44 = vmul.f32 %v12011_v7, %v6494_v38  ;;  %v6505_v45 = vadd.f32 %v10658_v41, %v9864_v33  ;;  %v6618_v47 = vsel %vm6586_vm6, %v6570_v30, %v6602_v39 }
0x16a2   :  { %v6496_v46 = vpop.f32.mrf.mxu1  ;;  %vm6584_vm8 = vcmp.gt.f32.partialorder %v6568_v35, 0.0  ;;  %v6573_v48 = vadd.f32 %v12014_v18, %v6552_v37  ;;  %v12027_v52 = vpack.c.bf16 %v6618_v47, %v6617_v54 }
0x16a3   :  { %v6553_v49 = vmul.f32 %v12011_v7, %v6505_v45  ;;  %v6497_v50 = vadd.f32 %v9858_v40, %v6496_v46  ;;  %v6616_v53 = vsel %vm6584_vm8, %v6568_v35, %v6600_v43  ;;  %v6571_v55 = vadd.f32 %v12014_v18, %v6550_v44 }
0x16a4   :  { %v10661_v51 = vpop.f32.mrf.mxu1  ;;  %v12032_v60 = vpack.c.bf16 %v6616_v53, %v6615_v58  ;;  %v6605_v13 = vmul.f32 0.1, %v6573_v48  ;;  %vm6589_vm9 = vcmp.gt.f32.partialorder %v6573_v48, 0.0  ;;  %v9882_v35 = vadd.f32 %v12001_v8, %v11999_v6 }
0x16a5   :  { %v6574_v56 = vadd.f32 %v12014_v18, %v6553_v49  ;;  %v6551_v57 = vmul.f32 %v12011_v7, %v6497_v50  ;;  %v6603_v20 = vmul.f32 0.1, %v6571_v55  ;;  %vm6587_vm11 = vcmp.gt.f32.partialorder %v6571_v55, 0.0 }
0x16a6   :  { %v6509_v59 = vpop.f32.mrf.mxu1  ;;  %v6621_v28 = vsel %vm6589_vm9, %v6573_v48, %v6605_v13 }
0x16a7   :  { %v6606_v14 = vmul.f32 0.1, %v6574_v56  ;;  %v6572_v15 = vadd.f32 %v12014_v18, %v6551_v57  ;;  %v6510_v16 = vadd.f32 %v11981_v61, %v6509_v59  ;;  %vm6590_vm10 = vcmp.gt.f32.partialorder %v6574_v56, 0.0 }
0x16a8   :  { %v10662_v17 = vpop.f32.mrf.mxu1  ;;  %v9873_v61 = vadd.f32 %v11989_v1, %v11987_v0  ;;  %v6619_v33 = vsel %vm6587_vm11, %v6571_v55, %v6603_v20  ;;  %v11280_v20 = vld [vmem:[#allocation5 + $0xc8] sm:$0xff]  }
0x16a9   :  { %v6604_v21 = vmul.f32 0.1, %v6572_v15  ;;  %v6554_v22 = vmul.f32 %v12011_v7, %v6510_v16  ;;  %v6622_v25 = vsel %vm6590_vm10, %v6574_v56, %v6606_v14  ;;  %vm6588_vm13 = vcmp.gt.f32.partialorder %v6572_v15, 0.0 }
0x16aa   :  { %v6512_v24 = vpop.f32.mrf.mxu1  ;;  %v6521_v63 = vadd.f32 %v10662_v17, %v9876_v23  ;;  %v12046_v30 = vpack.c.bf16 %v6622_v25, %v6621_v28  ;;  %v6518_v0 = vadd.f32 %v10661_v51, %v9873_v61  ;;  %v11283_v23 = vld [vmem:[#allocation5 + $0xe0] sm:$0xff]   ;;  %v11285_v25 = vld [vmem:[#allocation5 + $0xf0] sm:$0xff]   ;;  %v11286_v61 = vld [vmem:[#allocation5 + $0xf8] sm:$0xff]  }
0x16ab   :  { %v6513_v27 = vadd.f32 %v9870_v19, %v6512_v24  ;;  %v6575_v62 = vadd.f32 %v12014_v18, %v6554_v22  ;;  %v6620_v31 = vsel %vm6588_vm13, %v6572_v15, %v6604_v21  ;;  %v11281_v21 = vld [vmem:[#allocation5 + $0xd0] sm:$0xff]   ;;  %v11282_v22 = vld [vmem:[#allocation5 + $0xd8] sm:$0xff]   ;;  %v11284_v24 = vld [vmem:[#allocation5 + $0xe8] sm:$0xff]  }
0x16ac   :  { %v10665_v29 = vpop.f32.mrf.mxu1  ;;  %v6682_v34 = vpack.c.bf16 %v6620_v31, %v6619_v33  ;;  %v6557_v4 = vmul.f32 %v12011_v7, %v6521_v63  ;;  %v6556_v11 = vmul.f32 %v12011_v7, %v6518_v0  ;;  %v11291_v28 = vld [vmem:[#allocation5 + $0x120] sm:$0xff]   ;;  %v11293_v63 = vld [vmem:[#allocation5 + $0x130] sm:$0xff]   ;;  %v11296_v31 = vld [vmem:[#allocation5 + $0x148] sm:$0xff]  }
0x16ad   :  { %v6555_v3 = vmul.f32 %v12011_v7, %v6513_v27  ;;  %v6534_v32 = vadd.f32 %v10665_v29, %v9885_v26  ;;  %v6607_v37 = vmul.f32 0.1, %v6575_v62  ;;  %vm6591_vm14 = vcmp.gt.f32.partialorder %v6575_v62, 0.0  ;;  %v11287_v26 = vld [vmem:[#allocation5 + $0x100] sm:$0xff]   ;;  %v11289_v27 = vld [vmem:[#allocation5 + $0x110] sm:$0xff]   ;;  %v11294_v29 = vld [vmem:[#allocation5 + $0x138] sm:$0xff]  }
0x16ae   :  { %v6525_v1 = vpop.f32.mrf.mxu1  ;;  %v6578_v8 = vadd.f32 %v12014_v18, %v6557_v4  ;;  %v6577_v50 = vadd.f32 %v12014_v18, %v6556_v11  ;;  %v11303_v33 = vld [vmem:[#allocation2 + $0xa38] sm:$0xff]   ;;  %v11310_v4 = vld [vmem:[#allocation2 + $0x9e0] sm:$0xff]   ;;  %v11316_v11 = vld [vmem:[#allocation2 + $0x9c8] sm:$0xff]  }
0x16af   :  { %v6576_v10 = vadd.f32 %v12014_v18, %v6555_v3  ;;  %v6560_v36 = vmul.f32 %v12011_v7, %v6534_v32  ;;  %v6526_v39 = vadd.f32 %v9879_v2, %v6525_v1  ;;  %v6623_v49 = vsel %vm6591_vm14, %v6575_v62, %v6607_v37  ;;  %v11292_v62 = vld [vmem:[#allocation5 + $0x128] sm:$0xff]   ;;  %v11297_v2 = vld [vmem:[#allocation5 + $0x150] sm:$0xff]   ;;  %v11298_v3 = vld [vmem:[#allocation5 + $0x158] sm:$0xff]   ;;  %9937 = vmatprep.subr.bf16.mxu1 %v11303_v33 }
0x16b0   :  { %v10666_v5 = vpop.f32.mrf.mxu1  ;;  %v6610_v56 = vmul.f32 0.1, %v6578_v8  ;;  %vm6594_vm4 = vcmp.gt.f32.partialorder %v6578_v8, 0.0  ;;  %v6609_v14 = vmul.f32 0.1, %v6577_v50  ;;  %vm6593_vm5 = vcmp.gt.f32.partialorder %v6577_v50, 0.0 }
0x16b1   :  { %v6608_v38 = vmul.f32 0.1, %v6576_v10  ;;  %v6581_v40 = vadd.f32 %v12014_v18, %v6560_v36  ;;  %v6558_v41 = vmul.f32 %v12011_v7, %v6526_v39  ;;  %v6537_v42 = vadd.f32 %v10666_v5, %v9888_v9  ;;  %v11299_v32 = vld [vmem:[#allocation5 + $0x160] sm:$0xff]   ;;  %v11304_v0 = vld [vmem:[#allocation2 + $0x9f8] sm:$0xff]   ;;  %v11300_v1 = vld [vmem:[#allocation5 + $0x168] sm:$0xff]  }
0x16b2   :  { %v6528_v12 = vpop.f32.mrf.mxu1  ;;  %vm6592_vm15 = vcmp.gt.f32.partialorder %v6576_v10, 0.0  ;;  %v6626_v17 = vsel %vm6594_vm4, %v6578_v8, %v6610_v56  ;;  %v6625_v19 = vsel %vm6593_vm5, %v6577_v50, %v6609_v14  ;;  %9938 = vmatpush3.bf16.msra.mxu1 %v11304_v0  ;;  %v11305_v9 = vld [vmem:[#allocation2 + $0xa30] sm:$0xff]   ;;  %v11307_v36 = vld [vmem:[#allocation2 + $0xa28] sm:$0xff]   ;;  %v11309_v37 = vld [vmem:[#allocation2 + $0xa20] sm:$0xff]  }
0x16b3   :  { %v6579_v43 = vadd.f32 %v12014_v18, %v6558_v41  ;;  %v6561_v44 = vmul.f32 %v12011_v7, %v6537_v42  ;;  %v6529_v6 = vadd.f32 %v9882_v35, %v6528_v12  ;;  %v6624_v45 = vsel %vm6592_vm15, %v6576_v10, %v6608_v38  ;;  %v11306_v10 = vld [vmem:[#allocation2 + $0x9f0] sm:$0xff]   ;;  %9939 = vmatprep.subr.bf16.mxu1 %v11305_v9  ;;  %v11308_v39 = vld [vmem:[#allocation2 + $0x9e8] sm:$0xff]   ;;  %v11302_v35 = vld [vmem:[#allocation5 + $0x178] sm:$0xff]  }
0x16b4   :  { %v6613_v46 = vmul.f32 0.1, %v6581_v40  ;;  %vm6597_vm0 = vcmp.gt.f32.partialorder %v6581_v40, 0.0  ;;  %v6684_v54 = vpack.c.bf16 %v6624_v45, %v6623_v49  ;;  %v11311_v5 = vld [vmem:[#allocation2 + $0xa18] sm:$0xff]   ;;  %v11314_v41 = vld [vmem:[#allocation2 + $0x9d0] sm:$0xff]   ;;  %v11315_v42 = vld [vmem:[#allocation2 + $0xa08] sm:$0xff]  }
0x16b5   :  { %v6582_v47 = vadd.f32 %v12014_v18, %v6561_v44  ;;  %v6559_v48 = vmul.f32 %v12011_v7, %v6529_v6  ;;  %v6611_v51 = vmul.f32 0.1, %v6579_v43  ;;  %vm6595_vm2 = vcmp.gt.f32.partialorder %v6579_v43, 0.0  ;;  %v11312_v38 = vld [vmem:[#allocation2 + $0x9d8] sm:$0xff]   ;;  %v11317_v12 = vld [vmem:[#allocation2 + $0xa00] sm:$0xff]   ;;  %v11325_v33 = vld [vmem:[#allocation2 + $0xa48] sm:$0xff]  }
0x16b6   :  { %v6629_v58 = vsel %vm6597_vm0, %v6581_v40, %v6613_v46  ;;  %9940 = vmatpush3.bf16.msra.mxu1 %v11306_v10  ;;  %v11313_v40 = vld [vmem:[#allocation2 + $0xa10] sm:$0xff]   ;;  %v11319_v44 = vld [vmem:[#allocation2 + $0xa78] sm:$0xff]   ;;  %v11326_v10 = vld [vmem:[#allocation2 + $0xa40] sm:$0xff]  }
0x16b7   :  { %v6614_v53 = vmul.f32 0.1, %v6582_v47  ;;  %v6580_v55 = vadd.f32 %v12014_v18, %v6559_v48  ;;  %vm6598_vm1 = vcmp.gt.f32.partialorder %v6582_v47, 0.0  ;;  %v6627_v7 = vsel %vm6595_vm2, %v6579_v43, %v6611_v51  ;;  %9941 = vmatprep.subr.bf16.mxu1 %v11307_v36  ;;  %v11318_v43 = vld [vmem:[#allocation2 + $0x9c0] sm:$0xff]  }
0x16b8   :  { %v6685_v18 = vpack.c.bf16 %v6626_v17, %v6625_v19 }
0x16b9   :  { %v6612_v57 = vmul.f32 0.1, %v6580_v55  ;;  %v6630_v59 = vsel %vm6598_vm1, %v6582_v47, %v6614_v53  ;;  %vm6596_vm3 = vcmp.gt.f32.partialorder %v6580_v55, 0.0 }
0x16ba   :  { %v6687_v13 = vpack.c.bf16 %v6630_v59, %v6629_v58  ;;  %9942 = vmatpush3.bf16.msra.mxu1 %v11308_v39 }
0x16bb   :  { %v6628_v15 = vsel %vm6596_vm3, %v6580_v55, %v6612_v57  ;;  %9943 = vmatprep.subr.bf16.mxu1 %v11309_v37 }
0x16bc   :  { %10667 = vmatprep.subr.bf16.mxu0 %v6687_v13  ;;  %v6686_v16 = vpack.c.bf16 %v6628_v15, %v6627_v7 }
0x16bd   :  { %10668 = vmatpush3.bf16.msra.mxu0 %v6687_v13 }
0x16be   :  { %10669 = vmatprep.subr.bf16.mxu0 %v6686_v16  ;;  %9944 = vmatpush3.bf16.msra.mxu1 %v11310_v4 }
0x16bf   :  { %9945 = vmatprep.subr.bf16.mxu1 %v11311_v5 }
0x16c1   :  { %10670 = vmatpush3.bf16.msra.mxu0 %v6686_v16 }
0x16c2   :  { %10671 = vmatprep.subr.bf16.mxu0 %v6685_v18  ;;  %9946 = vmatpush3.bf16.msra.mxu1 %v11312_v38 }
0x16c3   :  { %9947 = vmatprep.subr.bf16.mxu1 %v11313_v40 }
0x16c5   :  { %10672 = vmatpush3.bf16.msra.mxu0 %v6685_v18 }
0x16c6   :  { %10673 = vmatprep.subr.bf16.mxu0 %v6684_v54  ;;  %9948 = vmatpush3.bf16.msra.mxu1 %v11314_v41 }
0x16c7   :  { %9949 = vmatprep.subr.bf16.mxu1 %v11315_v42 }
0x16c9   :  { %10674 = vmatpush3.bf16.msra.mxu0 %v6684_v54 }
0x16ca   :  { %10675 = vmatprep.subr.bf16.mxu0 %v12046_v30  ;;  %9950 = vmatpush3.bf16.msra.mxu1 %v11316_v11 }
0x16cb   :  { %9951 = vmatprep.subr.bf16.mxu1 %v11317_v12 }
0x16cd   :  { %10676 = vmatpush3.bf16.msra.mxu0 %v12046_v30  ;;  %v11295_v30 = vld [vmem:[#allocation5 + $0x140] sm:$0xff]  }
0x16ce   :  { %10677 = vmatprep.subr.bf16.mxu0 %v6682_v34  ;;  %9952 = vmatpush3.bf16.msra.mxu1 %v11318_v43 }
0x16cf   :  { %10731 = vmatprep.subr.bf16.mxu1 %v11319_v44 }
0x16d1   :  { %10678 = vmatpush3.bf16.msra.mxu0 %v6682_v34  ;;  %v11301_v34 = vld [vmem:[#allocation5 + $0x170] sm:$0xff]  }
0x16d2   :  { %10679 = vmatprep.subr.bf16.mxu0 %v12027_v52 }
0x16d5   :  { %10680 = vmatpush3.bf16.msra.mxu0 %v12027_v52  ;;  %v11288_v52 = vld [vmem:[#allocation5 + $0x108] sm:$0xff]  }
0x16d6   :  { %10681 = vmatprep.subr.bf16.mxu0 %v12032_v60 }
0x16d9   :  { %10682 = vmatpush3.bf16.msra.mxu0 %v12032_v60  ;;  %v11290_v60 = vld [vmem:[#allocation5 + $0x118] sm:$0xff]  }
0x16dc   :  { %10684 = vmatmul.mubr.bf16.vlgmr.msra.gmra.mxu0 %v11280_v20  ;;  %v11320_v20 = vld [vmem:[#allocation2 + $0xa70] sm:$0xff]  }
0x16dd   :  { %10687 = vmatprep.mubr.bf16.mxu0 %v11281_v21 }
0x16e4   :  { %10688 = vmatmul.mubr.bf16.gmra.mxu0 %v11282_v22 }
0x16e5   :  { %10691 = vmatprep.mubr.bf16.mxu0 %v11283_v23 }
0x16ec   :  { %10692 = vmatmul.mubr.bf16.gmra.mxu0 %v11284_v24  ;;  %v11321_v24 = vld [vmem:[#allocation2 + $0xa68] sm:$0xff]  }
0x16ed   :  { %10695 = vmatprep.mubr.bf16.mxu0 %v11285_v25 }
0x16f4   :  { %10696 = vmatmul.mubr.bf16.gmra.mxu0 %v11286_v61 }
0x16f5   :  { %10699 = vmatprep.mubr.bf16.mxu0 %v11287_v26 }
0x16fc   :  { %10700 = vmatmul.mubr.bf16.gmra.mxu0 %v11288_v52 }
0x16fd   :  { %10703 = vmatprep.mubr.bf16.mxu0 %v11289_v27  ;;  %v11322_v27 = vld [vmem:[#allocation2 + $0xa60] sm:$0xff]  }
0x1704   :  { %10704 = vmatmul.mubr.bf16.gmra.mxu0 %v11290_v60 }
0x1705   :  { %10707 = vmatprep.mubr.bf16.mxu0 %v11291_v28 }
0x170c   :  { %10708 = vmatmul.mubr.bf16.gmra.mxu0 %v11292_v62  ;;  %v11323_v62 = vld [vmem:[#allocation2 + $0xa58] sm:$0xff]  }
0x170d   :  { %10711 = vmatprep.mubr.bf16.mxu0 %v11293_v63 }
0x1714   :  { %10712 = vmatmul.mubr.bf16.gmra.mxu0 %v11294_v29 }
0x1715   :  { %10715 = vmatprep.mubr.bf16.mxu0 %v11295_v30 }
0x171c   :  { %10716 = vmatmul.mubr.bf16.gmra.mxu0 %v11296_v31  ;;  %v11324_v31 = vld [vmem:[#allocation2 + $0xa50] sm:$0xff]  }
0x171d   :  { %10719 = vmatprep.mubr.bf16.mxu0 %v11297_v2 }
0x1724   :  { %10720 = vmatmul.mubr.bf16.gmra.mxu0 %v11298_v3 }
0x1725   :  { %10723 = vmatprep.mubr.bf16.mxu0 %v11299_v32 }
0x172c   :  { %10724 = vmatmul.mubr.bf16.gmra.mxu0 %v11300_v1 }
0x172d   :  { %10727 = vmatprep.mubr.bf16.mxu0 %v11301_v34 }
0x1734   :  { %10728 = vmatmul.mubr.bf16.gmra.mxu0 %v11302_v35 }
0x179c   :  { %v10685_v6 = vpop.f32.mrf.mxu0 }
0x179e   :  { %v6866_v8 = vpop.f32.mrf.mxu0 }
0x17a0   :  { %v10686_v45 = vpop.f32.mrf.mxu0 }
0x17a1   :  { %v7060_v26 = vpack.c.bf16 %v10686_v45, %v10685_v6 }
0x17a2   :  { %v6869_v46 = vpop.f32.mrf.mxu0 }
0x17a3   :  { %v7057_v19 = vpack.c.bf16 %v6869_v46, %v6866_v8 }
0x17a4   :  { %v12074_v47 = vpop.f32.mrf.mxu0 }
0x17a6   :  { %v6882_v48 = vpop.f32.mrf.mxu0 }
0x17a8   :  { %v12076_v49 = vpop.f32.mrf.mxu0 }
0x17a9   :  { %v7066_v34 = vpack.c.bf16 %v12076_v49, %v12074_v47 }
0x17aa   :  { %v6885_v50 = vpop.f32.mrf.mxu0 }
0x17ab   :  { %v7063_v29 = vpack.c.bf16 %v6885_v50, %v6882_v48 }
0x17ac   :  { %v12078_v54 = vpop.f32.mrf.mxu0 }
0x17ae   :  { %v12080_v51 = vpop.f32.mrf.mxu0 }
0x17b0   :  { %v12082_v53 = vpop.f32.mrf.mxu0 }
0x17b1   :  { %v7072_v41 = vpack.c.bf16 %v12082_v53, %v12078_v54 }
0x17b2   :  { %v12084_v55 = vpop.f32.mrf.mxu0 }
0x17b3   :  { %v7069_v37 = vpack.c.bf16 %v12084_v55, %v12080_v51 }
0x17b4   :  { %v12086_v56 = vpop.f32.mrf.mxu0 }
0x17b6   :  { %v12088_v57 = vpop.f32.mrf.mxu0 }
0x17b8   :  { %v12090_v58 = vpop.f32.mrf.mxu0 }
0x17b9   :  { %v7078_v59 = vpack.c.bf16 %v12090_v58, %v12086_v56 }
0x17ba   :  { %v12094_v13 = vpop.f32.mrf.mxu0 }
0x17bb   :  { %v7075_v12 = vpack.c.bf16 %v12094_v13, %v12088_v57 }
0x17bc   :  { %v10701_v14 = vpop.f32.mrf.mxu0 }
0x17be   :  { %v6930_v7 = vpop.f32.mrf.mxu0 }
0x17c0   :  { %v10702_v15 = vpop.f32.mrf.mxu0 }
0x17c1   :  { %v7061_v21 = vpack.c.bf16 %v10702_v15, %v10701_v14  ;;  %v11327_v15 = vld [vmem:[#allocation5 + $0x180] sm:$0xff]  }
0x17c2   :  { %v6933_v16 = vpop.f32.mrf.mxu0  ;;  %10779 = vmatprep.mubr.bf16.mxu0 %v11327_v15 }
0x17c3   :  { %v7058_v17 = vpack.c.bf16 %v6933_v16, %v6930_v7 }
0x17c4   :  { %v10705_v18 = vpop.f32.mrf.mxu0 }
0x17c5   :  { %7306 = vmatprep.mubr.bf16.mxu1 %v7058_v17 }
0x17c6   :  { %7307 = vmatmul.mubr.bf16.vlgmr.msra.gmra.mxu1 %v7057_v19  ;;  %v6946_v22 = vpop.f32.mrf.mxu0 }
0x17c7   :  { %7314 = vmatprep.mubr.bf16.mxu1 %v7061_v21  ;;  %10732 = vmatpush3.bf16.msra.mxu1 %v11319_v44 }
0x17c8   :  { %v10706_v23 = vpop.f32.mrf.mxu0  ;;  %10733 = vmatprep.subr.bf16.mxu1 %v11320_v20 }
0x17c9   :  { %v7067_v2 = vpack.c.bf16 %v10706_v23, %v10705_v18 }
0x17ca   :  { %v6949_v25 = vpop.f32.mrf.mxu0 }
0x17cb   :  { %v7064_v61 = vpack.c.bf16 %v6949_v25, %v6946_v22  ;;  %10734 = vmatpush3.bf16.msra.mxu1 %v11320_v20 }
0x17cc   :  { %v10709_v52 = vpop.f32.mrf.mxu0  ;;  %10735 = vmatprep.subr.bf16.mxu1 %v11321_v24 }
0x17ce   :  { %7315 = vmatmul.mubr.bf16.gmra.mxu1 %v7060_v26  ;;  %v6962_v60 = vpop.f32.mrf.mxu0 }
0x17cf   :  { %7322 = vmatprep.mubr.bf16.mxu1 %v7064_v61  ;;  %10736 = vmatpush3.bf16.msra.mxu1 %v11321_v24 }
0x17d0   :  { %v10710_v28 = vpop.f32.mrf.mxu0  ;;  %10737 = vmatprep.subr.bf16.mxu1 %v11322_v27 }
0x17d1   :  { %v7073_v5 = vpack.c.bf16 %v10710_v28, %v10709_v52 }
0x17d2   :  { %v6965_v63 = vpop.f32.mrf.mxu0 }
0x17d3   :  { %10738 = vmatpush3.bf16.msra.mxu1 %v11322_v27  ;;  %v7070_v1 = vpack.c.bf16 %v6965_v63, %v6962_v60 }
0x17d4   :  { %v10713_v30 = vpop.f32.mrf.mxu0  ;;  %10739 = vmatprep.subr.bf16.mxu1 %v11323_v62 }
0x17d6   :  { %7323 = vmatmul.mubr.bf16.gmra.mxu1 %v7063_v29  ;;  %v6978_v3 = vpop.f32.mrf.mxu0 }
0x17d7   :  { %7330 = vmatprep.mubr.bf16.mxu1 %v7067_v2  ;;  %10740 = vmatpush3.bf16.msra.mxu1 %v11323_v62 }
0x17d8   :  { %v10714_v32 = vpop.f32.mrf.mxu0  ;;  %10741 = vmatprep.subr.bf16.mxu1 %v11324_v31 }
0x17d9   :  { %v7079_v44 = vpack.c.bf16 %v10714_v32, %v10713_v30 }
0x17da   :  { %v6981_v0 = vpop.f32.mrf.mxu0 }
0x17db   :  { %10742 = vmatpush3.bf16.msra.mxu1 %v11324_v31  ;;  %v7076_v40 = vpack.c.bf16 %v6981_v0, %v6978_v3 }
0x17dc   :  { %v10717_v9 = vpop.f32.mrf.mxu0  ;;  %10743 = vmatprep.subr.bf16.mxu1 %v11325_v33 }
0x17de   :  { %7331 = vmatmul.mubr.bf16.gmra.mxu1 %v7066_v34  ;;  %v6994_v36 = vpop.f32.mrf.mxu0 }
0x17df   :  { %7338 = vmatprep.mubr.bf16.mxu1 %v7070_v1  ;;  %10744 = vmatpush3.bf16.msra.mxu1 %v11325_v33 }
0x17e0   :  { %v10718_v39 = vpop.f32.mrf.mxu0  ;;  %10745 = vmatprep.subr.bf16.mxu1 %v11326_v10 }
0x17e1   :  { %v7062_v48 = vpack.c.bf16 %v10718_v39, %v10717_v9 }
0x17e2   :  { %v6997_v35 = vpop.f32.mrf.mxu0 }
0x17e3   :  { %10746 = vmatpush3.bf16.msra.mxu1 %v11326_v10  ;;  %v7059_v8 = vpack.c.bf16 %v6997_v35, %v6994_v36 }
0x17e4   :  { %v10721_v4 = vpop.f32.mrf.mxu0 }
0x17e6   :  { %7339 = vmatmul.mubr.bf16.gmra.mxu1 %v7069_v37  ;;  %v7010_v38 = vpop.f32.mrf.mxu0 }
0x17e7   :  { %7346 = vmatprep.mubr.bf16.mxu1 %v7073_v5 }
0x17e8   :  { %v10722_v42 = vpop.f32.mrf.mxu0 }
0x17e9   :  { %v7068_v51 = vpack.c.bf16 %v10722_v42, %v10721_v4 }
0x17ea   :  { %v7013_v11 = vpop.f32.mrf.mxu0 }
0x17eb   :  { %v7065_v47 = vpack.c.bf16 %v7013_v11, %v7010_v38 }
0x17ec   :  { %v10725_v43 = vpop.f32.mrf.mxu0 }
0x17ee   :  { %7347 = vmatmul.mubr.bf16.gmra.mxu1 %v7072_v41  ;;  %v7026_v6 = vpop.f32.mrf.mxu0  ;;  %v12137_v41 = vld [vmem:[#allocation7 + $0x1a] ss:$0 sm:$0xff] }
0x17ef   :  { %7354 = vmatprep.mubr.bf16.mxu1 %v7076_v40 }
0x17f0   :  { %v10726_v45 = vpop.f32.mrf.mxu0 }
0x17f1   :  { %v7074_v13 = vpack.c.bf16 %v10726_v45, %v10725_v43  ;;  %v12140_v43 = vld [vmem:[#allocation7 + $0x1b] ss:$0 sm:$0xff] }
0x17f2   :  { %v7029_v46 = vpop.f32.mrf.mxu0 }
0x17f3   :  { %v7071_v54 = vpack.c.bf16 %v7029_v46, %v7026_v6 }
0x17f4   :  { %v10729_v49 = vpop.f32.mrf.mxu0 }
0x17f6   :  { %7355 = vmatmul.mubr.bf16.gmra.mxu1 %v7075_v12  ;;  %v7042_v50 = vpop.f32.mrf.mxu0 }
0x17f7   :  { %7362 = vmatprep.mubr.bf16.mxu1 %v7079_v44 }
0x17f8   :  { %v10730_v53 = vpop.f32.mrf.mxu0 }
0x17f9   :  { %v7080_v56 = vpack.c.bf16 %v10730_v53, %v10729_v49 }
0x17fa   :  { %v7045_v55 = vpop.f32.mrf.mxu0 }
0x17fb   :  { %v7077_v57 = vpack.c.bf16 %v7045_v55, %v7042_v50 }
0x17fe   :  { %7363 = vmatmul.mubr.bf16.gmra.mxu1 %v7078_v59 }
0x17ff   :  { %10747 = vmatprep.mubr.bf16.mxu1 %v7059_v8 }
0x1806   :  { %10748 = vmatmul.mubr.bf16.vlgmr.msra.gmra.mxu1 %v7062_v48 }
0x1807   :  { %10751 = vmatprep.mubr.bf16.mxu1 %v7065_v47 }
0x180e   :  { %10752 = vmatmul.mubr.bf16.gmra.mxu1 %v7068_v51 }
0x180f   :  { %10755 = vmatprep.mubr.bf16.mxu1 %v7071_v54 }
0x1816   :  { %10756 = vmatmul.mubr.bf16.gmra.mxu1 %v7074_v13 }
0x1817   :  { %10759 = vmatprep.mubr.bf16.mxu1 %v7077_v57 }
0x181e   :  { %10760 = vmatmul.mubr.bf16.gmra.mxu1 %v7080_v56 }
0x1886   :  { %v9953_v58 = vpop.f32.mrf.mxu1 }
0x1888   :  { %v9954_v59 = vpop.f32.mrf.mxu1 }
0x1889   :  { %v9955_v14 = vadd.f32 %v9954_v59, %v9953_v58 }
0x188a   :  { %v9956_v7 = vpop.f32.mrf.mxu1 }
0x188c   :  { %v9957_v16 = vpop.f32.mrf.mxu1 }
0x188d   :  { %v9958_v17 = vadd.f32 %v9957_v16, %v9956_v7 }
0x188e   :  { %v9959_v19 = vpop.f32.mrf.mxu1 }
0x1890   :  { %v9960_v18 = vpop.f32.mrf.mxu1 }
0x1891   :  { %v9961_v20 = vadd.f32 %v9960_v18, %v9959_v19 }
0x1892   :  { %v9962_v21 = vpop.f32.mrf.mxu1 }
0x1894   :  { %v9963_v22 = vpop.f32.mrf.mxu1 }
0x1895   :  { %v9964_v23 = vadd.f32 %v9963_v22, %v9962_v21 }
0x1896   :  { %v9965_v24 = vpop.f32.mrf.mxu1 }
0x1898   :  { %v9966_v25 = vpop.f32.mrf.mxu1 }
0x1899   :  { %v9967_v61 = vadd.f32 %v9966_v25, %v9965_v24 }
0x189a   :  { %v9968_v26 = vpop.f32.mrf.mxu1 }
0x189c   :  { %v9969_v52 = vpop.f32.mrf.mxu1 }
0x189d   :  { %v9970_v27 = vadd.f32 %v9969_v52, %v9968_v26 }
0x189e   :  { %v9971_v60 = vpop.f32.mrf.mxu1 }
0x18a0   :  { %v9972_v28 = vpop.f32.mrf.mxu1 }
0x18a1   :  { %v9973_v62 = vadd.f32 %v9972_v28, %v9971_v60 }
0x18a2   :  { %v9974_v63 = vpop.f32.mrf.mxu1 }
0x18a4   :  { %v9975_v29 = vpop.f32.mrf.mxu1 }
0x18a5   :  { %v9976_v30 = vadd.f32 %v9975_v29, %v9974_v63 }
0x18a6   :  { %v9977_v31 = vpop.f32.mrf.mxu1 }
0x18a8   :  { %v9978_v2 = vpop.f32.mrf.mxu1 }
0x18a9   :  { %v12107_v3 = vadd.f32 %v9978_v2, %v9977_v31 }
0x18aa   :  { %v12109_v32 = vpop.f32.mrf.mxu1 }
0x18ac   :  { %v12111_v33 = vpop.f32.mrf.mxu1 }
0x18ae   :  { %v12113_v0 = vpop.f32.mrf.mxu1 }
0x18b0   :  { %v12115_v1 = vpop.f32.mrf.mxu1 }
0x18b2   :  { %v12117_v34 = vpop.f32.mrf.mxu1 }
0x18b4   :  { %v12119_v9 = vpop.f32.mrf.mxu1 }
0x18b6   :  { %v12121_v10 = vpop.f32.mrf.mxu1 }
0x18b8   :  { %v12123_v36 = vpop.f32.mrf.mxu1 }
0x18ba   :  { %v12125_v39 = vpop.f32.mrf.mxu1 }
0x18bc   :  { %v12127_v35 = vpop.f32.mrf.mxu1 }
0x18be   :  { %v12129_v37 = vpop.f32.mrf.mxu1 }
0x18c0   :  { %v12131_v4 = vpop.f32.mrf.mxu1 }
0x18c2   :  { %v12133_v5 = vpop.f32.mrf.mxu1 }
0x18c4   :  { %v12135_v38 = vpop.f32.mrf.mxu1 }
0x18c6   :  { %v10749_v40 = vpop.f32.mrf.mxu1 }
0x18c7   :  { %v7414_v42 = vadd.f32 %v10749_v40, %v9961_v20 }
0x18c8   :  { %v7405_v11 = vpop.f32.mrf.mxu1 }
0x18c9   :  { %v7476_v12 = vmul.f32 %v12137_v41, %v7414_v42  ;;  %v7406_v44 = vadd.f32 %v9955_v14, %v7405_v11  ;;  %v9982_v42 = vadd.f32 %v12111_v33, %v12109_v32 }
0x18ca   :  { %v10750_v6 = vpop.f32.mrf.mxu1 }
0x18cb   :  { %v7474_v8 = vmul.f32 %v12137_v41, %v7406_v44  ;;  %v7417_v45 = vadd.f32 %v10750_v6, %v9964_v23  ;;  %v7497_v46 = vadd.f32 %v12140_v43, %v7476_v12  ;;  %v9988_v6 = vadd.f32 %v12119_v9, %v12117_v34 }
0x18cc   :  { %v7408_v47 = vpop.f32.mrf.mxu1  ;;  %v9991_v34 = vadd.f32 %v12123_v36, %v12121_v10 }
0x18cd   :  { %v7477_v48 = vmul.f32 %v12137_v41, %v7417_v45  ;;  %v7409_v49 = vadd.f32 %v9958_v17, %v7408_v47  ;;  %v7495_v54 = vadd.f32 %v12140_v43, %v7474_v8  ;;  %v7529_v57 = vmul.f32 0.1, %v7497_v46 }
0x18ce   :  { %v10753_v50 = vpop.f32.mrf.mxu1  ;;  %vm7513_vm12 = vcmp.gt.f32.partialorder %v7497_v46, 0.0 }
0x18cf   :  { %v7498_v51 = vadd.f32 %v12140_v43, %v7477_v48  ;;  %v7475_v53 = vmul.f32 %v12137_v41, %v7409_v49  ;;  %v7430_v55 = vadd.f32 %v10753_v50, %v9973_v62  ;;  %v7527_v15 = vmul.f32 0.1, %v7495_v54 }
0x18d0   :  { %v7421_v13 = vpop.f32.mrf.mxu1  ;;  %vm7511_vm7 = vcmp.gt.f32.partialorder %v7495_v54, 0.0  ;;  %v7545_v24 = vsel %vm7513_vm12, %v7497_v46, %v7529_v57  ;;  %v9997_v46 = vadd.f32 %v12131_v4, %v12129_v37  ;;  %v10000_v37 = vadd.f32 %v12135_v38, %v12133_v5 }
0x18d1   :  { %v7530_v56 = vmul.f32 0.1, %v7498_v51  ;;  %v7496_v58 = vadd.f32 %v12140_v43, %v7475_v53  ;;  %v7480_v59 = vmul.f32 %v12137_v41, %v7430_v55  ;;  %v7422_v14 = vadd.f32 %v9967_v61, %v7421_v13 }
0x18d2   :  { %v10754_v7 = vpop.f32.mrf.mxu1  ;;  %vm7514_vm6 = vcmp.gt.f32.partialorder %v7498_v51, 0.0  ;;  %v7543_v62 = vsel %vm7511_vm7, %v7495_v54, %v7527_v15 }
0x18d3   :  { %v7528_v16 = vmul.f32 0.1, %v7496_v58  ;;  %v7478_v17 = vmul.f32 %v12137_v41, %v7422_v14  ;;  %v7433_v19 = vadd.f32 %v10754_v7, %v9976_v30  ;;  %v7546_v20 = vsel %vm7514_vm6, %v7498_v51, %v7530_v56 }
0x18d4   :  { %v7424_v18 = vpop.f32.mrf.mxu1  ;;  %vm7512_vm8 = vcmp.gt.f32.partialorder %v7496_v58, 0.0  ;;  %v7501_v21 = vadd.f32 %v12140_v43, %v7480_v59  ;;  %v12153_v61 = vpack.c.bf16 %v7546_v20, %v7545_v24  ;;  %v9994_v56 = vadd.f32 %v12127_v35, %v12125_v39 }
0x18d5   :  { %v7481_v22 = vmul.f32 %v12137_v41, %v7433_v19  ;;  %v7425_v23 = vadd.f32 %v9970_v27, %v7424_v18  ;;  %v7544_v26 = vsel %vm7512_vm8, %v7496_v58, %v7528_v16  ;;  %v7499_v52 = vadd.f32 %v12140_v43, %v7478_v17 }
0x18d6   :  { %v10757_v25 = vpop.f32.mrf.mxu1  ;;  %v12158_v29 = vpack.c.bf16 %v7544_v26, %v7543_v62  ;;  %v7533_v30 = vmul.f32 0.1, %v7501_v21  ;;  %vm7517_vm9 = vcmp.gt.f32.partialorder %v7501_v21, 0.0 }
0x18d7   :  { %v7502_v60 = vadd.f32 %v12140_v43, %v7481_v22  ;;  %v7479_v28 = vmul.f32 %v12137_v41, %v7425_v23  ;;  %v7531_v11 = vmul.f32 0.1, %v7499_v52  ;;  %vm7515_vm11 = vcmp.gt.f32.partialorder %v7499_v52, 0.0 }
0x18d8   :  { %v7437_v63 = vpop.f32.mrf.mxu1  ;;  %v7549_v48 = vsel %vm7517_vm9, %v7501_v21, %v7533_v30 }
0x18d9   :  { %v7534_v31 = vmul.f32 0.1, %v7502_v60  ;;  %v7500_v2 = vadd.f32 %v12140_v43, %v7479_v28  ;;  %v7438_v27 = vadd.f32 %v12107_v3, %v7437_v63  ;;  %vm7518_vm10 = vcmp.gt.f32.partialorder %v7502_v60, 0.0 }
0x18da   :  { %v10758_v40 = vpop.f32.mrf.mxu1  ;;  %v9985_v3 = vadd.f32 %v12115_v1, %v12113_v0  ;;  %v7547_v53 = vsel %vm7515_vm11, %v7499_v52, %v7531_v11  ;;  %v11328_v11 = vld [vmem:[#allocation5 + $0x188] sm:$0xff]  }
0x18db   :  { %v7532_v12 = vmul.f32 0.1, %v7500_v2  ;;  %v7482_v44 = vmul.f32 %v12137_v41, %v7438_v27  ;;  %v7550_v45 = vsel %vm7518_vm10, %v7502_v60, %v7534_v31  ;;  %vm7516_vm13 = vcmp.gt.f32.partialorder %v7500_v2, 0.0 }
0x18dc   :  { %v7440_v8 = vpop.f32.mrf.mxu1  ;;  %v7449_v33 = vadd.f32 %v10758_v40, %v9988_v6  ;;  %v12172_v50 = vpack.c.bf16 %v7550_v45, %v7549_v48  ;;  %v7446_v0 = vadd.f32 %v10757_v25, %v9985_v3  ;;  %v11331_v6 = vld [vmem:[#allocation5 + $0x1a0] sm:$0xff]   ;;  %v11333_v45 = vld [vmem:[#allocation5 + $0x1b0] sm:$0xff]   ;;  %v11334_v3 = vld [vmem:[#allocation5 + $0x1b8] sm:$0xff]  }
0x18dd   :  { %v7441_v47 = vadd.f32 %v9982_v42, %v7440_v8  ;;  %v7503_v32 = vadd.f32 %v12140_v43, %v7482_v44  ;;  %v7548_v54 = vsel %vm7516_vm13, %v7500_v2, %v7532_v12  ;;  %v11329_v12 = vld [vmem:[#allocation5 + $0x190] sm:$0xff]   ;;  %v11330_v44 = vld [vmem:[#allocation5 + $0x198] sm:$0xff]   ;;  %v11332_v8 = vld [vmem:[#allocation5 + $0x1a8] sm:$0xff]  }
0x18de   :  { %v10761_v49 = vpop.f32.mrf.mxu1  ;;  %v7610_v55 = vpack.c.bf16 %v7548_v54, %v7547_v53  ;;  %v7485_v10 = vmul.f32 %v12137_v41, %v7449_v33  ;;  %v7484_v5 = vmul.f32 %v12137_v41, %v7446_v0  ;;  %v11339_v48 = vld [vmem:[#allocation5 + $0x1e0] sm:$0xff]   ;;  %v11341_v33 = vld [vmem:[#allocation5 + $0x1f0] sm:$0xff]   ;;  %v11344_v54 = vld [vmem:[#allocation5 + $0x208] sm:$0xff]  }
0x18df   :  { %v7483_v9 = vmul.f32 %v12137_v41, %v7441_v47  ;;  %v7462_v51 = vadd.f32 %v10761_v49, %v9997_v46  ;;  %v7535_v58 = vmul.f32 0.1, %v7503_v32  ;;  %vm7519_vm14 = vcmp.gt.f32.partialorder %v7503_v32, 0.0  ;;  %v11335_v46 = vld [vmem:[#allocation5 + $0x1c0] sm:$0xff]   ;;  %v11337_v47 = vld [vmem:[#allocation5 + $0x1d0] sm:$0xff]   ;;  %v11342_v49 = vld [vmem:[#allocation5 + $0x1f8] sm:$0xff]  }
0x18e0   :  { %v7453_v1 = vpop.f32.mrf.mxu1  ;;  %v7506_v35 = vadd.f32 %v12140_v43, %v7485_v10  ;;  %v7505_v23 = vadd.f32 %v12140_v43, %v7484_v5  ;;  %v11351_v53 = vld [vmem:[#allocation2 + $0xaf8] sm:$0xff]   ;;  %v11358_v10 = vld [vmem:[#allocation2 + $0xaa0] sm:$0xff]   ;;  %v11364_v5 = vld [vmem:[#allocation2 + $0xa88] sm:$0xff]  }
0x18e1   :  { %v7504_v4 = vadd.f32 %v12140_v43, %v7483_v9  ;;  %v7488_v57 = vmul.f32 %v12137_v41, %v7462_v51  ;;  %v7454_v13 = vadd.f32 %v9991_v34, %v7453_v1  ;;  %v7551_v22 = vsel %vm7519_vm14, %v7503_v32, %v7535_v58  ;;  %v11340_v32 = vld [vmem:[#allocation5 + $0x1e8] sm:$0xff]   ;;  %v11345_v34 = vld [vmem:[#allocation5 + $0x210] sm:$0xff]   ;;  %v11346_v9 = vld [vmem:[#allocation5 + $0x218] sm:$0xff]   ;;  %10049 = vmatprep.subr.bf16.mxu1 %v11351_v53 }
0x18e2   :  { %v10762_v36 = vpop.f32.mrf.mxu1  ;;  %v7538_v60 = vmul.f32 0.1, %v7506_v35  ;;  %vm7522_vm4 = vcmp.gt.f32.partialorder %v7506_v35, 0.0  ;;  %v7537_v31 = vmul.f32 0.1, %v7505_v23  ;;  %vm7521_vm5 = vcmp.gt.f32.partialorder %v7505_v23, 0.0 }
0x18e3   :  { %v7536_v59 = vmul.f32 0.1, %v7504_v4  ;;  %v7509_v14 = vadd.f32 %v12140_v43, %v7488_v57  ;;  %v7486_v7 = vmul.f32 %v12137_v41, %v7454_v13  ;;  %v7465_v15 = vadd.f32 %v10762_v36, %v10000_v37  ;;  %v11347_v51 = vld [vmem:[#allocation5 + $0x220] sm:$0xff]   ;;  %v11352_v0 = vld [vmem:[#allocation2 + $0xab8] sm:$0xff]   ;;  %v11348_v1 = vld [vmem:[#allocation5 + $0x228] sm:$0xff]  }
0x18e4   :  { %v7456_v38 = vpop.f32.mrf.mxu1  ;;  %vm7520_vm15 = vcmp.gt.f32.partialorder %v7504_v4, 0.0  ;;  %v7554_v40 = vsel %vm7522_vm4, %v7506_v35, %v7538_v60  ;;  %v7553_v42 = vsel %vm7521_vm5, %v7505_v23, %v7537_v31  ;;  %10050 = vmatpush3.bf16.msra.mxu1 %v11352_v0  ;;  %v11353_v37 = vld [vmem:[#allocation2 + $0xaf0] sm:$0xff]   ;;  %v11355_v57 = vld [vmem:[#allocation2 + $0xae8] sm:$0xff]   ;;  %v11357_v58 = vld [vmem:[#allocation2 + $0xae0] sm:$0xff]  }
0x18e5   :  { %v7507_v16 = vadd.f32 %v12140_v43, %v7486_v7  ;;  %v7489_v17 = vmul.f32 %v12137_v41, %v7465_v15  ;;  %v7457_v39 = vadd.f32 %v9994_v56, %v7456_v38  ;;  %v7552_v19 = vsel %vm7520_vm15, %v7504_v4, %v7536_v59  ;;  %v11354_v4 = vld [vmem:[#allocation2 + $0xab0] sm:$0xff]   ;;  %10051 = vmatprep.subr.bf16.mxu1 %v11353_v37  ;;  %v11356_v13 = vld [vmem:[#allocation2 + $0xaa8] sm:$0xff]   ;;  %v11350_v56 = vld [vmem:[#allocation5 + $0x238] sm:$0xff]  }
0x18e6   :  { %v7541_v18 = vmul.f32 0.1, %v7509_v14  ;;  %vm7525_vm0 = vcmp.gt.f32.partialorder %v7509_v14, 0.0  ;;  %v7612_v24 = vpack.c.bf16 %v7552_v19, %v7551_v22  ;;  %v11359_v36 = vld [vmem:[#allocation2 + $0xad8] sm:$0xff]   ;;  %v11362_v7 = vld [vmem:[#allocation2 + $0xa90] sm:$0xff]   ;;  %v11363_v15 = vld [vmem:[#allocation2 + $0xac8] sm:$0xff]  }
0x18e7   :  { %v7510_v20 = vadd.f32 %v12140_v43, %v7489_v17  ;;  %v7487_v21 = vmul.f32 %v12137_v41, %v7457_v39  ;;  %v7539_v25 = vmul.f32 0.1, %v7507_v16  ;;  %vm7523_vm2 = vcmp.gt.f32.partialorder %v7507_v16, 0.0  ;;  %v11360_v59 = vld [vmem:[#allocation2 + $0xa98] sm:$0xff]   ;;  %v11365_v38 = vld [vmem:[#allocation2 + $0xac0] sm:$0xff]   ;;  %v11373_v53 = vld [vmem:[#allocation2 + $0xb08] sm:$0xff]  }
0x18e8   :  { %v7557_v62 = vsel %vm7525_vm0, %v7509_v14, %v7541_v18  ;;  %10052 = vmatpush3.bf16.msra.mxu1 %v11354_v4  ;;  %v11361_v14 = vld [vmem:[#allocation2 + $0xad0] sm:$0xff]   ;;  %v11367_v17 = vld [vmem:[#allocation2 + $0xb38] sm:$0xff]   ;;  %v11374_v4 = vld [vmem:[#allocation2 + $0xb00] sm:$0xff]  }
0x18e9   :  { %v7542_v26 = vmul.f32 0.1, %v7510_v20  ;;  %v7508_v52 = vadd.f32 %v12140_v43, %v7487_v21  ;;  %vm7526_vm1 = vcmp.gt.f32.partialorder %v7510_v20, 0.0  ;;  %v7555_v41 = vsel %vm7523_vm2, %v7507_v16, %v7539_v25  ;;  %10053 = vmatprep.subr.bf16.mxu1 %v11355_v57  ;;  %v11366_v16 = vld [vmem:[#allocation2 + $0xa80] sm:$0xff]  }
0x18ea   :  { %v7613_v43 = vpack.c.bf16 %v7554_v40, %v7553_v42 }
0x18eb   :  { %v7540_v28 = vmul.f32 0.1, %v7508_v52  ;;  %v7558_v63 = vsel %vm7526_vm1, %v7510_v20, %v7542_v26  ;;  %vm7524_vm3 = vcmp.gt.f32.partialorder %v7508_v52, 0.0 }
0x18ec   :  { %v7615_v30 = vpack.c.bf16 %v7558_v63, %v7557_v62  ;;  %10054 = vmatpush3.bf16.msra.mxu1 %v11356_v13 }
0x18ed   :  { %v7556_v2 = vsel %vm7524_vm3, %v7508_v52, %v7540_v28  ;;  %10055 = vmatprep.subr.bf16.mxu1 %v11357_v58 }
0x18ee   :  { %10763 = vmatprep.subr.bf16.mxu0 %v7615_v30  ;;  %v7614_v27 = vpack.c.bf16 %v7556_v2, %v7555_v41 }
0x18ef   :  { %10764 = vmatpush3.bf16.msra.mxu0 %v7615_v30 }
0x18f0   :  { %10765 = vmatprep.subr.bf16.mxu0 %v7614_v27  ;;  %10056 = vmatpush3.bf16.msra.mxu1 %v11358_v10 }
0x18f1   :  { %10057 = vmatprep.subr.bf16.mxu1 %v11359_v36 }
0x18f3   :  { %10766 = vmatpush3.bf16.msra.mxu0 %v7614_v27 }
0x18f4   :  { %10767 = vmatprep.subr.bf16.mxu0 %v7613_v43  ;;  %10058 = vmatpush3.bf16.msra.mxu1 %v11360_v59 }
0x18f5   :  { %10059 = vmatprep.subr.bf16.mxu1 %v11361_v14 }
0x18f7   :  { %10768 = vmatpush3.bf16.msra.mxu0 %v7613_v43 }
0x18f8   :  { %10769 = vmatprep.subr.bf16.mxu0 %v7612_v24  ;;  %10060 = vmatpush3.bf16.msra.mxu1 %v11362_v7 }
0x18f9   :  { %10061 = vmatprep.subr.bf16.mxu1 %v11363_v15 }
0x18fb   :  { %10770 = vmatpush3.bf16.msra.mxu0 %v7612_v24 }
0x18fc   :  { %10771 = vmatprep.subr.bf16.mxu0 %v12172_v50  ;;  %10062 = vmatpush3.bf16.msra.mxu1 %v11364_v5 }
0x18fd   :  { %10063 = vmatprep.subr.bf16.mxu1 %v11365_v38 }
0x18ff   :  { %10772 = vmatpush3.bf16.msra.mxu0 %v12172_v50  ;;  %v11343_v50 = vld [vmem:[#allocation5 + $0x200] sm:$0xff]  }
0x1900   :  { %10773 = vmatprep.subr.bf16.mxu0 %v7610_v55  ;;  %10064 = vmatpush3.bf16.msra.mxu1 %v11366_v16 }
0x1901   :  { %10827 = vmatprep.subr.bf16.mxu1 %v11367_v17 }
0x1903   :  { %10774 = vmatpush3.bf16.msra.mxu0 %v7610_v55  ;;  %v11349_v55 = vld [vmem:[#allocation5 + $0x230] sm:$0xff]  }
0x1904   :  { %10775 = vmatprep.subr.bf16.mxu0 %v12153_v61 }
0x1907   :  { %10776 = vmatpush3.bf16.msra.mxu0 %v12153_v61  ;;  %v11336_v61 = vld [vmem:[#allocation5 + $0x1c8] sm:$0xff]  }
0x1908   :  { %10777 = vmatprep.subr.bf16.mxu0 %v12158_v29 }
0x190b   :  { %10778 = vmatpush3.bf16.msra.mxu0 %v12158_v29  ;;  %v11338_v29 = vld [vmem:[#allocation5 + $0x1d8] sm:$0xff]  }
0x190e   :  { %10780 = vmatmul.mubr.bf16.vlgmr.msra.gmra.mxu0 %v11328_v11  ;;  %v11368_v11 = vld [vmem:[#allocation2 + $0xb30] sm:$0xff]  }
0x190f   :  { %10783 = vmatprep.mubr.bf16.mxu0 %v11329_v12 }
0x1916   :  { %10784 = vmatmul.mubr.bf16.gmra.mxu0 %v11330_v44 }
0x1917   :  { %10787 = vmatprep.mubr.bf16.mxu0 %v11331_v6 }
0x191e   :  { %10788 = vmatmul.mubr.bf16.gmra.mxu0 %v11332_v8  ;;  %v11369_v8 = vld [vmem:[#allocation2 + $0xb28] sm:$0xff]  }
0x191f   :  { %10791 = vmatprep.mubr.bf16.mxu0 %v11333_v45 }
0x1926   :  { %10792 = vmatmul.mubr.bf16.gmra.mxu0 %v11334_v3 }
0x1927   :  { %10795 = vmatprep.mubr.bf16.mxu0 %v11335_v46 }
0x192e   :  { %10796 = vmatmul.mubr.bf16.gmra.mxu0 %v11336_v61 }
0x192f   :  { %10799 = vmatprep.mubr.bf16.mxu0 %v11337_v47  ;;  %v11370_v47 = vld [vmem:[#allocation2 + $0xb20] sm:$0xff]  }
0x1936   :  { %10800 = vmatmul.mubr.bf16.gmra.mxu0 %v11338_v29 }
0x1937   :  { %10803 = vmatprep.mubr.bf16.mxu0 %v11339_v48 }
0x193e   :  { %10804 = vmatmul.mubr.bf16.gmra.mxu0 %v11340_v32  ;;  %v11371_v32 = vld [vmem:[#allocation2 + $0xb18] sm:$0xff]  }
0x193f   :  { %10807 = vmatprep.mubr.bf16.mxu0 %v11341_v33 }
0x1946   :  { %10808 = vmatmul.mubr.bf16.gmra.mxu0 %v11342_v49 }
0x1947   :  { %10811 = vmatprep.mubr.bf16.mxu0 %v11343_v50 }
0x194e   :  { %10812 = vmatmul.mubr.bf16.gmra.mxu0 %v11344_v54  ;;  %v11372_v54 = vld [vmem:[#allocation2 + $0xb10] sm:$0xff]  }
0x194f   :  { %10815 = vmatprep.mubr.bf16.mxu0 %v11345_v34 }
0x1956   :  { %10816 = vmatmul.mubr.bf16.gmra.mxu0 %v11346_v9 }
0x1957   :  { %10819 = vmatprep.mubr.bf16.mxu0 %v11347_v51 }
0x195e   :  { %10820 = vmatmul.mubr.bf16.gmra.mxu0 %v11348_v1 }
0x195f   :  { %10823 = vmatprep.mubr.bf16.mxu0 %v11349_v55 }
0x1966   :  { %10824 = vmatmul.mubr.bf16.gmra.mxu0 %v11350_v56 }
0x19ce   :  { %v10781_v39 = vpop.f32.mrf.mxu0 }
0x19d0   :  { %v7794_v35 = vpop.f32.mrf.mxu0 }
0x19d2   :  { %v10782_v19 = vpop.f32.mrf.mxu0 }
0x19d3   :  { %v7988_v46 = vpack.c.bf16 %v10782_v19, %v10781_v39 }
0x19d4   :  { %v7797_v18 = vpop.f32.mrf.mxu0 }
0x19d5   :  { %v7985_v42 = vpack.c.bf16 %v7797_v18, %v7794_v35 }
0x19d6   :  { %v12200_v20 = vpop.f32.mrf.mxu0 }
0x19d8   :  { %v7810_v21 = vpop.f32.mrf.mxu0 }
0x19da   :  { %v12202_v22 = vpop.f32.mrf.mxu0 }
0x19db   :  { %v7994_v55 = vpack.c.bf16 %v12202_v22, %v12200_v20 }
0x19dc   :  { %v7813_v23 = vpop.f32.mrf.mxu0 }
0x19dd   :  { %v7991_v49 = vpack.c.bf16 %v7813_v23, %v7810_v21 }
0x19de   :  { %v12204_v24 = vpop.f32.mrf.mxu0 }
0x19e0   :  { %v12206_v25 = vpop.f32.mrf.mxu0 }
0x19e2   :  { %v12208_v26 = vpop.f32.mrf.mxu0 }
0x19e3   :  { %v8000_v7 = vpack.c.bf16 %v12208_v26, %v12204_v24 }
0x19e4   :  { %v12210_v52 = vpop.f32.mrf.mxu0 }
0x19e5   :  { %v7997_v58 = vpack.c.bf16 %v12210_v52, %v12206_v25 }
0x19e6   :  { %v12212_v60 = vpop.f32.mrf.mxu0 }
0x19e8   :  { %v12214_v28 = vpop.f32.mrf.mxu0 }
0x19ea   :  { %v12216_v62 = vpop.f32.mrf.mxu0 }
0x19eb   :  { %v8006_v63 = vpack.c.bf16 %v12216_v62, %v12212_v60 }
0x19ec   :  { %v12220_v30 = vpop.f32.mrf.mxu0 }
0x19ed   :  { %v8003_v38 = vpack.c.bf16 %v12220_v30, %v12214_v28 }
0x19ee   :  { %v10797_v31 = vpop.f32.mrf.mxu0 }
0x19f0   :  { %v7858_v41 = vpop.f32.mrf.mxu0 }
0x19f2   :  { %v10798_v2 = vpop.f32.mrf.mxu0 }
0x19f3   :  { %v7989_v12 = vpack.c.bf16 %v10798_v2, %v10797_v31 }
0x19f4   :  { %v7861_v27 = vpop.f32.mrf.mxu0 }
0x19f5   :  { %v7986_v40 = vpack.c.bf16 %v7861_v27, %v7858_v41 }
0x19f6   :  { %v10801_v43 = vpop.f32.mrf.mxu0 }
0x19f7   :  { %8234 = vmatprep.mubr.bf16.mxu1 %v7986_v40 }
0x19f8   :  { %8235 = vmatmul.mubr.bf16.vlgmr.msra.gmra.mxu1 %v7985_v42  ;;  %v7874_v44 = vpop.f32.mrf.mxu0 }
0x19f9   :  { %8242 = vmatprep.mubr.bf16.mxu1 %v7989_v12  ;;  %10828 = vmatpush3.bf16.msra.mxu1 %v11367_v17 }
0x19fa   :  { %v10802_v6 = vpop.f32.mrf.mxu0  ;;  %10829 = vmatprep.subr.bf16.mxu1 %v11368_v11 }
0x19fb   :  { %v7995_v34 = vpack.c.bf16 %v10802_v6, %v10801_v43 }
0x19fc   :  { %v7877_v45 = vpop.f32.mrf.mxu0 }
0x19fd   :  { %v7992_v3 = vpack.c.bf16 %v7877_v45, %v7874_v44  ;;  %10830 = vmatpush3.bf16.msra.mxu1 %v11368_v11 }
0x19fe   :  { %v10805_v61 = vpop.f32.mrf.mxu0  ;;  %10831 = vmatprep.subr.bf16.mxu1 %v11369_v8 }
0x1a00   :  { %8243 = vmatmul.mubr.bf16.gmra.mxu1 %v7988_v46  ;;  %v7890_v29 = vpop.f32.mrf.mxu0 }
0x1a01   :  { %8250 = vmatprep.mubr.bf16.mxu1 %v7992_v3  ;;  %10832 = vmatpush3.bf16.msra.mxu1 %v11369_v8 }
0x1a02   :  { %v10806_v48 = vpop.f32.mrf.mxu0  ;;  %10833 = vmatprep.subr.bf16.mxu1 %v11370_v47 }
0x1a03   :  { %v8001_v36 = vpack.c.bf16 %v10806_v48, %v10805_v61 }
0x1a04   :  { %v7893_v33 = vpop.f32.mrf.mxu0 }
0x1a05   :  { %10834 = vmatpush3.bf16.msra.mxu1 %v11370_v47  ;;  %v7998_v1 = vpack.c.bf16 %v7893_v33, %v7890_v29 }
0x1a06   :  { %v10809_v50 = vpop.f32.mrf.mxu0  ;;  %10835 = vmatprep.subr.bf16.mxu1 %v11371_v32 }
0x1a08   :  { %8251 = vmatmul.mubr.bf16.gmra.mxu1 %v7991_v49  ;;  %v7906_v9 = vpop.f32.mrf.mxu0 }
0x1a09   :  { %8258 = vmatprep.mubr.bf16.mxu1 %v7995_v34  ;;  %10836 = vmatpush3.bf16.msra.mxu1 %v11371_v32 }
0x1a0a   :  { %v10810_v51 = vpop.f32.mrf.mxu0  ;;  %10837 = vmatprep.subr.bf16.mxu1 %v11372_v54 }
0x1a0b   :  { %v8007_v17 = vpack.c.bf16 %v10810_v51, %v10809_v50 }
0x1a0c   :  { %v7909_v0 = vpop.f32.mrf.mxu0 }
0x1a0d   :  { %10838 = vmatpush3.bf16.msra.mxu1 %v11372_v54  ;;  %v8004_v14 = vpack.c.bf16 %v7909_v0, %v7906_v9 }
0x1a0e   :  { %v10813_v37 = vpop.f32.mrf.mxu0  ;;  %10839 = vmatprep.subr.bf16.mxu1 %v11373_v53 }
0x1a10   :  { %8259 = vmatmul.mubr.bf16.gmra.mxu1 %v7994_v55  ;;  %v7922_v57 = vpop.f32.mrf.mxu0 }
0x1a11   :  { %8266 = vmatprep.mubr.bf16.mxu1 %v7998_v1  ;;  %10840 = vmatpush3.bf16.msra.mxu1 %v11373_v53 }
0x1a12   :  { %v10814_v13 = vpop.f32.mrf.mxu0  ;;  %10841 = vmatprep.subr.bf16.mxu1 %v11374_v4 }
0x1a13   :  { %v7990_v21 = vpack.c.bf16 %v10814_v13, %v10813_v37 }
0x1a14   :  { %v7925_v56 = vpop.f32.mrf.mxu0 }
0x1a15   :  { %10842 = vmatpush3.bf16.msra.mxu1 %v11374_v4  ;;  %v7987_v35 = vpack.c.bf16 %v7925_v56, %v7922_v57  ;;  %v12267_v4 = vld [vmem:[#allocation7 + $0x1c] ss:$0 sm:$0xff]  ;;  %v12269_v56 = vld [vmem:[#allocation7 + $0x1d] ss:$0 sm:$0xff] }
0x1a16   :  { %v10817_v10 = vpop.f32.mrf.mxu0 }
0x1a18   :  { %8267 = vmatmul.mubr.bf16.gmra.mxu1 %v7997_v58  ;;  %v7938_v59 = vpop.f32.mrf.mxu0 }
0x1a19   :  { %8274 = vmatprep.mubr.bf16.mxu1 %v8001_v36 }
0x1a1a   :  { %v10818_v15 = vpop.f32.mrf.mxu0 }
0x1a1b   :  { %v7996_v25 = vpack.c.bf16 %v10818_v15, %v10817_v10 }
0x1a1c   :  { %v7941_v5 = vpop.f32.mrf.mxu0 }
0x1a1d   :  { %v7993_v20 = vpack.c.bf16 %v7941_v5, %v7938_v59 }
0x1a1e   :  { %v10821_v16 = vpop.f32.mrf.mxu0 }
0x1a20   :  { %8275 = vmatmul.mubr.bf16.gmra.mxu1 %v8000_v7  ;;  %v7954_v39 = vpop.f32.mrf.mxu0 }
0x1a21   :  { %8282 = vmatprep.mubr.bf16.mxu1 %v8004_v14 }
0x1a22   :  { %v10822_v19 = vpop.f32.mrf.mxu0 }
0x1a23   :  { %v8002_v30 = vpack.c.bf16 %v10822_v19, %v10821_v16 }
0x1a24   :  { %v7957_v18 = vpop.f32.mrf.mxu0 }
0x1a25   :  { %v7999_v24 = vpack.c.bf16 %v7957_v18, %v7954_v39 }
0x1a26   :  { %v10825_v22 = vpop.f32.mrf.mxu0 }
0x1a28   :  { %8283 = vmatmul.mubr.bf16.gmra.mxu1 %v8003_v38  ;;  %v7970_v23 = vpop.f32.mrf.mxu0 }
0x1a29   :  { %8290 = vmatprep.mubr.bf16.mxu1 %v8007_v17 }
0x1a2a   :  { %v10826_v26 = vpop.f32.mrf.mxu0 }
0x1a2b   :  { %v8008_v60 = vpack.c.bf16 %v10826_v26, %v10825_v22 }
0x1a2c   :  { %v7973_v52 = vpop.f32.mrf.mxu0 }
0x1a2d   :  { %v8005_v28 = vpack.c.bf16 %v7973_v52, %v7970_v23 }
0x1a30   :  { %8291 = vmatmul.mubr.bf16.gmra.mxu1 %v8006_v63 }
0x1a31   :  { %10843 = vmatprep.mubr.bf16.mxu1 %v7987_v35 }
0x1a38   :  { %10844 = vmatmul.mubr.bf16.vlgmr.msra.gmra.mxu1 %v7990_v21 }
0x1a39   :  { %10847 = vmatprep.mubr.bf16.mxu1 %v7993_v20 }
0x1a40   :  { %10848 = vmatmul.mubr.bf16.gmra.mxu1 %v7996_v25 }
0x1a41   :  { %10851 = vmatprep.mubr.bf16.mxu1 %v7999_v24 }
0x1a48   :  { %10852 = vmatmul.mubr.bf16.gmra.mxu1 %v8002_v30 }
0x1a49   :  { %10855 = vmatprep.mubr.bf16.mxu1 %v8005_v28 }
0x1a50   :  { %10856 = vmatmul.mubr.bf16.gmra.mxu1 %v8008_v60 }
0x1ab8   :  { %v10065_v62 = vpop.f32.mrf.mxu1 }
0x1aba   :  { %v10066_v63 = vpop.f32.mrf.mxu1 }
0x1abb   :  { %v10067_v57 = vadd.f32 %v10066_v63, %v10065_v62 }
0x1abc   :  { %v10068_v31 = vpop.f32.mrf.mxu1 }
0x1abe   :  { %v10069_v41 = vpop.f32.mrf.mxu1 }
0x1abf   :  { %v10070_v38 = vadd.f32 %v10069_v41, %v10068_v31 }
0x1ac0   :  { %v10071_v2 = vpop.f32.mrf.mxu1 }
0x1ac2   :  { %v10072_v27 = vpop.f32.mrf.mxu1 }
0x1ac3   :  { %v10073_v55 = vadd.f32 %v10072_v27, %v10071_v2 }
0x1ac4   :  { %v10074_v40 = vpop.f32.mrf.mxu1 }
0x1ac6   :  { %v10075_v42 = vpop.f32.mrf.mxu1 }
0x1ac7   :  { %v10076_v10 = vadd.f32 %v10075_v42, %v10074_v40 }
0x1ac8   :  { %v10077_v43 = vpop.f32.mrf.mxu1 }
0x1aca   :  { %v10078_v11 = vpop.f32.mrf.mxu1 }
0x1acb   :  { %v10079_v19 = vadd.f32 %v10078_v11, %v10077_v43 }
0x1acc   :  { %v12233_v12 = vpop.f32.mrf.mxu1 }
0x1ace   :  { %v10081_v44 = vpop.f32.mrf.mxu1 }
0x1acf   :  { %v10082_v2 = vadd.f32 %v10081_v44, %v12233_v12 }
0x1ad0   :  { %v10083_v6 = vpop.f32.mrf.mxu1 }
0x1ad2   :  { %v10084_v8 = vpop.f32.mrf.mxu1 }
0x1ad3   :  { %v10085_v18 = vadd.f32 %v10084_v8, %v10083_v6 }
0x1ad4   :  { %v10086_v45 = vpop.f32.mrf.mxu1 }
0x1ad6   :  { %v10087_v3 = vpop.f32.mrf.mxu1 }
0x1ad7   :  { %v10088_v25 = vadd.f32 %v10087_v3, %v10086_v45 }
0x1ad8   :  { %v12235_v46 = vpop.f32.mrf.mxu1 }
0x1ada   :  { %v12237_v61 = vpop.f32.mrf.mxu1 }
0x1adb   :  { %v10091_v8 = vadd.f32 %v12237_v61, %v12235_v46 }
0x1adc   :  { %v12239_v47 = vpop.f32.mrf.mxu1 }
0x1ade   :  { %v12241_v29 = vpop.f32.mrf.mxu1 }
0x1ae0   :  { %v12243_v48 = vpop.f32.mrf.mxu1 }
0x1ae2   :  { %v12245_v32 = vpop.f32.mrf.mxu1 }
0x1ae3   :  { %v10097_v12 = vadd.f32 %v12245_v32, %v12243_v48 }
0x1ae4   :  { %v12247_v33 = vpop.f32.mrf.mxu1 }
0x1ae6   :  { %v12249_v49 = vpop.f32.mrf.mxu1 }
0x1ae7   :  { %v10100_v46 = vadd.f32 %v12249_v49, %v12247_v33 }
0x1ae8   :  { %v12251_v50 = vpop.f32.mrf.mxu1 }
0x1aea   :  { %v12253_v54 = vpop.f32.mrf.mxu1 }
0x1aec   :  { %v12255_v34 = vpop.f32.mrf.mxu1 }
0x1aee   :  { %v12257_v9 = vpop.f32.mrf.mxu1 }
0x1af0   :  { %v12259_v51 = vpop.f32.mrf.mxu1 }
0x1af2   :  { %v12261_v53 = vpop.f32.mrf.mxu1 }
0x1af4   :  { %v12263_v0 = vpop.f32.mrf.mxu1 }
0x1af6   :  { %v12265_v1 = vpop.f32.mrf.mxu1 }
0x1af8   :  { %v10845_v37 = vpop.f32.mrf.mxu1 }
0x1af9   :  { %v8342_v13 = vadd.f32 %v10845_v37, %v10073_v55 }
0x1afa   :  { %v8333_v58 = vpop.f32.mrf.mxu1 }
0x1afb   :  { %v8404_v36 = vmul.f32 %v12267_v4, %v8342_v13  ;;  %v8334_v59 = vadd.f32 %v10067_v57, %v8333_v58 }
0x1afc   :  { %v10846_v14 = vpop.f32.mrf.mxu1 }
0x1afd   :  { %v8425_v7 = vadd.f32 %v12269_v56, %v8404_v36  ;;  %v8402_v15 = vmul.f32 %v12267_v4, %v8334_v59  ;;  %v8345_v5 = vadd.f32 %v10846_v14, %v10076_v10 }
0x1afe   :  { %v8336_v16 = vpop.f32.mrf.mxu1 }
0x1aff   :  { %vm8441_vm12 = vcmp.gt.f32.partialorder %v8425_v7, 0.0  ;;  %v8457_v17 = vmul.f32 0.1, %v8425_v7  ;;  %v8423_v39 = vadd.f32 %v12269_v56, %v8402_v15  ;;  %v8405_v35 = vmul.f32 %v12267_v4, %v8345_v5 }
0x1b00   :  { %v8337_v20 = vadd.f32 %v10070_v38, %v8336_v16  ;;  %v10849_v21 = vpop.f32.mrf.mxu1  ;;  %v10094_v38 = vadd.f32 %v12241_v29, %v12239_v47 }
0x1b01   :  { %v8473_v22 = vsel %vm8441_vm12, %v8425_v7, %v8457_v17  ;;  %vm8439_vm6 = vcmp.gt.f32.partialorder %v8423_v39, 0.0  ;;  %v8455_v23 = vmul.f32 0.1, %v8423_v39  ;;  %v8426_v24 = vadd.f32 %v12269_v56, %v8405_v35 }
0x1b02   :  { %11375 = vtanh.f32 %v8473_v22  ;;  %v8403_v26 = vmul.f32 %v12267_v4, %v8337_v20  ;;  %v8358_v52 = vadd.f32 %v10849_v21, %v10085_v18  ;;  %v8349_v28 = vpop.f32.mrf.mxu1  ;;  %v10109_v21 = vadd.f32 %v12261_v53, %v12259_v51 }
0x1b03   :  { %v8471_v30 = vsel %vm8439_vm6, %v8423_v39, %v8455_v23  ;;  %vm8442_vm7 = vcmp.gt.f32.partialorder %v8426_v24, 0.0  ;;  %v8458_v60 = vmul.f32 0.1, %v8426_v24  ;;  %v8350_v62 = vadd.f32 %v10079_v19, %v8349_v28 }
0x1b04   :  { %11377 = vtanh.f32 %v8471_v30  ;;  %v8424_v63 = vadd.f32 %v12269_v56, %v8403_v26  ;;  %v8408_v31 = vmul.f32 %v12267_v4, %v8358_v52  ;;  %v10850_v41 = vpop.f32.mrf.mxu1  ;;  %v10103_v52 = vadd.f32 %v12253_v54, %v12251_v50 }
0x1b05   :  { %v8474_v27 = vsel %vm8442_vm7, %v8426_v24, %v8458_v60  ;;  %v8406_v40 = vmul.f32 %v12267_v4, %v8350_v62  ;;  %v8361_v42 = vadd.f32 %v10850_v41, %v10088_v25  ;;  %v10112_v28 = vadd.f32 %v12265_v1, %v12263_v0 }
0x1b06   :  { %11379 = vtanh.f32 %v8474_v27  ;;  %vm8440_vm8 = vcmp.gt.f32.partialorder %v8424_v63, 0.0  ;;  %v8456_v43 = vmul.f32 0.1, %v8424_v63  ;;  %v8429_v11 = vadd.f32 %v12269_v56, %v8408_v31  ;;  %v8352_v6 = vpop.f32.mrf.mxu1 }
0x1b07   :  { %v8427_v45 = vadd.f32 %v12269_v56, %v8406_v40  ;;  %v8409_v3 = vmul.f32 %v12267_v4, %v8361_v42  ;;  %v8353_v55 = vadd.f32 %v10082_v2, %v8352_v6  ;;  %v10106_v54 = vadd.f32 %v12257_v9, %v12255_v34 }
0x1b08   :  { %v8472_v44 = vsel %vm8440_vm8, %v8424_v63, %v8456_v43  ;;  %vm8445_vm9 = vcmp.gt.f32.partialorder %v8429_v11, 0.0  ;;  %v8461_v37 = vmul.f32 0.1, %v8429_v11  ;;  %v10853_v57 = vpop.f32.mrf.mxu1 }
0x1b09   :  { %11381 = vtanh.f32 %v8472_v44  ;;  %vm8443_vm10 = vcmp.gt.f32.partialorder %v8427_v45, 0.0  ;;  %v8459_v13 = vmul.f32 0.1, %v8427_v45  ;;  %v8430_v58 = vadd.f32 %v12269_v56, %v8409_v3 }
0x1b0a   :  { %v8477_v61 = vsel %vm8445_vm9, %v8429_v11, %v8461_v37  ;;  %v8407_v10 = vmul.f32 %v12267_v4, %v8353_v55  ;;  %v8374_v36 = vadd.f32 %v10853_v57, %v10097_v12  ;;  %v8365_v59 = vpop.f32.mrf.mxu1 }
0x1b0b   :  { %11383 = vtanh.f32 %v8477_v61  ;;  %v8475_v14 = vsel %vm8443_vm10, %v8427_v45, %v8459_v13  ;;  %vm8446_vm11 = vcmp.gt.f32.partialorder %v8430_v58, 0.0  ;;  %v8462_v48 = vmul.f32 0.1, %v8430_v58 }
0x1b0c   :  { %11385 = vtanh.f32 %v8475_v14  ;;  %v8428_v32 = vadd.f32 %v12269_v56, %v8407_v10  ;;  %v8412_v7 = vmul.f32 %v12267_v4, %v8374_v36  ;;  %v8366_v15 = vadd.f32 %v10091_v8, %v8365_v59  ;;  %v10854_v5 = vpop.f32.mrf.mxu1 }
0x1b0d   :  { %v8478_v33 = vsel %vm8446_vm11, %v8430_v58, %v8462_v48  ;;  %v8377_v49 = vadd.f32 %v10854_v5, %v10100_v46 }
0x1b0e   :  { %11387 = vtanh.f32 %v8478_v33  ;;  %vm8444_vm13 = vcmp.gt.f32.partialorder %v8428_v32, 0.0  ;;  %v8460_v16 = vmul.f32 0.1, %v8428_v32  ;;  %v8433_v17 = vadd.f32 %v12269_v56, %v8412_v7  ;;  %v8368_v39 = vpop.f32.mrf.mxu1 }
0x1b0f   :  { %v11376_v35 = vpop.eup %11375  ;;  %v8410_v19 = vmul.f32 %v12267_v4, %v8366_v15  ;;  %v8413_v18 = vmul.f32 %v12267_v4, %v8377_v49  ;;  %v8369_v20 = vadd.f32 %v10094_v38, %v8368_v39 }
0x1b10   :  { %8505 = vst [vmem:[#allocation8 + $0x10] sm:$0xff] %v11376_v35  ;;  %v8476_v22 = vsel %vm8444_vm13, %v8428_v32, %v8460_v16  ;;  %vm8449_vm14 = vcmp.gt.f32.partialorder %v8433_v17, 0.0  ;;  %v8465_v47 = vmul.f32 0.1, %v8433_v17  ;;  %v10857_v29 = vpop.f32.mrf.mxu1 }
0x1b11   :  { %v11378_v23 = vpop.eup %11377  ;;  %11389 = vtanh.f32 %v8476_v22  ;;  %v8431_v24 = vadd.f32 %v12269_v56, %v8410_v19  ;;  %v8434_v25 = vadd.f32 %v12269_v56, %v8413_v18  ;;  %v8411_v26 = vmul.f32 %v12267_v4, %v8369_v20 }
0x1b12   :  { %8503 = vst [vmem:[#allocation8] sm:$0xff] %v11378_v23  ;;  %v8481_v51 = vsel %vm8449_vm14, %v8433_v17, %v8465_v47  ;;  %v8390_v53 = vadd.f32 %v10857_v29, %v10109_v21  ;;  %v8381_v30 = vpop.f32.mrf.mxu1 }
0x1b13   :  { %v11380_v60 = vpop.eup %11379  ;;  %11391 = vtanh.f32 %v8481_v51  ;;  %vm8447_vm15 = vcmp.gt.f32.partialorder %v8431_v24, 0.0  ;;  %v8463_v62 = vmul.f32 0.1, %v8431_v24  ;;  %vm8450_vm0 = vcmp.gt.f32.partialorder %v8434_v25, 0.0 }
0x1b14   :  { %8506 = vst [vmem:[#allocation8 + $0x18] sm:$0xff] %v11380_v60  ;;  %v8466_v63 = vmul.f32 0.1, %v8434_v25  ;;  %v8432_v31 = vadd.f32 %v12269_v56, %v8411_v26  ;;  %v8416_v41 = vmul.f32 %v12267_v4, %v8390_v53  ;;  %v8382_v2 = vadd.f32 %v10103_v52, %v8381_v30  ;;  %v10858_v50 = vpop.f32.mrf.mxu1 }
0x1b15   :  { %v8479_v0 = vsel %vm8447_vm15, %v8431_v24, %v8463_v62  ;;  %v8393_v1 = vadd.f32 %v10858_v50, %v10112_v28 }
0x1b16   :  { %v11382_v27 = vpop.eup %11381  ;;  %11393 = vtanh.f32 %v8479_v0  ;;  %v8482_v40 = vsel %vm8450_vm0, %v8434_v25, %v8466_v63  ;;  %vm8448_vm1 = vcmp.gt.f32.partialorder %v8432_v31, 0.0  ;;  %v8464_v42 = vmul.f32 0.1, %v8432_v31  ;;  %v8384_v43 = vpop.f32.mrf.mxu1 }
0x1b17   :  { %8504 = vst [vmem:[#allocation8 + $0x8] sm:$0xff] %v11382_v27  ;;  %11395 = vtanh.f32 %v8482_v40  ;;  %v8437_v11 = vadd.f32 %v12269_v56, %v8416_v41  ;;  %v8414_v6 = vmul.f32 %v12267_v4, %v8382_v2  ;;  %v8417_v8 = vmul.f32 %v12267_v4, %v8393_v1 }
0x1b18   :  { %v11384_v45 = vpop.eup %11383  ;;  %v8480_v3 = vsel %vm8448_vm1, %v8432_v31, %v8464_v42  ;;  %v8385_v55 = vadd.f32 %v10106_v54, %v8384_v43 }
0x1b19   :  { %v11386_v34 = vpop.eup %11385  ;;  %8509 = vst [vmem:[#allocation8 + $0x30] sm:$0xff] %v11384_v45  ;;  %11397 = vtanh.f32 %v8480_v3  ;;  %vm8453_vm2 = vcmp.gt.f32.partialorder %v8437_v11, 0.0  ;;  %v8469_v9 = vmul.f32 0.1, %v8437_v11  ;;  %v8435_v12 = vadd.f32 %v12269_v56, %v8414_v6 }
0x1b1a   :  { %8507 = vst [vmem:[#allocation8 + $0x20] sm:$0xff] %v11386_v34  ;;  %v8438_v44 = vadd.f32 %v12269_v56, %v8417_v8  ;;  %v8415_v37 = vmul.f32 %v12267_v4, %v8385_v55 }
0x1b1b   :  { %v11388_v57 = vpop.eup %11387  ;;  %v8485_v13 = vsel %vm8453_vm2, %v8437_v11, %v8469_v9  ;;  %vm8451_vm3 = vcmp.gt.f32.partialorder %v8435_v12, 0.0  ;;  %v8467_v58 = vmul.f32 0.1, %v8435_v12 }
0x1b1c   :  { %8510 = vst [vmem:[#allocation8 + $0x38] sm:$0xff] %v11388_v57  ;;  %11399 = vtanh.f32 %v8485_v13  ;;  %vm8454_vm4 = vcmp.gt.f32.partialorder %v8438_v44, 0.0  ;;  %v8470_v46 = vmul.f32 0.1, %v8438_v44  ;;  %v8436_v61 = vadd.f32 %v12269_v56, %v8415_v37 }
0x1b1d   :  { %v8483_v10 = vsel %vm8451_vm3, %v8435_v12, %v8467_v58 }
0x1b1e   :  { %v11390_v36 = vpop.eup %11389  ;;  %11401 = vtanh.f32 %v8483_v10  ;;  %v8486_v59 = vsel %vm8454_vm4, %v8438_v44, %v8470_v46  ;;  %vm8452_vm5 = vcmp.gt.f32.partialorder %v8436_v61, 0.0  ;;  %v8468_v14 = vmul.f32 0.1, %v8436_v61 }
0x1b1f   :  { %8508 = vst [vmem:[#allocation8 + $0x28] sm:$0xff] %v11390_v36  ;;  %11403 = vtanh.f32 %v8486_v59 }
0x1b20   :  { %v11392_v48 = vpop.eup %11391  ;;  %v8484_v4 = vsel %vm8452_vm5, %v8436_v61, %v8468_v14 }
0x1b21   :  { %8513 = vst [vmem:[#allocation8 + $0x50] sm:$0xff] %v11392_v48  ;;  %11405 = vtanh.f32 %v8484_v4 }
0x1b23   :  { %v11394_v32 = vpop.eup %11393 }
0x1b24   :  { %v11396_v7 = vpop.eup %11395  ;;  %8511 = vst [vmem:[#allocation8 + $0x40] sm:$0xff] %v11394_v32 }
0x1b25   :  { %8514 = vst [vmem:[#allocation8 + $0x58] sm:$0xff] %v11396_v7 }
0x1b26   :  { %v11398_v15 = vpop.eup %11397 }
0x1b27   :  { %8512 = vst [vmem:[#allocation8 + $0x48] sm:$0xff] %v11398_v15 }
0x1b29   :  { %v11400_v5 = vpop.eup %11399 }
0x1b2a   :  { %8517 = vst [vmem:[#allocation8 + $0x70] sm:$0xff] %v11400_v5 }
0x1b2b   :  { %v11402_v56 = vpop.eup %11401 }
0x1b2c   :  { %v11404_v38 = vpop.eup %11403  ;;  %8515 = vst [vmem:[#allocation8 + $0x60] sm:$0xff] %v11402_v56 }
0x1b2d   :  { %8518 = vst [vmem:[#allocation8 + $0x78] sm:$0xff] %v11404_v38 }
0x1b2e   :  { %v11406_v33 = vpop.eup %11405 }
0x1b2f   :  { %8516 = vst [vmem:[#allocation8 + $0x68] sm:$0xff] %v11406_v33 }
0x1b30   :  { %11478 = shalt.err (!%p11475_p5)
}
0x1b31   :  { %s11503_s1 = smov 128   ;;  %s11504_s23 = smov 8  }
0x1b32   :  { %8530 = dma.vmem_to_hbm [thread:$0]  %s8525_s21, 2048, %s12331_s8, [#allocation4], %s11503_s1, %s11503_s1, %s11504_s23  }
0x1b33   :  { %11491 = dma.done.wait [#allocation4], 2048  }
0x1b34   :  { %11492 = vsyncadd [#allocation4], 4294965248 }
0x1b35   :  { %8534 = vsyncpa [#allocation3], 1 }
0x1b36   :  { %8535 = vsyncpa [#allocation6], 1 }
0x1b37   :  { %8536 = vsyncpa [#allocation4], 1 }

</bundles_post_ra>
